<compile_context>
chip_gen: v7x
topology: tpu7x:2x2x1
jax: 0.10.0
libtpu: 0.0.40
codegen_flags: <defaults>
</compile_context>

<pallas_src>
import functools
import math

import jax
import jax.numpy as jnp
from jax import lax
from jax.experimental import pallas as pl
from jax.experimental.pallas import tpu as pltpu

_LN_EPS = 1e-5
_NEG_FILL = -1e30          # finite mask fill: exp underflows to 0 exactly, no NaN risk


# ----------------------------------------------------------------------------- helpers

def _largest_tile(n, target, mult):
    """Largest divisor of n that is <= target and a multiple of `mult`; falls back to n
    (full extent), so every BlockSpec satisfies the (8,128)-or-full-dim rule exactly."""
    for cand in range(min(n, target), 0, -1):
        if n % cand == 0 and cand % mult == 0:
            return cand
    return n


def _compiler_params(sem, working_bytes=None):
    kwargs = dict(dimension_semantics=sem)
    if working_bytes is not None:
        # never tighter than any generation's default scoped limit; generous headroom.
        kwargs["vmem_limit_bytes"] = int(min(max(int(working_bytes) + (16 << 20), 32 << 20),
                                             128 << 20))
    return pltpu.CompilerParams(**kwargs)


# ----------------------------------------------------------------------------- in-kernel math

def _erf(x):
    # Abramowitz & Stegun 7.1.26 rational approximation (|err| <= 1.5e-7): exact-erf GELU
    # without relying on a lax.erf Mosaic lowering.
    a1, a2, a3, a4, a5 = 0.254829592, -0.284496736, 1.421413741, -1.453152027, 1.061405429
    p = 0.3275911
    ax = jnp.abs(x)
    t = 1.0 / (1.0 + p * ax)
    poly = ((((a5 * t + a4) * t + a3) * t + a2) * t + a1) * t
    y = 1.0 - poly * jnp.exp(-ax * ax)
    return jnp.where(x >= 0.0, y, -y)


def _gelu_exact(x):
    return 0.5 * x * (1.0 + _erf(x * (1.0 / math.sqrt(2.0))))


def _layernorm(y, g, b, eps):
    mu = jnp.mean(y, axis=-1, keepdims=True)
    yc = y - mu
    var = jnp.mean(yc * yc, axis=-1, keepdims=True)          # biased var (torch LN)
    return yc * lax.rsqrt(var + eps) * g + b


def _mm(a, b, mm_dtype):
    # MXU matmul with selectable operand dtype and f32 accumulation.
    return jnp.dot(a.astype(mm_dtype), b.astype(mm_dtype),
                   preferred_element_type=jnp.float32)


# ----------------------------------------------------------------------------- kernels

def _embed_kernel(win_ref, xm_ref, wtok_ref, wt_ref, bt_ref, pos_ref, o_ref, *, mm_dtype):
    # fused DataEmbedding: circular-conv token matmul + temporal-feature matmul + positional
    win = win_ref[0].astype(jnp.float32)                     # (L, 3C) circular k=3 windows
    xm = xm_ref[0].astype(jnp.float32)                       # (L, Cm)
    out = _mm(win, wtok_ref[...], mm_dtype)                  # TokenEmbedding (no bias)
    out = out + _mm(xm, wt_ref[...], mm_dtype) + bt_ref[...].astype(jnp.float32)
    out = out + pos_ref[...].astype(jnp.float32)             # PositionalEmbedding
    o_ref[0] = out.astype(o_ref.dtype)                       # dropout(p=0) == identity


def _attn_res_ln_kernel(xq_ref, xkv_ref, wq_ref, bq_ref, wk_ref, bk_ref, wv_ref, bv_ref,
                        wo_ref, bo_ref, g_ref, beta_ref, o_ref,
                        *, n_heads, scale, causal, q_tile, eps, mm_dtype):
    # grid step = (batch element, query-row tile). QKV proj + per-head attention + heads
    # concatenated + ONE full-width output projection + residual + LayerNorm.
    xq = xq_ref[0].astype(jnp.float32)                       # (TQ, D)
    xkv = xkv_ref[0].astype(jnp.float32)                     # (S, D)
    TQ, D = xq.shape
    S = xkv.shape[0]
    dk = D // n_heads

    # full-width projections: contraction depth D, output width D -> full MXU utilization.
    q = _mm(xq, wq_ref[...], mm_dtype) + bq_ref[...].astype(jnp.float32)    # (TQ, D)
    k = _mm(xkv, wk_ref[...], mm_dtype) + bk_ref[...].astype(jnp.float32)   # (S, D)
    v = _mm(xkv, wv_ref[...], mm_dtype) + bv_ref[...].astype(jnp.float32)   # (S, D)

    if causal:
        row0 = pl.program_id(1) * q_tile
        row = row0 + lax.broadcasted_iota(jnp.int32, (TQ, S), 0)
        col = lax.broadcasted_iota(jnp.int32, (TQ, S), 1)
        cmask = col > row

    heads = []
    for h in range(n_heads):                                 # static unroll
        qh = q[:, h * dk:(h + 1) * dk]
        kh = k[:, h * dk:(h + 1) * dk]
        vh = v[:, h * dk:(h + 1) * dk]
        # contract on the feature axis directly: no k.T / XLU transpose.
        s = lax.dot_general(qh.astype(mm_dtype), kh.astype(mm_dtype),
                            (((1,), (1,)), ((), ())),
                            preferred_element_type=jnp.float32)             # (TQ, S)
        if causal:
            s = jnp.where(cmask, _NEG_FILL, s)               # mask before scale (ref order)
        s = s * scale
        m = jnp.max(s, axis=-1, keepdims=True)
        p = jnp.exp(s - m)
        a = p * pl.reciprocal(jnp.sum(p, axis=-1, keepdims=True), approx=True)
        heads.append(_mm(a, vh, mm_dtype))                   # (TQ, dk)
    o_cat = jnp.concatenate(heads, axis=-1)                  # (TQ, D) head-concatenated ctx
    # single full-depth output projection (contraction D, not dk).
    y = xq + _mm(o_cat, wo_ref[...], mm_dtype) + bo_ref[...].astype(jnp.float32)
    o_ref[0] = _layernorm(y, g_ref[...].astype(jnp.float32),
                          beta_ref[...].astype(jnp.float32), eps).astype(o_ref.dtype)


def _ffn_res_ln_kernel(x_ref, w1_ref, b1_ref, w2_ref, b2_ref, g_ref, beta_ref, *rest,
                       final_ln, eps, mm_dtype):
    # d_ff (F) is a reduction grid axis: per f-tile compute GELU(x@w1_tile) @ w2_tile into a
    # VMEM f32 accumulator; residual + LayerNorm (+ optional fused final stack LN) epilogue.
    if final_ln:
        g2_ref, beta2_ref, o_ref, acc_ref = rest
    else:
        o_ref, acc_ref = rest

    f = pl.program_id(1)

    @pl.when(f == 0)
    def _():
        acc_ref[...] = jnp.zeros_like(acc_ref)

    x = x_ref[...].astype(jnp.float32)                                       # (TM, D)
    h = _mm(x, w1_ref[...], mm_dtype) + b1_ref[...].astype(jnp.float32)      # (TM, TF)
    h = _gelu_exact(h)
    acc_ref[...] += _mm(h, w2_ref[...], mm_dtype)                            # (TM, D)

    @pl.when(f == pl.num_programs(1) - 1)
    def _():
        y = x + acc_ref[...] + b2_ref[...].astype(jnp.float32)               # residual
        y = _layernorm(y, g_ref[...].astype(jnp.float32),
                       beta_ref[...].astype(jnp.float32), eps)
        if final_ln:                                         # fused final encoder/decoder LN
            y = _layernorm(y, g2_ref[...].astype(jnp.float32),
                           beta2_ref[...].astype(jnp.float32), eps)
        o_ref[...] = y.astype(o_ref.dtype)


def _linear_kernel(x_ref, w_ref, b_ref, o_ref, *, mm_dtype):
    acc = _mm(x_ref[...], w_ref[...], mm_dtype)
    o_ref[...] = (acc + b_ref[...].astype(jnp.float32)).astype(o_ref.dtype)


# ----------------------------------------------------------------------------- wrappers

def linear(x2d, w, b, *, mm_dtype):
    """x2d: (M, K) @ w: (K, N) + b: (N,), tiled over M rows."""
    M, K = x2d.shape
    N = w.shape[1]
    TM = _largest_tile(M, 256, 8)
    return pl.pallas_call(
        functools.partial(_linear_kernel, mm_dtype=mm_dtype),
        out_shape=jax.ShapeDtypeStruct((M, N), x2d.dtype),
        grid=(M // TM,),
        in_specs=[
            pl.BlockSpec((TM, K), lambda i: (i, 0)),
            pl.BlockSpec((K, N), lambda i: (0, 0)),
            pl.BlockSpec((1, N), lambda i: (0, 0)),
        ],
        out_specs=pl.BlockSpec((TM, N), lambda i: (i, 0)),
        compiler_params=_compiler_params(("parallel",)),
    )(x2d, w.astype(mm_dtype), b.reshape(1, N))


def attention_res_ln(p, xq, xkv, *, n_heads, causal, gamma, beta, mm_dtype):
    """Fused attention sub-layer: LayerNorm(xq + OutProj(MHA(xq, xkv, xkv)))."""
    B, L, D = xq.shape
    S = xkv.shape[1]
    assert D % n_heads == 0
    dk = D // n_heads
    scale = 1.0 / math.sqrt(dk)
    TQ = _largest_tile(L, 256, 8)
    nq = L // TQ
    wb = jnp.dtype(mm_dtype).itemsize
    ab = jnp.dtype(xq.dtype).itemsize

    flops = 2 * B * (L * D * D                 # Q projection
                     + 2 * nq * S * D * D      # K/V projections (recomputed per q tile)
                     + 2 * L * S * D           # scores + context over all heads
                     + L * D * D)              # output projection
    bytes_acc = (ab * (2 * B * L * D + B * nq * S * D)
                 + wb * 4 * D * D + 4 * 6 * D
                 + 4 * B * n_heads * L * S)    # per-head score traffic
    working = (2 * (ab * (2 * TQ * D + S * D) + wb * 4 * D * D + 4 * 6 * D)
               + 4 * ((TQ + 2 * S) * D + 4 * TQ * S + 2 * TQ * D))

    wspec = pl.BlockSpec((D, D), lambda b, t: (0, 0))
    bspec = pl.BlockSpec((1, D), lambda b, t: (0, 0))
    cast = lambda w: w.astype(mm_dtype)        # pre-cast weights in HBM (halves weight DMA)
    return pl.pallas_call(
        functools.partial(_attn_res_ln_kernel, n_heads=n_heads, scale=scale, causal=causal,
                          q_tile=TQ, eps=_LN_EPS, mm_dtype=mm_dtype),
        out_shape=jax.ShapeDtypeStruct((B, L, D), xq.dtype),
        grid=(B, nq),
        in_specs=[
            pl.BlockSpec((1, TQ, D), lambda b, t: (b, t, 0)),
            pl.BlockSpec((1, S, D), lambda b, t: (b, 0, 0)),
            wspec, bspec, wspec, bspec, wspec, bspec, wspec, bspec,
            bspec, bspec,
        ],
        out_specs=pl.BlockSpec((1, TQ, D), lambda b, t: (b, t, 0)),
        compiler_params=_compiler_params(("parallel", "parallel"), working),
        cost_estimate=pl.CostEstimate(flops=int(flops), transcendentals=int(B * n_heads * L * S),
                                      bytes_accessed=int(bytes_acc)),
    )(xq, xkv,
      cast(p["wq"]), p["bq"].reshape(1, D), cast(p["wk"]), p["bk"].reshape(1, D),
      cast(p["wv"]), p["bv"].reshape(1, D), cast(p["wo"]), p["bo"].reshape(1, D),
      gamma.reshape(1, D), beta.reshape(1, D))


def ffn_res_ln(p, x, *, gamma, beta, mm_dtype, final_gamma=None, final_beta=None):
    """Fused FFN sub-layer: LayerNorm(x + conv2(GELU(conv1(x)))); d_ff tiled as a reduction
    axis; optionally fuses the stack's final LayerNorm into the epilogue."""
    B, L, D = x.shape
    F = p["conv1_w"].shape[1]
    M = B * L
    x2 = x.reshape(M, D)
    TM = _largest_tile(M, 256, 8)
    TF = _largest_tile(F, 512, 128)
    nf = F // TF
    final_ln = final_gamma is not None
    wb = jnp.dtype(mm_dtype).itemsize
    ab = jnp.dtype(x.dtype).itemsize

    flops = 4 * M * D * F
    bytes_acc = ab * 2 * M * D + wb * 2 * D * F + 4 * (F + 3 * D) + 4 * M * F
    working = (2 * (ab * 2 * TM * D + wb * 2 * D * TF + 4 * (TF + 3 * D))
               + 4 * (2 * TM * TF + 3 * TM * D))

    in_specs = [
        pl.BlockSpec((TM, D), lambda i, f: (i, 0)),
        pl.BlockSpec((D, TF), lambda i, f: (0, f)),
        pl.BlockSpec((1, TF), lambda i, f: (0, f)),
        pl.BlockSpec((TF, D), lambda i, f: (f, 0)),
        pl.BlockSpec((1, D), lambda i, f: (0, 0)),
        pl.BlockSpec((1, D), lambda i, f: (0, 0)),
        pl.BlockSpec((1, D), lambda i, f: (0, 0)),
    ]
    args = [x2, p["conv1_w"].astype(mm_dtype), p["conv1_b"].reshape(1, F),
            p["conv2_w"].astype(mm_dtype), p["conv2_b"].reshape(1, D),
            gamma.reshape(1, D), beta.reshape(1, D)]
    if final_ln:
        in_specs += [pl.BlockSpec((1, D), lambda i, f: (0, 0)),
                     pl.BlockSpec((1, D), lambda i, f: (0, 0))]
        args += [final_gamma.reshape(1, D), final_beta.reshape(1, D)]

    out = pl.pallas_call(
        functools.partial(_ffn_res_ln_kernel, final_ln=final_ln, eps=_LN_EPS,
                          mm_dtype=mm_dtype),
        out_shape=jax.ShapeDtypeStruct((M, D), x.dtype),
        grid=(M // TM, nf),
        in_specs=in_specs,
        out_specs=pl.BlockSpec((TM, D), lambda i, f: (i, 0)),
        scratch_shapes=[pltpu.VMEM((TM, D), jnp.float32)],
        compiler_params=_compiler_params(("parallel", "arbitrary"), working),
        cost_estimate=pl.CostEstimate(flops=int(flops), transcendentals=int(M * F),
                                      bytes_accessed=int(bytes_acc)),
    )(*args)
    return out.reshape(B, L, D)


# ----------------------------------------------------------------------------- model pieces

def positional_embedding(L, d_model):
    position = jnp.arange(L, dtype=jnp.float32)[:, None]
    div_term = jnp.exp(jnp.arange(0, d_model, 2, dtype=jnp.float32)
                       * (-(math.log(10000.0) / d_model)))
    pe = jnp.zeros((L, d_model), jnp.float32)
    pe = pe.at[:, 0::2].set(jnp.sin(position * div_term))
    pe = pe.at[:, 1::2].set(jnp.cos(position * div_term))
    return pe


def data_embedding(p, x, x_mark, *, mm_dtype):
    """Fused TokenEmbedding (circular Conv1d k=3, no bias) + Positional + TimeFeature emb."""
    B, L, C = x.shape
    Cm = x_mark.shape[-1]
    D = p["token_w"].shape[1]
    # circular-pad window gather (3*C per token, negligible vs the d_model-wide output).
    xpad = jnp.concatenate([x[:, -1:, :], x, x[:, :1, :]], axis=1)           # (B, L+2, C)
    win = jnp.concatenate([xpad[:, k:k + L, :] for k in range(3)], axis=-1)  # (B, L, 3C)
    pos = positional_embedding(L, D).astype(x.dtype)
    return pl.pallas_call(
        functools.partial(_embed_kernel, mm_dtype=mm_dtype),
        out_shape=jax.ShapeDtypeStruct((B, L, D), x.dtype),
        grid=(B,),
        in_specs=[
            pl.BlockSpec((1, L, 3 * C), lambda b: (b, 0, 0)),
            pl.BlockSpec((1, L, Cm), lambda b: (b, 0, 0)),
            pl.BlockSpec((3 * C, D), lambda b: (0, 0)),
            pl.BlockSpec((Cm, D), lambda b: (0, 0)),
            pl.BlockSpec((1, D), lambda b: (0, 0)),
            pl.BlockSpec((L, D), lambda b: (0, 0)),
        ],
        out_specs=pl.BlockSpec((1, L, D), lambda b: (b, 0, 0)),
        compiler_params=_compiler_params(("parallel",)),
    )(win, x_mark, p["token_w"].astype(mm_dtype), p["temp_w"].astype(mm_dtype),
      p["temp_b"].reshape(1, D), pos)


def encoder(p, x, *, n_heads, mm_dtype):
    layers = p["layers"]
    for li, lp in enumerate(layers):
        last = li == len(layers) - 1
        x = attention_res_ln(lp["attn"], x, x, n_heads=n_heads, causal=False,
                             gamma=lp["norm1_g"], beta=lp["norm1_b"], mm_dtype=mm_dtype)
        x = ffn_res_ln(lp, x, gamma=lp["norm2_g"], beta=lp["norm2_b"], mm_dtype=mm_dtype,
                       final_gamma=p["norm_g"] if last else None,
                       final_beta=p["norm_b"] if last else None)
    return x


def decoder(p, x, cross, *, n_heads, mm_dtype):
    layers = p["layers"]
    for li, lp in enumerate(layers):
        last = li == len(layers) - 1
        x = attention_res_ln(lp["self_attn"], x, x, n_heads=n_heads, causal=True,
                             gamma=lp["norm1_g"], beta=lp["norm1_b"], mm_dtype=mm_dtype)
        x = attention_res_ln(lp["cross_attn"], x, cross, n_heads=n_heads, causal=False,
                             gamma=lp["norm2_g"], beta=lp["norm2_b"], mm_dtype=mm_dtype)
        x = ffn_res_ln(lp, x, gamma=lp["norm3_g"], beta=lp["norm3_b"], mm_dtype=mm_dtype,
                       final_gamma=p["norm_g"] if last else None,
                       final_beta=p["norm_b"] if last else None)
    return x


def informer_forward(params, x_enc, x_mark_enc, x_dec, x_mark_dec,
                     *, pred_len, n_heads, matmul_dtype=jnp.bfloat16, run_encoder=False):
    """matmul_dtype=bfloat16: bf16 MXU operands / f32 accumulation (native v6e/v7x path);
    pass jnp.float32 to reproduce f32 reference numerics bit-for-bit in the matmuls."""
    enc_emb = data_embedding(params["enc_emb"], x_enc, x_mark_enc, mm_dtype=matmul_dtype)
    # The reference forward feeds the *encoder embedding* (not the encoder output) to the
    # decoder cross-attention, and with outputAttention=False the encoder output is never
    # used, so the encoder stack is dead code (XLA prunes it under jit).  The returned
    # values are identical whether or not it runs; it is skipped by default.
    if run_encoder:
        _ = encoder(params["encoder"], enc_emb, n_heads=n_heads, mm_dtype=matmul_dtype)
    dec_emb = data_embedding(params["dec_emb"], x_dec, x_mark_dec, mm_dtype=matmul_dtype)
    dec_out = decoder(params["decoder"], dec_emb, enc_emb,
                      n_heads=n_heads, mm_dtype=matmul_dtype)
    # projection is row-wise, so projecting only the pred_len tail == proj(dec_out)[:, -p:]
    B, _, D = dec_out.shape
    tail = dec_out[:, -pred_len:, :]
    proj = linear(tail.reshape(B * pred_len, D), params["proj_w"], params["proj_b"],
                  mm_dtype=matmul_dtype)
    return proj.reshape(B, pred_len, -1)


# ----------------------------------------------------------------------------- params

def init_params(key, *, enc_in, dec_in, c_out, d_model, n_heads, d_ff,
                e_layers, d_layers, freq_dim=4):
    keys = iter(jax.random.split(key, 512))

    def nk():
        return next(keys)

    def lin(fan_in, fan_out):
        k1, k2 = jax.random.split(nk())
        w = jax.random.normal(k1, (fan_in, fan_out), jnp.float32) / math.sqrt(fan_in)
        b = jax.random.normal(k2, (fan_out,), jnp.float32) * 0.02
        return w, b

    def attn_p():
        wq, bq = lin(d_model, d_model)
        wk, bk = lin(d_model, d_model)
        wv, bv = lin(d_model, d_model)
        wo, bo = lin(d_model, d_model)
        return dict(wq=wq, bq=bq, wk=wk, bk=bk, wv=wv, bv=bv, wo=wo, bo=bo)

    def ln_p():
        return jnp.ones((d_model,), jnp.float32), jnp.zeros((d_model,), jnp.float32)

    def emb_p(c_in):
        token_w = jax.random.normal(nk(), (3 * c_in, d_model), jnp.float32) / math.sqrt(3 * c_in)
        temp_w, temp_b = lin(freq_dim, d_model)
        return dict(token_w=token_w, temp_w=temp_w, temp_b=temp_b)

    def enc_layer_p():
        c1w, c1b = lin(d_model, d_ff)
        c2w, c2b = lin(d_ff, d_model)
        n1g, n1b = ln_p()
        n2g, n2b = ln_p()
        return dict(attn=attn_p(), conv1_w=c1w, conv1_b=c1b, conv2_w=c2w, conv2_b=c2b,
                    norm1_g=n1g, norm1_b=n1b, norm2_g=n2g, norm2_b=n2b)

    def dec_layer_p():
        c1w, c1b = lin(d_model, d_ff)
        c2w, c2b = lin(d_ff, d_model)
        n1g, n1b = ln_p()
        n2g, n2b = ln_p()
        n3g, n3b = ln_p()
        return dict(self_attn=attn_p(), cross_attn=attn_p(),
                    conv1_w=c1w, conv1_b=c1b, conv2_w=c2w, conv2_b=c2b,
                    norm1_g=n1g, norm1_b=n1b, norm2_g=n2g, norm2_b=n2b,
                    norm3_g=n3g, norm3_b=n3b)

    enc_ng, enc_nb = ln_p()
    dec_ng, dec_nb = ln_p()
    proj_w, proj_b = lin(d_model, c_out)
    return dict(
        enc_emb=emb_p(enc_in),
        dec_emb=emb_p(dec_in),
        encoder=dict(layers=[enc_layer_p() for _ in range(e_layers)],
                     norm_g=enc_ng, norm_b=enc_nb),
        decoder=dict(layers=[dec_layer_p() for _ in range(d_layers)],
                     norm_g=dec_ng, norm_b=dec_nb),
        proj_w=proj_w, proj_b=proj_b,
    )


# ----------------------------------------------------------------------------- main

if __name__ == "__main__":
    # small, module-consistent shapes (d_model/c_out are sub-128 here, so demo stores are
    # masked vst.msk; production shapes should keep d_model a multiple of 128).
    B = 2
    seq_len, label_len, out_len = 16, 8, 8
    enc_in, dec_in, c_out = 4, 4, 4
    d_model, n_heads, d_ff = 32, 4, 64
    e_layers, d_layers = 2, 2

    key = jax.random.PRNGKey(0)
    kp, k1, k2, k3, k4 = jax.random.split(key, 5)
    params = init_params(kp, enc_in=enc_in, dec_in=dec_in, c_out=c_out,
                         d_model=d_model, n_heads=n_heads, d_ff=d_ff,
                         e_layers=e_layers, d_layers=d_layers, freq_dim=4)

    x_enc = jax.random.normal(k1, (B, seq_len, enc_in), jnp.float32)
    x_mark_enc = jax.random.normal(k2, (B, seq_len, 4), jnp.float32)
    x_dec = jax.random.normal(k3, (B, label_len + out_len, dec_in), jnp.float32)
    x_mark_dec = jax.random.normal(k4, (B, label_len + out_len, 4), jnp.float32)

    fwd = jax.jit(functools.partial(informer_forward,
                                    pred_len=out_len, n_heads=n_heads,
                                    matmul_dtype=jnp.bfloat16))
    out = fwd(params, x_enc, x_mark_enc, x_dec, x_mark_dec)
    out = jax.block_until_ready(out)

    assert out.shape == (B, out_len, c_out), out.shape
    assert bool(jnp.all(jnp.isfinite(out)))
    print("KERNEL_OK")
</pallas_src>

<mosaic_0001>
module attributes {stable_mosaic.version = 11 : i64} {
  func.func @_embed_kernel(%arg0: i32, %arg1: memref<1x16x12xf32, #tpu.memory_space<vmem>>, %arg2: memref<1x16x4xf32, #tpu.memory_space<vmem>>, %arg3: memref<12x32xbf16, #tpu.memory_space<vmem>>, %arg4: memref<4x32xbf16, #tpu.memory_space<vmem>>, %arg5: memref<1x32xf32, #tpu.memory_space<vmem>>, %arg6: memref<16x32xf32, #tpu.memory_space<vmem>>, %arg7: memref<1x16x32xf32, #tpu.memory_space<vmem>>) attributes {dimension_semantics = [#tpu.dimension_semantics<parallel>], iteration_bounds = array<i64: 2>, scalar_prefetch = 0 : i64, scratch_operands = 0 : i64, tpu.core_type = #tpu.core_type<tc>, window_params = [{transform_indices = @transform_0, window_bounds = array<i64: 1, 16, 12>}, {transform_indices = @transform_1, window_bounds = array<i64: 1, 16, 4>}, {pipeline_mode = #tpu.pipeline_mode<synchronous>, transform_indices = @transform_2, window_bounds = array<i64: 12, 32>}, {pipeline_mode = #tpu.pipeline_mode<synchronous>, transform_indices = @transform_3, window_bounds = array<i64: 4, 32>}, {pipeline_mode = #tpu.pipeline_mode<synchronous>, transform_indices = @transform_4, window_bounds = array<i64: 1, 32>}, {pipeline_mode = #tpu.pipeline_mode<synchronous>, transform_indices = @transform_5, window_bounds = array<i64: 16, 32>}, {transform_indices = @transform_6, window_bounds = array<i64: 1, 16, 32>}]} {
    %c0 = arith.constant 0 : index
    %c0_0 = arith.constant 0 : index
    %c0_1 = arith.constant 0 : index
    %0 = vector.load %arg1[%c0, %c0_0, %c0_1] : memref<1x16x12xf32, #tpu.memory_space<vmem>>, vector<1x16x12xf32>
    %1 = vector.shape_cast %0 : vector<1x16x12xf32> to vector<16x12xf32>
    %c0_2 = arith.constant 0 : index
    %c0_3 = arith.constant 0 : index
    %c0_4 = arith.constant 0 : index
    %2 = vector.load %arg2[%c0_2, %c0_3, %c0_4] : memref<1x16x4xf32, #tpu.memory_space<vmem>>, vector<1x16x4xf32>
    %3 = vector.shape_cast %2 : vector<1x16x4xf32> to vector<16x4xf32>
    %c0_5 = arith.constant 0 : index
    %c0_6 = arith.constant 0 : index
    %4 = vector.load %arg3[%c0_5, %c0_6] : memref<12x32xbf16, #tpu.memory_space<vmem>>, vector<12x32xbf16>
    %5 = arith.truncf %1 : vector<16x12xf32> to vector<16x12xbf16>
    %cst = arith.constant dense<0.000000e+00> : vector<16x32xf32>
    %6 = tpu.matmul %5, %4, %cst {dimension_numbers = #tpu.dot_dimension_numbers<[1], [0], [0], [1], [0, 0, 1, 1], [], []>} : vector<16x12xbf16>, vector<12x32xbf16>, vector<16x32xf32> -> vector<16x32xf32>
    %c0_7 = arith.constant 0 : index
    %c0_8 = arith.constant 0 : index
    %7 = vector.load %arg4[%c0_7, %c0_8] : memref<4x32xbf16, #tpu.memory_space<vmem>>, vector<4x32xbf16>
    %8 = arith.truncf %3 : vector<16x4xf32> to vector<16x4xbf16>
    %cst_9 = arith.constant dense<0.000000e+00> : vector<16x32xf32>
    %9 = tpu.matmul %8, %7, %cst_9 {dimension_numbers = #tpu.dot_dimension_numbers<[1], [0], [0], [1], [0, 0, 1, 1], [], []>} : vector<16x4xbf16>, vector<4x32xbf16>, vector<16x32xf32> -> vector<16x32xf32>
    %10 = arith.addf %6, %9 : vector<16x32xf32>
    %c0_10 = arith.constant 0 : index
    %c0_11 = arith.constant 0 : index
    %11 = vector.load %arg5[%c0_10, %c0_11] : memref<1x32xf32, #tpu.memory_space<vmem>>, vector<1x32xf32>
    %12 = vector.broadcast %11 : vector<1x32xf32> to vector<16x32xf32>
    %13 = arith.addf %10, %12 : vector<16x32xf32>
    %c0_12 = arith.constant 0 : index
    %c0_13 = arith.constant 0 : index
    %14 = vector.load %arg6[%c0_12, %c0_13] : memref<16x32xf32, #tpu.memory_space<vmem>>, vector<16x32xf32>
    %15 = arith.addf %13, %14 : vector<16x32xf32>
    %c0_14 = arith.constant 0 : index
    %c0_15 = arith.constant 0 : index
    %c0_16 = arith.constant 0 : index
    %16 = vector.load %arg7[%c0_14, %c0_15, %c0_16] : memref<1x16x32xf32, #tpu.memory_space<vmem>>, vector<1x16x32xf32>
    %17 = vector.shape_cast %16 : vector<1x16x32xf32> to vector<16x32xf32>
    %18 = vector.shape_cast %15 : vector<16x32xf32> to vector<1x16x32xf32>
    tpu.vector_store %arg7[%c0_14, %c0_15, %c0_16], %18 {strides = array<i32>} : memref<1x16x32xf32, #tpu.memory_space<vmem>>, vector<1x16x32xf32>,
    return
  }
  func.func @transform_0(%arg0: i32) -> (i32, i32, i32) {
    %c0_i32 = arith.constant 0 : i32
    %c0_i32_0 = arith.constant 0 : i32
    %c0_i32_1 = arith.constant 0 : i32
    return %arg0, %c0_i32, %c0_i32_0 : i32, i32, i32
  }
  func.func @transform_1(%arg0: i32) -> (i32, i32, i32) {
    %c0_i32 = arith.constant 0 : i32
    %c0_i32_0 = arith.constant 0 : i32
    %c0_i32_1 = arith.constant 0 : i32
    return %arg0, %c0_i32, %c0_i32_0 : i32, i32, i32
  }
  func.func @transform_2(%arg0: i32) -> (i32, i32) {
    %c0_i32 = arith.constant 0 : i32
    %c0_i32_0 = arith.constant 0 : i32
    %c0_i32_1 = arith.constant 0 : i32
    return %c0_i32, %c0_i32_0 : i32, i32
  }
  func.func @transform_3(%arg0: i32) -> (i32, i32) {
    %c0_i32 = arith.constant 0 : i32
    %c0_i32_0 = arith.constant 0 : i32
    %c0_i32_1 = arith.constant 0 : i32
    return %c0_i32, %c0_i32_0 : i32, i32
  }
  func.func @transform_4(%arg0: i32) -> (i32, i32) {
    %c0_i32 = arith.constant 0 : i32
    %c0_i32_0 = arith.constant 0 : i32
    %c0_i32_1 = arith.constant 0 : i32
    return %c0_i32, %c0_i32_0 : i32, i32
  }
  func.func @transform_5(%arg0: i32) -> (i32, i32) {
    %c0_i32 = arith.constant 0 : i32
    %c0_i32_0 = arith.constant 0 : i32
    %c0_i32_1 = arith.constant 0 : i32
    return %c0_i32, %c0_i32_0 : i32, i32
  }
  func.func @transform_6(%arg0: i32) -> (i32, i32, i32) {
    %c0_i32 = arith.constant 0 : i32
    %c0_i32_0 = arith.constant 0 : i32
    %c0_i32_1 = arith.constant 0 : i32
    return %arg0, %c0_i32, %c0_i32_0 : i32, i32, i32
  }
}

module attributes {stable_mosaic.version = 11 : i64} {
  func.func @_attn_res_ln_kernel(%arg0: i32, %arg1: i32, %arg2: memref<1x16x32xf32, #tpu.memory_space<vmem>>, %arg3: memref<1x16x32xf32, #tpu.memory_space<vmem>>, %arg4: memref<32x32xbf16, #tpu.memory_space<vmem>>, %arg5: memref<1x32xf32, #tpu.memory_space<vmem>>, %arg6: memref<32x32xbf16, #tpu.memory_space<vmem>>, %arg7: memref<1x32xf32, #tpu.memory_space<vmem>>, %arg8: memref<32x32xbf16, #tpu.memory_space<vmem>>, %arg9: memref<1x32xf32, #tpu.memory_space<vmem>>, %arg10: memref<32x32xbf16, #tpu.memory_space<vmem>>, %arg11: memref<1x32xf32, #tpu.memory_space<vmem>>, %arg12: memref<1x32xf32, #tpu.memory_space<vmem>>, %arg13: memref<1x32xf32, #tpu.memory_space<vmem>>, %arg14: memref<1x16x32xf32, #tpu.memory_space<vmem>>) attributes {dimension_semantics = [#tpu.dimension_semantics<parallel>, #tpu.dimension_semantics<parallel>], iteration_bounds = array<i64: 2, 1>, scalar_prefetch = 0 : i64, scratch_operands = 0 : i64, tpu.core_type = #tpu.core_type<tc>, window_params = [{transform_indices = @transform_0, window_bounds = array<i64: 1, 16, 32>}, {transform_indices = @transform_1, window_bounds = array<i64: 1, 16, 32>}, {pipeline_mode = #tpu.pipeline_mode<synchronous>, transform_indices = @transform_2, window_bounds = array<i64: 32, 32>}, {pipeline_mode = #tpu.pipeline_mode<synchronous>, transform_indices = @transform_3, window_bounds = array<i64: 1, 32>}, {pipeline_mode = #tpu.pipeline_mode<synchronous>, transform_indices = @transform_4, window_bounds = array<i64: 32, 32>}, {pipeline_mode = #tpu.pipeline_mode<synchronous>, transform_indices = @transform_5, window_bounds = array<i64: 1, 32>}, {pipeline_mode = #tpu.pipeline_mode<synchronous>, transform_indices = @transform_6, window_bounds = array<i64: 32, 32>}, {pipeline_mode = #tpu.pipeline_mode<synchronous>, transform_indices = @transform_7, window_bounds = array<i64: 1, 32>}, {pipeline_mode = #tpu.pipeline_mode<synchronous>, transform_indices = @transform_8, window_bounds = array<i64: 32, 32>}, {pipeline_mode = #tpu.pipeline_mode<synchronous>, transform_indices = @transform_9, window_bounds = array<i64: 1, 32>}, {pipeline_mode = #tpu.pipeline_mode<synchronous>, transform_indices = @transform_10, window_bounds = array<i64: 1, 32>}, {pipeline_mode = #tpu.pipeline_mode<synchronous>, transform_indices = @transform_11, window_bounds = array<i64: 1, 32>}, {transform_indices = @transform_12, window_bounds = array<i64: 1, 16, 32>}]} {
    %c0 = arith.constant 0 : index
    %c0_0 = arith.constant 0 : index
    %c0_1 = arith.constant 0 : index
    %0 = vector.load %arg2[%c0, %c0_0, %c0_1] : memref<1x16x32xf32, #tpu.memory_space<vmem>>, vector<1x16x32xf32>
    %1 = vector.shape_cast %0 : vector<1x16x32xf32> to vector<16x32xf32>
    %c0_2 = arith.constant 0 : index
    %c0_3 = arith.constant 0 : index
    %c0_4 = arith.constant 0 : index
    %2 = vector.load %arg3[%c0_2, %c0_3, %c0_4] : memref<1x16x32xf32, #tpu.memory_space<vmem>>, vector<1x16x32xf32>
    %3 = vector.shape_cast %2 : vector<1x16x32xf32> to vector<16x32xf32>
    %c0_5 = arith.constant 0 : index
    %c0_6 = arith.constant 0 : index
    %4 = vector.load %arg4[%c0_5, %c0_6] : memref<32x32xbf16, #tpu.memory_space<vmem>>, vector<32x32xbf16>
    %5 = arith.truncf %1 : vector<16x32xf32> to vector<16x32xbf16>
    %cst = arith.constant dense<0.000000e+00> : vector<16x32xf32>
    %6 = tpu.matmul %5, %4, %cst {dimension_numbers = #tpu.dot_dimension_numbers<[1], [0], [0], [1], [0, 0, 1, 1], [], []>} : vector<16x32xbf16>, vector<32x32xbf16>, vector<16x32xf32> -> vector<16x32xf32>
    %c0_7 = arith.constant 0 : index
    %c0_8 = arith.constant 0 : index
    %7 = vector.load %arg5[%c0_7, %c0_8] : memref<1x32xf32, #tpu.memory_space<vmem>>, vector<1x32xf32>
    %8 = vector.broadcast %7 : vector<1x32xf32> to vector<16x32xf32>
    %9 = arith.addf %6, %8 : vector<16x32xf32>
    %c0_9 = arith.constant 0 : index
    %c0_10 = arith.constant 0 : index
    %10 = vector.load %arg6[%c0_9, %c0_10] : memref<32x32xbf16, #tpu.memory_space<vmem>>, vector<32x32xbf16>
    %11 = arith.truncf %3 : vector<16x32xf32> to vector<16x32xbf16>
    %cst_11 = arith.constant dense<0.000000e+00> : vector<16x32xf32>
    %12 = tpu.matmul %11, %10, %cst_11 {dimension_numbers = #tpu.dot_dimension_numbers<[1], [0], [0], [1], [0, 0, 1, 1], [], []>} : vector<16x32xbf16>, vector<32x32xbf16>, vector<16x32xf32> -> vector<16x32xf32>
    %c0_12 = arith.constant 0 : index
    %c0_13 = arith.constant 0 : index
    %13 = vector.load %arg7[%c0_12, %c0_13] : memref<1x32xf32, #tpu.memory_space<vmem>>, vector<1x32xf32>
    %14 = vector.broadcast %13 : vector<1x32xf32> to vector<16x32xf32>
    %15 = arith.addf %12, %14 : vector<16x32xf32>
    %c0_14 = arith.constant 0 : index
    %c0_15 = arith.constant 0 : index
    %16 = vector.load %arg8[%c0_14, %c0_15] : memref<32x32xbf16, #tpu.memory_space<vmem>>, vector<32x32xbf16>
    %17 = arith.truncf %3 : vector<16x32xf32> to vector<16x32xbf16>
    %cst_16 = arith.constant dense<0.000000e+00> : vector<16x32xf32>
    %18 = tpu.matmul %17, %16, %cst_16 {dimension_numbers = #tpu.dot_dimension_numbers<[1], [0], [0], [1], [0, 0, 1, 1], [], []>} : vector<16x32xbf16>, vector<32x32xbf16>, vector<16x32xf32> -> vector<16x32xf32>
    %c0_17 = arith.constant 0 : index
    %c0_18 = arith.constant 0 : index
    %19 = vector.load %arg9[%c0_17, %c0_18] : memref<1x32xf32, #tpu.memory_space<vmem>>, vector<1x32xf32>
    %20 = vector.broadcast %19 : vector<1x32xf32> to vector<16x32xf32>
    %21 = arith.addf %18, %20 : vector<16x32xf32>
    %c16_i32 = arith.constant 16 : i32
    %22 = arith.muli %arg1, %c16_i32 : i32
    %23 = tpu.iota {dimensions = array<i32: 0>} : vector<16x16xi32>
    %24 = vector.broadcast %22 : i32 to vector<16x16xi32>
    %25 = arith.addi %24, %23 : vector<16x16xi32>
    %26 = tpu.iota {dimensions = array<i32: 1>} : vector<16x16xi32>
    %27 = arith.cmpi sgt, %26, %25 : vector<16x16xi32>
    %28 = vector.extract_strided_slice %9 {offsets = [0, 0], sizes = [16, 8], strides = [1, 1]} : vector<16x32xf32> to vector<16x8xf32>
    %29 = vector.extract_strided_slice %15 {offsets = [0, 0], sizes = [16, 8], strides = [1, 1]} : vector<16x32xf32> to vector<16x8xf32>
    %30 = vector.extract_strided_slice %21 {offsets = [0, 0], sizes = [16, 8], strides = [1, 1]} : vector<16x32xf32> to vector<16x8xf32>
    %31 = arith.truncf %28 : vector<16x8xf32> to vector<16x8xbf16>
    %32 = arith.truncf %29 : vector<16x8xf32> to vector<16x8xbf16>
    %cst_19 = arith.constant dense<0.000000e+00> : vector<16x16xf32>
    %33 = tpu.matmul %31, %32, %cst_19 {dimension_numbers = #tpu.dot_dimension_numbers<[1], [1], [0], [0], [0, 0, 1, 0], [], []>} : vector<16x8xbf16>, vector<16x8xbf16>, vector<16x16xf32> -> vector<16x16xf32>
    %cst_20 = arith.constant -1.000000e+30 : f32
    %34 = vector.broadcast %cst_20 : f32 to vector<16x16xf32>
    %35 = arith.select %27, %34, %33 : vector<16x16xi1>, vector<16x16xf32>
    %cst_21 = arith.constant 0.353553385 : f32
    %36 = vector.broadcast %cst_21 : f32 to vector<16x16xf32>
    %37 = arith.mulf %35, %36 : vector<16x16xf32>
    %cst_22 = arith.constant dense<0xFF800000> : vector<16xf32>
    %38 = vector.multi_reduction <maximumf>, %37, %cst_22 [1] : vector<16x16xf32> to vector<16xf32>
    %39 = vector.shape_cast %38 : vector<16xf32> to vector<16x1xf32>
    %40 = vector.broadcast %39 : vector<16x1xf32> to vector<16x16xf32>
    %41 = arith.subf %37, %40 : vector<16x16xf32>
    %42 = math.exp %41 : vector<16x16xf32>
    %cst_23 = arith.constant dense<0.000000e+00> : vector<16xf32>
    %43 = vector.multi_reduction <add>, %42, %cst_23 [1] : vector<16x16xf32> to vector<16xf32>
    %44 = vector.shape_cast %43 : vector<16xf32> to vector<16x1xf32>
    %45 = tpu.reciprocal %44 {approx = true} : vector<16x1xf32> -> vector<16x1xf32>
    %46 = vector.broadcast %45 : vector<16x1xf32> to vector<16x16xf32>
    %47 = arith.mulf %42, %46 : vector<16x16xf32>
    %48 = arith.truncf %47 : vector<16x16xf32> to vector<16x16xbf16>
    %49 = arith.truncf %30 : vector<16x8xf32> to vector<16x8xbf16>
    %cst_24 = arith.constant dense<0.000000e+00> : vector<16x8xf32>
    %50 = tpu.matmul %48, %49, %cst_24 {dimension_numbers = #tpu.dot_dimension_numbers<[1], [0], [0], [1], [0, 0, 1, 1], [], []>} : vector<16x16xbf16>, vector<16x8xbf16>, vector<16x8xf32> -> vector<16x8xf32>
    %51 = vector.extract_strided_slice %9 {offsets = [0, 8], sizes = [16, 8], strides = [1, 1]} : vector<16x32xf32> to vector<16x8xf32>
    %52 = vector.extract_strided_slice %15 {offsets = [0, 8], sizes = [16, 8], strides = [1, 1]} : vector<16x32xf32> to vector<16x8xf32>
    %53 = vector.extract_strided_slice %21 {offsets = [0, 8], sizes = [16, 8], strides = [1, 1]} : vector<16x32xf32> to vector<16x8xf32>
    %54 = arith.truncf %51 : vector<16x8xf32> to vector<16x8xbf16>
    %55 = arith.truncf %52 : vector<16x8xf32> to vector<16x8xbf16>
    %cst_25 = arith.constant dense<0.000000e+00> : vector<16x16xf32>
    %56 = tpu.matmul %54, %55, %cst_25 {dimension_numbers = #tpu.dot_dimension_numbers<[1], [1], [0], [0], [0, 0, 1, 0], [], []>} : vector<16x8xbf16>, vector<16x8xbf16>, vector<16x16xf32> -> vector<16x16xf32>
    %cst_26 = arith.constant -1.000000e+30 : f32
    %57 = vector.broadcast %cst_26 : f32 to vector<16x16xf32>
    %58 = arith.select %27, %57, %56 : vector<16x16xi1>, vector<16x16xf32>
    %cst_27 = arith.constant 0.353553385 : f32
    %59 = vector.broadcast %cst_27 : f32 to vector<16x16xf32>
    %60 = arith.mulf %58, %59 : vector<16x16xf32>
    %cst_28 = arith.constant dense<0xFF800000> : vector<16xf32>
    %61 = vector.multi_reduction <maximumf>, %60, %cst_28 [1] : vector<16x16xf32> to vector<16xf32>
    %62 = vector.shape_cast %61 : vector<16xf32> to vector<16x1xf32>
    %63 = vector.broadcast %62 : vector<16x1xf32> to vector<16x16xf32>
    %64 = arith.subf %60, %63 : vector<16x16xf32>
    %65 = math.exp %64 : vector<16x16xf32>
    %cst_29 = arith.constant dense<0.000000e+00> : vector<16xf32>
    %66 = vector.multi_reduction <add>, %65, %cst_29 [1] : vector<16x16xf32> to vector<16xf32>
    %67 = vector.shape_cast %66 : vector<16xf32> to vector<16x1xf32>
    %68 = tpu.reciprocal %67 {approx = true} : vector<16x1xf32> -> vector<16x1xf32>
    %69 = vector.broadcast %68 : vector<16x1xf32> to vector<16x16xf32>
    %70 = arith.mulf %65, %69 : vector<16x16xf32>
    %71 = arith.truncf %70 : vector<16x16xf32> to vector<16x16xbf16>
    %72 = arith.truncf %53 : vector<16x8xf32> to vector<16x8xbf16>
    %cst_30 = arith.constant dense<0.000000e+00> : vector<16x8xf32>
    %73 = tpu.matmul %71, %72, %cst_30 {dimension_numbers = #tpu.dot_dimension_numbers<[1], [0], [0], [1], [0, 0, 1, 1], [], []>} : vector<16x16xbf16>, vector<16x8xbf16>, vector<16x8xf32> -> vector<16x8xf32>
    %74 = vector.extract_strided_slice %9 {offsets = [0, 16], sizes = [16, 8], strides = [1, 1]} : vector<16x32xf32> to vector<16x8xf32>
    %75 = vector.extract_strided_slice %15 {offsets = [0, 16], sizes = [16, 8], strides = [1, 1]} : vector<16x32xf32> to vector<16x8xf32>
    %76 = vector.extract_strided_slice %21 {offsets = [0, 16], sizes = [16, 8], strides = [1, 1]} : vector<16x32xf32> to vector<16x8xf32>
    %77 = arith.truncf %74 : vector<16x8xf32> to vector<16x8xbf16>
    %78 = arith.truncf %75 : vector<16x8xf32> to vector<16x8xbf16>
    %cst_31 = arith.constant dense<0.000000e+00> : vector<16x16xf32>
    %79 = tpu.matmul %77, %78, %cst_31 {dimension_numbers = #tpu.dot_dimension_numbers<[1], [1], [0], [0], [0, 0, 1, 0], [], []>} : vector<16x8xbf16>, vector<16x8xbf16>, vector<16x16xf32> -> vector<16x16xf32>
    %cst_32 = arith.constant -1.000000e+30 : f32
    %80 = vector.broadcast %cst_32 : f32 to vector<16x16xf32>
    %81 = arith.select %27, %80, %79 : vector<16x16xi1>, vector<16x16xf32>
    %cst_33 = arith.constant 0.353553385 : f32
    %82 = vector.broadcast %cst_33 : f32 to vector<16x16xf32>
    %83 = arith.mulf %81, %82 : vector<16x16xf32>
    %cst_34 = arith.constant dense<0xFF800000> : vector<16xf32>
    %84 = vector.multi_reduction <maximumf>, %83, %cst_34 [1] : vector<16x16xf32> to vector<16xf32>
    %85 = vector.shape_cast %84 : vector<16xf32> to vector<16x1xf32>
    %86 = vector.broadcast %85 : vector<16x1xf32> to vector<16x16xf32>
    %87 = arith.subf %83, %86 : vector<16x16xf32>
    %88 = math.exp %87 : vector<16x16xf32>
    %cst_35 = arith.constant dense<0.000000e+00> : vector<16xf32>
    %89 = vector.multi_reduction <add>, %88, %cst_35 [1] : vector<16x16xf32> to vector<16xf32>
    %90 = vector.shape_cast %89 : vector<16xf32> to vector<16x1xf32>
    %91 = tpu.reciprocal %90 {approx = true} : vector<16x1xf32> -> vector<16x1xf32>
    %92 = vector.broadcast %91 : vector<16x1xf32> to vector<16x16xf32>
    %93 = arith.mulf %88, %92 : vector<16x16xf32>
    %94 = arith.truncf %93 : vector<16x16xf32> to vector<16x16xbf16>
    %95 = arith.truncf %76 : vector<16x8xf32> to vector<16x8xbf16>
    %cst_36 = arith.constant dense<0.000000e+00> : vector<16x8xf32>
    %96 = tpu.matmul %94, %95, %cst_36 {dimension_numbers = #tpu.dot_dimension_numbers<[1], [0], [0], [1], [0, 0, 1, 1], [], []>} : vector<16x16xbf16>, vector<16x8xbf16>, vector<16x8xf32> -> vector<16x8xf32>
    %97 = vector.extract_strided_slice %9 {offsets = [0, 24], sizes = [16, 8], strides = [1, 1]} : vector<16x32xf32> to vector<16x8xf32>
    %98 = vector.extract_strided_slice %15 {offsets = [0, 24], sizes = [16, 8], strides = [1, 1]} : vector<16x32xf32> to vector<16x8xf32>
    %99 = vector.extract_strided_slice %21 {offsets = [0, 24], sizes = [16, 8], strides = [1, 1]} : vector<16x32xf32> to vector<16x8xf32>
    %100 = arith.truncf %97 : vector<16x8xf32> to vector<16x8xbf16>
    %101 = arith.truncf %98 : vector<16x8xf32> to vector<16x8xbf16>
    %cst_37 = arith.constant dense<0.000000e+00> : vector<16x16xf32>
    %102 = tpu.matmul %100, %101, %cst_37 {dimension_numbers = #tpu.dot_dimension_numbers<[1], [1], [0], [0], [0, 0, 1, 0], [], []>} : vector<16x8xbf16>, vector<16x8xbf16>, vector<16x16xf32> -> vector<16x16xf32>
    %cst_38 = arith.constant -1.000000e+30 : f32
    %103 = vector.broadcast %cst_38 : f32 to vector<16x16xf32>
    %104 = arith.select %27, %103, %102 : vector<16x16xi1>, vector<16x16xf32>
    %cst_39 = arith.constant 0.353553385 : f32
    %105 = vector.broadcast %cst_39 : f32 to vector<16x16xf32>
    %106 = arith.mulf %104, %105 : vector<16x16xf32>
    %cst_40 = arith.constant dense<0xFF800000> : vector<16xf32>
    %107 = vector.multi_reduction <maximumf>, %106, %cst_40 [1] : vector<16x16xf32> to vector<16xf32>
    %108 = vector.shape_cast %107 : vector<16xf32> to vector<16x1xf32>
    %109 = vector.broadcast %108 : vector<16x1xf32> to vector<16x16xf32>
    %110 = arith.subf %106, %109 : vector<16x16xf32>
    %111 = math.exp %110 : vector<16x16xf32>
    %cst_41 = arith.constant dense<0.000000e+00> : vector<16xf32>
    %112 = vector.multi_reduction <add>, %111, %cst_41 [1] : vector<16x16xf32> to vector<16xf32>
    %113 = vector.shape_cast %112 : vector<16xf32> to vector<16x1xf32>
    %114 = tpu.reciprocal %113 {approx = true} : vector<16x1xf32> -> vector<16x1xf32>
    %115 = vector.broadcast %114 : vector<16x1xf32> to vector<16x16xf32>
    %116 = arith.mulf %111, %115 : vector<16x16xf32>
    %117 = arith.truncf %116 : vector<16x16xf32> to vector<16x16xbf16>
    %118 = arith.truncf %99 : vector<16x8xf32> to vector<16x8xbf16>
    %cst_42 = arith.constant dense<0.000000e+00> : vector<16x8xf32>
    %119 = tpu.matmul %117, %118, %cst_42 {dimension_numbers = #tpu.dot_dimension_numbers<[1], [0], [0], [1], [0, 0, 1, 1], [], []>} : vector<16x16xbf16>, vector<16x8xbf16>, vector<16x8xf32> -> vector<16x8xf32>
    %120 = tpu.concatenate %50, %73, %96, %119 in 1 : vector<16x8xf32>, vector<16x8xf32>, vector<16x8xf32>, vector<16x8xf32> -> vector<16x32xf32>
    %c0_43 = arith.constant 0 : index
    %c0_44 = arith.constant 0 : index
    %121 = vector.load %arg10[%c0_43, %c0_44] : memref<32x32xbf16, #tpu.memory_space<vmem>>, vector<32x32xbf16>
    %122 = arith.truncf %120 : vector<16x32xf32> to vector<16x32xbf16>
    %cst_45 = arith.constant dense<0.000000e+00> : vector<16x32xf32>
    %123 = tpu.matmul %122, %121, %cst_45 {dimension_numbers = #tpu.dot_dimension_numbers<[1], [0], [0], [1], [0, 0, 1, 1], [], []>} : vector<16x32xbf16>, vector<32x32xbf16>, vector<16x32xf32> -> vector<16x32xf32>
    %124 = arith.addf %1, %123 : vector<16x32xf32>
    %c0_46 = arith.constant 0 : index
    %c0_47 = arith.constant 0 : index
    %125 = vector.load %arg11[%c0_46, %c0_47] : memref<1x32xf32, #tpu.memory_space<vmem>>, vector<1x32xf32>
    %126 = vector.broadcast %125 : vector<1x32xf32> to vector<16x32xf32>
    %127 = arith.addf %124, %126 : vector<16x32xf32>
    %c0_48 = arith.constant 0 : index
    %c0_49 = arith.constant 0 : index
    %128 = vector.load %arg12[%c0_48, %c0_49] : memref<1x32xf32, #tpu.memory_space<vmem>>, vector<1x32xf32>
    %c0_50 = arith.constant 0 : index
    %c0_51 = arith.constant 0 : index
    %129 = vector.load %arg13[%c0_50, %c0_51] : memref<1x32xf32, #tpu.memory_space<vmem>>, vector<1x32xf32>
    %cst_52 = arith.constant dense<0.000000e+00> : vector<16xf32>
    %130 = vector.multi_reduction <add>, %127, %cst_52 [1] : vector<16x32xf32> to vector<16xf32>
    %131 = vector.shape_cast %130 : vector<16xf32> to vector<16x1xf32>
    %cst_53 = arith.constant 3.200000e+01 : f32
    %132 = vector.broadcast %cst_53 : f32 to vector<16x1xf32>
    %133 = arith.divf %131, %132 : vector<16x1xf32>
    %134 = vector.broadcast %133 : vector<16x1xf32> to vector<16x32xf32>
    %135 = arith.subf %127, %134 : vector<16x32xf32>
    %136 = arith.mulf %135, %135 : vector<16x32xf32>
    %cst_54 = arith.constant dense<0.000000e+00> : vector<16xf32>
    %137 = vector.multi_reduction <add>, %136, %cst_54 [1] : vector<16x32xf32> to vector<16xf32>
    %138 = vector.shape_cast %137 : vector<16xf32> to vector<16x1xf32>
    %cst_55 = arith.constant 3.200000e+01 : f32
    %139 = vector.broadcast %cst_55 : f32 to vector<16x1xf32>
    %140 = arith.divf %138, %139 : vector<16x1xf32>
    %cst_56 = arith.constant 9.99999974E-6 : f32
    %141 = vector.broadcast %cst_56 : f32 to vector<16x1xf32>
    %142 = arith.addf %140, %141 : vector<16x1xf32>
    %143 = math.rsqrt %142 : vector<16x1xf32>
    %144 = vector.broadcast %143 : vector<16x1xf32> to vector<16x32xf32>
    %145 = arith.mulf %135, %144 : vector<16x32xf32>
    %146 = vector.broadcast %128 : vector<1x32xf32> to vector<16x32xf32>
    %147 = arith.mulf %145, %146 : vector<16x32xf32>
    %148 = vector.broadcast %129 : vector<1x32xf32> to vector<16x32xf32>
    %149 = arith.addf %147, %148 : vector<16x32xf32>
    %c0_57 = arith.constant 0 : index
    %c0_58 = arith.constant 0 : index
    %c0_59 = arith.constant 0 : index
    %150 = vector.load %arg14[%c0_57, %c0_58, %c0_59] : memref<1x16x32xf32, #tpu.memory_space<vmem>>, vector<1x16x32xf32>
    %151 = vector.shape_cast %150 : vector<1x16x32xf32> to vector<16x32xf32>
    %152 = vector.shape_cast %149 : vector<16x32xf32> to vector<1x16x32xf32>
    tpu.vector_store %arg14[%c0_57, %c0_58, %c0_59], %152 {strides = array<i32>} : memref<1x16x32xf32, #tpu.memory_space<vmem>>, vector<1x16x32xf32>,
    return
  }
  func.func @transform_0(%arg0: i32, %arg1: i32) -> (i32, i32, i32) {
    %c0_i32 = arith.constant 0 : i32
    %c0_i32_0 = arith.constant 0 : i32
    return %arg0, %arg1, %c0_i32 : i32, i32, i32
  }
  func.func @transform_1(%arg0: i32, %arg1: i32) -> (i32, i32, i32) {
    %c0_i32 = arith.constant 0 : i32
    %c0_i32_0 = arith.constant 0 : i32
    %c0_i32_1 = arith.constant 0 : i32
    return %arg0, %c0_i32, %c0_i32_0 : i32, i32, i32
  }
  func.func @transform_2(%arg0: i32, %arg1: i32) -> (i32, i32) {
    %c0_i32 = arith.constant 0 : i32
    %c0_i32_0 = arith.constant 0 : i32
    %c0_i32_1 = arith.constant 0 : i32
    return %c0_i32, %c0_i32_0 : i32, i32
  }
  func.func @transform_3(%arg0: i32, %arg1: i32) -> (i32, i32) {
    %c0_i32 = arith.constant 0 : i32
    %c0_i32_0 = arith.constant 0 : i32
    %c0_i32_1 = arith.constant 0 : i32
    return %c0_i32, %c0_i32_0 : i32, i32
  }
  func.func @transform_4(%arg0: i32, %arg1: i32) -> (i32, i32) {
    %c0_i32 = arith.constant 0 : i32
    %c0_i32_0 = arith.constant 0 : i32
    %c0_i32_1 = arith.constant 0 : i32
    return %c0_i32, %c0_i32_0 : i32, i32
  }
  func.func @transform_5(%arg0: i32, %arg1: i32) -> (i32, i32) {
    %c0_i32 = arith.constant 0 : i32
    %c0_i32_0 = arith.constant 0 : i32
    %c0_i32_1 = arith.constant 0 : i32
    return %c0_i32, %c0_i32_0 : i32, i32
  }
  func.func @transform_6(%arg0: i32, %arg1: i32) -> (i32, i32) {
    %c0_i32 = arith.constant 0 : i32
    %c0_i32_0 = arith.constant 0 : i32
    %c0_i32_1 = arith.constant 0 : i32
    return %c0_i32, %c0_i32_0 : i32, i32
  }
  func.func @transform_7(%arg0: i32, %arg1: i32) -> (i32, i32) {
    %c0_i32 = arith.constant 0 : i32
    %c0_i32_0 = arith.constant 0 : i32
    %c0_i32_1 = arith.constant 0 : i32
    return %c0_i32, %c0_i32_0 : i32, i32
  }
  func.func @transform_8(%arg0: i32, %arg1: i32) -> (i32, i32) {
    %c0_i32 = arith.constant 0 : i32
    %c0_i32_0 = arith.constant 0 : i32
    %c0_i32_1 = arith.constant 0 : i32
    return %c0_i32, %c0_i32_0 : i32, i32
  }
  func.func @transform_9(%arg0: i32, %arg1: i32) -> (i32, i32) {
    %c0_i32 = arith.constant 0 : i32
    %c0_i32_0 = arith.constant 0 : i32
    %c0_i32_1 = arith.constant 0 : i32
    return %c0_i32, %c0_i32_0 : i32, i32
  }
  func.func @transform_10(%arg0: i32, %arg1: i32) -> (i32, i32) {
    %c0_i32 = arith.constant 0 : i32
    %c0_i32_0 = arith.constant 0 : i32
    %c0_i32_1 = arith.constant 0 : i32
    return %c0_i32, %c0_i32_0 : i32, i32
  }
  func.func @transform_11(%arg0: i32, %arg1: i32) -> (i32, i32) {
    %c0_i32 = arith.constant 0 : i32
    %c0_i32_0 = arith.constant 0 : i32
    %c0_i32_1 = arith.constant 0 : i32
    return %c0_i32, %c0_i32_0 : i32, i32
  }
  func.func @transform_12(%arg0: i32, %arg1: i32) -> (i32, i32, i32) {
    %c0_i32 = arith.constant 0 : i32
    %c0_i32_0 = arith.constant 0 : i32
    return %arg0, %arg1, %c0_i32 : i32, i32, i32
  }
}

module attributes {stable_mosaic.version = 11 : i64} {
  func.func @_attn_res_ln_kernel(%arg0: i32, %arg1: i32, %arg2: memref<1x16x32xf32, #tpu.memory_space<vmem>>, %arg3: memref<1x16x32xf32, #tpu.memory_space<vmem>>, %arg4: memref<32x32xbf16, #tpu.memory_space<vmem>>, %arg5: memref<1x32xf32, #tpu.memory_space<vmem>>, %arg6: memref<32x32xbf16, #tpu.memory_space<vmem>>, %arg7: memref<1x32xf32, #tpu.memory_space<vmem>>, %arg8: memref<32x32xbf16, #tpu.memory_space<vmem>>, %arg9: memref<1x32xf32, #tpu.memory_space<vmem>>, %arg10: memref<32x32xbf16, #tpu.memory_space<vmem>>, %arg11: memref<1x32xf32, #tpu.memory_space<vmem>>, %arg12: memref<1x32xf32, #tpu.memory_space<vmem>>, %arg13: memref<1x32xf32, #tpu.memory_space<vmem>>, %arg14: memref<1x16x32xf32, #tpu.memory_space<vmem>>) attributes {dimension_semantics = [#tpu.dimension_semantics<parallel>, #tpu.dimension_semantics<parallel>], iteration_bounds = array<i64: 2, 1>, scalar_prefetch = 0 : i64, scratch_operands = 0 : i64, tpu.core_type = #tpu.core_type<tc>, window_params = [{transform_indices = @transform_0, window_bounds = array<i64: 1, 16, 32>}, {transform_indices = @transform_1, window_bounds = array<i64: 1, 16, 32>}, {pipeline_mode = #tpu.pipeline_mode<synchronous>, transform_indices = @transform_2, window_bounds = array<i64: 32, 32>}, {pipeline_mode = #tpu.pipeline_mode<synchronous>, transform_indices = @transform_3, window_bounds = array<i64: 1, 32>}, {pipeline_mode = #tpu.pipeline_mode<synchronous>, transform_indices = @transform_4, window_bounds = array<i64: 32, 32>}, {pipeline_mode = #tpu.pipeline_mode<synchronous>, transform_indices = @transform_5, window_bounds = array<i64: 1, 32>}, {pipeline_mode = #tpu.pipeline_mode<synchronous>, transform_indices = @transform_6, window_bounds = array<i64: 32, 32>}, {pipeline_mode = #tpu.pipeline_mode<synchronous>, transform_indices = @transform_7, window_bounds = array<i64: 1, 32>}, {pipeline_mode = #tpu.pipeline_mode<synchronous>, transform_indices = @transform_8, window_bounds = array<i64: 32, 32>}, {pipeline_mode = #tpu.pipeline_mode<synchronous>, transform_indices = @transform_9, window_bounds = array<i64: 1, 32>}, {pipeline_mode = #tpu.pipeline_mode<synchronous>, transform_indices = @transform_10, window_bounds = array<i64: 1, 32>}, {pipeline_mode = #tpu.pipeline_mode<synchronous>, transform_indices = @transform_11, window_bounds = array<i64: 1, 32>}, {transform_indices = @transform_12, window_bounds = array<i64: 1, 16, 32>}]} {
    %c0 = arith.constant 0 : index
    %c0_0 = arith.constant 0 : index
    %c0_1 = arith.constant 0 : index
    %0 = vector.load %arg2[%c0, %c0_0, %c0_1] : memref<1x16x32xf32, #tpu.memory_space<vmem>>, vector<1x16x32xf32>
    %1 = vector.shape_cast %0 : vector<1x16x32xf32> to vector<16x32xf32>
    %c0_2 = arith.constant 0 : index
    %c0_3 = arith.constant 0 : index
    %c0_4 = arith.constant 0 : index
    %2 = vector.load %arg3[%c0_2, %c0_3, %c0_4] : memref<1x16x32xf32, #tpu.memory_space<vmem>>, vector<1x16x32xf32>
    %3 = vector.shape_cast %2 : vector<1x16x32xf32> to vector<16x32xf32>
    %c0_5 = arith.constant 0 : index
    %c0_6 = arith.constant 0 : index
    %4 = vector.load %arg4[%c0_5, %c0_6] : memref<32x32xbf16, #tpu.memory_space<vmem>>, vector<32x32xbf16>
    %5 = arith.truncf %1 : vector<16x32xf32> to vector<16x32xbf16>
    %cst = arith.constant dense<0.000000e+00> : vector<16x32xf32>
    %6 = tpu.matmul %5, %4, %cst {dimension_numbers = #tpu.dot_dimension_numbers<[1], [0], [0], [1], [0, 0, 1, 1], [], []>} : vector<16x32xbf16>, vector<32x32xbf16>, vector<16x32xf32> -> vector<16x32xf32>
    %c0_7 = arith.constant 0 : index
    %c0_8 = arith.constant 0 : index
    %7 = vector.load %arg5[%c0_7, %c0_8] : memref<1x32xf32, #tpu.memory_space<vmem>>, vector<1x32xf32>
    %8 = vector.broadcast %7 : vector<1x32xf32> to vector<16x32xf32>
    %9 = arith.addf %6, %8 : vector<16x32xf32>
    %c0_9 = arith.constant 0 : index
    %c0_10 = arith.constant 0 : index
    %10 = vector.load %arg6[%c0_9, %c0_10] : memref<32x32xbf16, #tpu.memory_space<vmem>>, vector<32x32xbf16>
    %11 = arith.truncf %3 : vector<16x32xf32> to vector<16x32xbf16>
    %cst_11 = arith.constant dense<0.000000e+00> : vector<16x32xf32>
    %12 = tpu.matmul %11, %10, %cst_11 {dimension_numbers = #tpu.dot_dimension_numbers<[1], [0], [0], [1], [0, 0, 1, 1], [], []>} : vector<16x32xbf16>, vector<32x32xbf16>, vector<16x32xf32> -> vector<16x32xf32>
    %c0_12 = arith.constant 0 : index
    %c0_13 = arith.constant 0 : index
    %13 = vector.load %arg7[%c0_12, %c0_13] : memref<1x32xf32, #tpu.memory_space<vmem>>, vector<1x32xf32>
    %14 = vector.broadcast %13 : vector<1x32xf32> to vector<16x32xf32>
    %15 = arith.addf %12, %14 : vector<16x32xf32>
    %c0_14 = arith.constant 0 : index
    %c0_15 = arith.constant 0 : index
    %16 = vector.load %arg8[%c0_14, %c0_15] : memref<32x32xbf16, #tpu.memory_space<vmem>>, vector<32x32xbf16>
    %17 = arith.truncf %3 : vector<16x32xf32> to vector<16x32xbf16>
    %cst_16 = arith.constant dense<0.000000e+00> : vector<16x32xf32>
    %18 = tpu.matmul %17, %16, %cst_16 {dimension_numbers = #tpu.dot_dimension_numbers<[1], [0], [0], [1], [0, 0, 1, 1], [], []>} : vector<16x32xbf16>, vector<32x32xbf16>, vector<16x32xf32> -> vector<16x32xf32>
    %c0_17 = arith.constant 0 : index
    %c0_18 = arith.constant 0 : index
    %19 = vector.load %arg9[%c0_17, %c0_18] : memref<1x32xf32, #tpu.memory_space<vmem>>, vector<1x32xf32>
    %20 = vector.broadcast %19 : vector<1x32xf32> to vector<16x32xf32>
    %21 = arith.addf %18, %20 : vector<16x32xf32>
    %22 = vector.extract_strided_slice %9 {offsets = [0, 0], sizes = [16, 8], strides = [1, 1]} : vector<16x32xf32> to vector<16x8xf32>
    %23 = vector.extract_strided_slice %15 {offsets = [0, 0], sizes = [16, 8], strides = [1, 1]} : vector<16x32xf32> to vector<16x8xf32>
    %24 = vector.extract_strided_slice %21 {offsets = [0, 0], sizes = [16, 8], strides = [1, 1]} : vector<16x32xf32> to vector<16x8xf32>
    %25 = arith.truncf %22 : vector<16x8xf32> to vector<16x8xbf16>
    %26 = arith.truncf %23 : vector<16x8xf32> to vector<16x8xbf16>
    %cst_19 = arith.constant dense<0.000000e+00> : vector<16x16xf32>
    %27 = tpu.matmul %25, %26, %cst_19 {dimension_numbers = #tpu.dot_dimension_numbers<[1], [1], [0], [0], [0, 0, 1, 0], [], []>} : vector<16x8xbf16>, vector<16x8xbf16>, vector<16x16xf32> -> vector<16x16xf32>
    %cst_20 = arith.constant 0.353553385 : f32
    %28 = vector.broadcast %cst_20 : f32 to vector<16x16xf32>
    %29 = arith.mulf %27, %28 : vector<16x16xf32>
    %cst_21 = arith.constant dense<0xFF800000> : vector<16xf32>
    %30 = vector.multi_reduction <maximumf>, %29, %cst_21 [1] : vector<16x16xf32> to vector<16xf32>
    %31 = vector.shape_cast %30 : vector<16xf32> to vector<16x1xf32>
    %32 = vector.broadcast %31 : vector<16x1xf32> to vector<16x16xf32>
    %33 = arith.subf %29, %32 : vector<16x16xf32>
    %34 = math.exp %33 : vector<16x16xf32>
    %cst_22 = arith.constant dense<0.000000e+00> : vector<16xf32>
    %35 = vector.multi_reduction <add>, %34, %cst_22 [1] : vector<16x16xf32> to vector<16xf32>
    %36 = vector.shape_cast %35 : vector<16xf32> to vector<16x1xf32>
    %37 = tpu.reciprocal %36 {approx = true} : vector<16x1xf32> -> vector<16x1xf32>
    %38 = vector.broadcast %37 : vector<16x1xf32> to vector<16x16xf32>
    %39 = arith.mulf %34, %38 : vector<16x16xf32>
    %40 = arith.truncf %39 : vector<16x16xf32> to vector<16x16xbf16>
    %41 = arith.truncf %24 : vector<16x8xf32> to vector<16x8xbf16>
    %cst_23 = arith.constant dense<0.000000e+00> : vector<16x8xf32>
    %42 = tpu.matmul %40, %41, %cst_23 {dimension_numbers = #tpu.dot_dimension_numbers<[1], [0], [0], [1], [0, 0, 1, 1], [], []>} : vector<16x16xbf16>, vector<16x8xbf16>, vector<16x8xf32> -> vector<16x8xf32>
    %43 = vector.extract_strided_slice %9 {offsets = [0, 8], sizes = [16, 8], strides = [1, 1]} : vector<16x32xf32> to vector<16x8xf32>
    %44 = vector.extract_strided_slice %15 {offsets = [0, 8], sizes = [16, 8], strides = [1, 1]} : vector<16x32xf32> to vector<16x8xf32>
    %45 = vector.extract_strided_slice %21 {offsets = [0, 8], sizes = [16, 8], strides = [1, 1]} : vector<16x32xf32> to vector<16x8xf32>
    %46 = arith.truncf %43 : vector<16x8xf32> to vector<16x8xbf16>
    %47 = arith.truncf %44 : vector<16x8xf32> to vector<16x8xbf16>
    %cst_24 = arith.constant dense<0.000000e+00> : vector<16x16xf32>
    %48 = tpu.matmul %46, %47, %cst_24 {dimension_numbers = #tpu.dot_dimension_numbers<[1], [1], [0], [0], [0, 0, 1, 0], [], []>} : vector<16x8xbf16>, vector<16x8xbf16>, vector<16x16xf32> -> vector<16x16xf32>
    %cst_25 = arith.constant 0.353553385 : f32
    %49 = vector.broadcast %cst_25 : f32 to vector<16x16xf32>
    %50 = arith.mulf %48, %49 : vector<16x16xf32>
    %cst_26 = arith.constant dense<0xFF800000> : vector<16xf32>
    %51 = vector.multi_reduction <maximumf>, %50, %cst_26 [1] : vector<16x16xf32> to vector<16xf32>
    %52 = vector.shape_cast %51 : vector<16xf32> to vector<16x1xf32>
    %53 = vector.broadcast %52 : vector<16x1xf32> to vector<16x16xf32>
    %54 = arith.subf %50, %53 : vector<16x16xf32>
    %55 = math.exp %54 : vector<16x16xf32>
    %cst_27 = arith.constant dense<0.000000e+00> : vector<16xf32>
    %56 = vector.multi_reduction <add>, %55, %cst_27 [1] : vector<16x16xf32> to vector<16xf32>
    %57 = vector.shape_cast %56 : vector<16xf32> to vector<16x1xf32>
    %58 = tpu.reciprocal %57 {approx = true} : vector<16x1xf32> -> vector<16x1xf32>
    %59 = vector.broadcast %58 : vector<16x1xf32> to vector<16x16xf32>
    %60 = arith.mulf %55, %59 : vector<16x16xf32>
    %61 = arith.truncf %60 : vector<16x16xf32> to vector<16x16xbf16>
    %62 = arith.truncf %45 : vector<16x8xf32> to vector<16x8xbf16>
    %cst_28 = arith.constant dense<0.000000e+00> : vector<16x8xf32>
    %63 = tpu.matmul %61, %62, %cst_28 {dimension_numbers = #tpu.dot_dimension_numbers<[1], [0], [0], [1], [0, 0, 1, 1], [], []>} : vector<16x16xbf16>, vector<16x8xbf16>, vector<16x8xf32> -> vector<16x8xf32>
    %64 = vector.extract_strided_slice %9 {offsets = [0, 16], sizes = [16, 8], strides = [1, 1]} : vector<16x32xf32> to vector<16x8xf32>
    %65 = vector.extract_strided_slice %15 {offsets = [0, 16], sizes = [16, 8], strides = [1, 1]} : vector<16x32xf32> to vector<16x8xf32>
    %66 = vector.extract_strided_slice %21 {offsets = [0, 16], sizes = [16, 8], strides = [1, 1]} : vector<16x32xf32> to vector<16x8xf32>
    %67 = arith.truncf %64 : vector<16x8xf32> to vector<16x8xbf16>
    %68 = arith.truncf %65 : vector<16x8xf32> to vector<16x8xbf16>
    %cst_29 = arith.constant dense<0.000000e+00> : vector<16x16xf32>
    %69 = tpu.matmul %67, %68, %cst_29 {dimension_numbers = #tpu.dot_dimension_numbers<[1], [1], [0], [0], [0, 0, 1, 0], [], []>} : vector<16x8xbf16>, vector<16x8xbf16>, vector<16x16xf32> -> vector<16x16xf32>
    %cst_30 = arith.constant 0.353553385 : f32
    %70 = vector.broadcast %cst_30 : f32 to vector<16x16xf32>
    %71 = arith.mulf %69, %70 : vector<16x16xf32>
    %cst_31 = arith.constant dense<0xFF800000> : vector<16xf32>
    %72 = vector.multi_reduction <maximumf>, %71, %cst_31 [1] : vector<16x16xf32> to vector<16xf32>
    %73 = vector.shape_cast %72 : vector<16xf32> to vector<16x1xf32>
    %74 = vector.broadcast %73 : vector<16x1xf32> to vector<16x16xf32>
    %75 = arith.subf %71, %74 : vector<16x16xf32>
    %76 = math.exp %75 : vector<16x16xf32>
    %cst_32 = arith.constant dense<0.000000e+00> : vector<16xf32>
    %77 = vector.multi_reduction <add>, %76, %cst_32 [1] : vector<16x16xf32> to vector<16xf32>
    %78 = vector.shape_cast %77 : vector<16xf32> to vector<16x1xf32>
    %79 = tpu.reciprocal %78 {approx = true} : vector<16x1xf32> -> vector<16x1xf32>
    %80 = vector.broadcast %79 : vector<16x1xf32> to vector<16x16xf32>
    %81 = arith.mulf %76, %80 : vector<16x16xf32>
    %82 = arith.truncf %81 : vector<16x16xf32> to vector<16x16xbf16>
    %83 = arith.truncf %66 : vector<16x8xf32> to vector<16x8xbf16>
    %cst_33 = arith.constant dense<0.000000e+00> : vector<16x8xf32>
    %84 = tpu.matmul %82, %83, %cst_33 {dimension_numbers = #tpu.dot_dimension_numbers<[1], [0], [0], [1], [0, 0, 1, 1], [], []>} : vector<16x16xbf16>, vector<16x8xbf16>, vector<16x8xf32> -> vector<16x8xf32>
    %85 = vector.extract_strided_slice %9 {offsets = [0, 24], sizes = [16, 8], strides = [1, 1]} : vector<16x32xf32> to vector<16x8xf32>
    %86 = vector.extract_strided_slice %15 {offsets = [0, 24], sizes = [16, 8], strides = [1, 1]} : vector<16x32xf32> to vector<16x8xf32>
    %87 = vector.extract_strided_slice %21 {offsets = [0, 24], sizes = [16, 8], strides = [1, 1]} : vector<16x32xf32> to vector<16x8xf32>
    %88 = arith.truncf %85 : vector<16x8xf32> to vector<16x8xbf16>
    %89 = arith.truncf %86 : vector<16x8xf32> to vector<16x8xbf16>
    %cst_34 = arith.constant dense<0.000000e+00> : vector<16x16xf32>
    %90 = tpu.matmul %88, %89, %cst_34 {dimension_numbers = #tpu.dot_dimension_numbers<[1], [1], [0], [0], [0, 0, 1, 0], [], []>} : vector<16x8xbf16>, vector<16x8xbf16>, vector<16x16xf32> -> vector<16x16xf32>
    %cst_35 = arith.constant 0.353553385 : f32
    %91 = vector.broadcast %cst_35 : f32 to vector<16x16xf32>
    %92 = arith.mulf %90, %91 : vector<16x16xf32>
    %cst_36 = arith.constant dense<0xFF800000> : vector<16xf32>
    %93 = vector.multi_reduction <maximumf>, %92, %cst_36 [1] : vector<16x16xf32> to vector<16xf32>
    %94 = vector.shape_cast %93 : vector<16xf32> to vector<16x1xf32>
    %95 = vector.broadcast %94 : vector<16x1xf32> to vector<16x16xf32>
    %96 = arith.subf %92, %95 : vector<16x16xf32>
    %97 = math.exp %96 : vector<16x16xf32>
    %cst_37 = arith.constant dense<0.000000e+00> : vector<16xf32>
    %98 = vector.multi_reduction <add>, %97, %cst_37 [1] : vector<16x16xf32> to vector<16xf32>
    %99 = vector.shape_cast %98 : vector<16xf32> to vector<16x1xf32>
    %100 = tpu.reciprocal %99 {approx = true} : vector<16x1xf32> -> vector<16x1xf32>
    %101 = vector.broadcast %100 : vector<16x1xf32> to vector<16x16xf32>
    %102 = arith.mulf %97, %101 : vector<16x16xf32>
    %103 = arith.truncf %102 : vector<16x16xf32> to vector<16x16xbf16>
    %104 = arith.truncf %87 : vector<16x8xf32> to vector<16x8xbf16>
    %cst_38 = arith.constant dense<0.000000e+00> : vector<16x8xf32>
    %105 = tpu.matmul %103, %104, %cst_38 {dimension_numbers = #tpu.dot_dimension_numbers<[1], [0], [0], [1], [0, 0, 1, 1], [], []>} : vector<16x16xbf16>, vector<16x8xbf16>, vector<16x8xf32> -> vector<16x8xf32>
    %106 = tpu.concatenate %42, %63, %84, %105 in 1 : vector<16x8xf32>, vector<16x8xf32>, vector<16x8xf32>, vector<16x8xf32> -> vector<16x32xf32>
    %c0_39 = arith.constant 0 : index
    %c0_40 = arith.constant 0 : index
    %107 = vector.load %arg10[%c0_39, %c0_40] : memref<32x32xbf16, #tpu.memory_space<vmem>>, vector<32x32xbf16>
    %108 = arith.truncf %106 : vector<16x32xf32> to vector<16x32xbf16>
    %cst_41 = arith.constant dense<0.000000e+00> : vector<16x32xf32>
    %109 = tpu.matmul %108, %107, %cst_41 {dimension_numbers = #tpu.dot_dimension_numbers<[1], [0], [0], [1], [0, 0, 1, 1], [], []>} : vector<16x32xbf16>, vector<32x32xbf16>, vector<16x32xf32> -> vector<16x32xf32>
    %110 = arith.addf %1, %109 : vector<16x32xf32>
    %c0_42 = arith.constant 0 : index
    %c0_43 = arith.constant 0 : index
    %111 = vector.load %arg11[%c0_42, %c0_43] : memref<1x32xf32, #tpu.memory_space<vmem>>, vector<1x32xf32>
    %112 = vector.broadcast %111 : vector<1x32xf32> to vector<16x32xf32>
    %113 = arith.addf %110, %112 : vector<16x32xf32>
    %c0_44 = arith.constant 0 : index
    %c0_45 = arith.constant 0 : index
    %114 = vector.load %arg12[%c0_44, %c0_45] : memref<1x32xf32, #tpu.memory_space<vmem>>, vector<1x32xf32>
    %c0_46 = arith.constant 0 : index
    %c0_47 = arith.constant 0 : index
    %115 = vector.load %arg13[%c0_46, %c0_47] : memref<1x32xf32, #tpu.memory_space<vmem>>, vector<1x32xf32>
    %cst_48 = arith.constant dense<0.000000e+00> : vector<16xf32>
    %116 = vector.multi_reduction <add>, %113, %cst_48 [1] : vector<16x32xf32> to vector<16xf32>
    %117 = vector.shape_cast %116 : vector<16xf32> to vector<16x1xf32>
    %cst_49 = arith.constant 3.200000e+01 : f32
    %118 = vector.broadcast %cst_49 : f32 to vector<16x1xf32>
    %119 = arith.divf %117, %118 : vector<16x1xf32>
    %120 = vector.broadcast %119 : vector<16x1xf32> to vector<16x32xf32>
    %121 = arith.subf %113, %120 : vector<16x32xf32>
    %122 = arith.mulf %121, %121 : vector<16x32xf32>
    %cst_50 = arith.constant dense<0.000000e+00> : vector<16xf32>
    %123 = vector.multi_reduction <add>, %122, %cst_50 [1] : vector<16x32xf32> to vector<16xf32>
    %124 = vector.shape_cast %123 : vector<16xf32> to vector<16x1xf32>
    %cst_51 = arith.constant 3.200000e+01 : f32
    %125 = vector.broadcast %cst_51 : f32 to vector<16x1xf32>
    %126 = arith.divf %124, %125 : vector<16x1xf32>
    %cst_52 = arith.constant 9.99999974E-6 : f32
    %127 = vector.broadcast %cst_52 : f32 to vector<16x1xf32>
    %128 = arith.addf %126, %127 : vector<16x1xf32>
    %129 = math.rsqrt %128 : vector<16x1xf32>
    %130 = vector.broadcast %129 : vector<16x1xf32> to vector<16x32xf32>
    %131 = arith.mulf %121, %130 : vector<16x32xf32>
    %132 = vector.broadcast %114 : vector<1x32xf32> to vector<16x32xf32>
    %133 = arith.mulf %131, %132 : vector<16x32xf32>
    %134 = vector.broadcast %115 : vector<1x32xf32> to vector<16x32xf32>
    %135 = arith.addf %133, %134 : vector<16x32xf32>
    %c0_53 = arith.constant 0 : index
    %c0_54 = arith.constant 0 : index
    %c0_55 = arith.constant 0 : index
    %136 = vector.load %arg14[%c0_53, %c0_54, %c0_55] : memref<1x16x32xf32, #tpu.memory_space<vmem>>, vector<1x16x32xf32>
    %137 = vector.shape_cast %136 : vector<1x16x32xf32> to vector<16x32xf32>
    %138 = vector.shape_cast %135 : vector<16x32xf32> to vector<1x16x32xf32>
    tpu.vector_store %arg14[%c0_53, %c0_54, %c0_55], %138 {strides = array<i32>} : memref<1x16x32xf32, #tpu.memory_space<vmem>>, vector<1x16x32xf32>,
    return
  }
  func.func @transform_0(%arg0: i32, %arg1: i32) -> (i32, i32, i32) {
    %c0_i32 = arith.constant 0 : i32
    %c0_i32_0 = arith.constant 0 : i32
    return %arg0, %arg1, %c0_i32 : i32, i32, i32
  }
  func.func @transform_1(%arg0: i32, %arg1: i32) -> (i32, i32, i32) {
    %c0_i32 = arith.constant 0 : i32
    %c0_i32_0 = arith.constant 0 : i32
    %c0_i32_1 = arith.constant 0 : i32
    return %arg0, %c0_i32, %c0_i32_0 : i32, i32, i32
  }
  func.func @transform_2(%arg0: i32, %arg1: i32) -> (i32, i32) {
    %c0_i32 = arith.constant 0 : i32
    %c0_i32_0 = arith.constant 0 : i32
    %c0_i32_1 = arith.constant 0 : i32
    return %c0_i32, %c0_i32_0 : i32, i32
  }
  func.func @transform_3(%arg0: i32, %arg1: i32) -> (i32, i32) {
    %c0_i32 = arith.constant 0 : i32
    %c0_i32_0 = arith.constant 0 : i32
    %c0_i32_1 = arith.constant 0 : i32
    return %c0_i32, %c0_i32_0 : i32, i32
  }
  func.func @transform_4(%arg0: i32, %arg1: i32) -> (i32, i32) {
    %c0_i32 = arith.constant 0 : i32
    %c0_i32_0 = arith.constant 0 : i32
    %c0_i32_1 = arith.constant 0 : i32
    return %c0_i32, %c0_i32_0 : i32, i32
  }
  func.func @transform_5(%arg0: i32, %arg1: i32) -> (i32, i32) {
    %c0_i32 = arith.constant 0 : i32
    %c0_i32_0 = arith.constant 0 : i32
    %c0_i32_1 = arith.constant 0 : i32
    return %c0_i32, %c0_i32_0 : i32, i32
  }
  func.func @transform_6(%arg0: i32, %arg1: i32) -> (i32, i32) {
    %c0_i32 = arith.constant 0 : i32
    %c0_i32_0 = arith.constant 0 : i32
    %c0_i32_1 = arith.constant 0 : i32
    return %c0_i32, %c0_i32_0 : i32, i32
  }
  func.func @transform_7(%arg0: i32, %arg1: i32) -> (i32, i32) {
    %c0_i32 = arith.constant 0 : i32
    %c0_i32_0 = arith.constant 0 : i32
    %c0_i32_1 = arith.constant 0 : i32
    return %c0_i32, %c0_i32_0 : i32, i32
  }
  func.func @transform_8(%arg0: i32, %arg1: i32) -> (i32, i32) {
    %c0_i32 = arith.constant 0 : i32
    %c0_i32_0 = arith.constant 0 : i32
    %c0_i32_1 = arith.constant 0 : i32
    return %c0_i32, %c0_i32_0 : i32, i32
  }
  func.func @transform_9(%arg0: i32, %arg1: i32) -> (i32, i32) {
    %c0_i32 = arith.constant 0 : i32
    %c0_i32_0 = arith.constant 0 : i32
    %c0_i32_1 = arith.constant 0 : i32
    return %c0_i32, %c0_i32_0 : i32, i32
  }
  func.func @transform_10(%arg0: i32, %arg1: i32) -> (i32, i32) {
    %c0_i32 = arith.constant 0 : i32
    %c0_i32_0 = arith.constant 0 : i32
    %c0_i32_1 = arith.constant 0 : i32
    return %c0_i32, %c0_i32_0 : i32, i32
  }
  func.func @transform_11(%arg0: i32, %arg1: i32) -> (i32, i32) {
    %c0_i32 = arith.constant 0 : i32
    %c0_i32_0 = arith.constant 0 : i32
    %c0_i32_1 = arith.constant 0 : i32
    return %c0_i32, %c0_i32_0 : i32, i32
  }
  func.func @transform_12(%arg0: i32, %arg1: i32) -> (i32, i32, i32) {
    %c0_i32 = arith.constant 0 : i32
    %c0_i32_0 = arith.constant 0 : i32
    return %arg0, %arg1, %c0_i32 : i32, i32, i32
  }
}

module attributes {stable_mosaic.version = 11 : i64} {
  func.func @_ffn_res_ln_kernel(%arg0: i32, %arg1: i32, %arg2: memref<32x32xf32, #tpu.memory_space<vmem>>, %arg3: memref<32x64xbf16, #tpu.memory_space<vmem>>, %arg4: memref<1x64xf32, #tpu.memory_space<vmem>>, %arg5: memref<64x32xbf16, #tpu.memory_space<vmem>>, %arg6: memref<1x32xf32, #tpu.memory_space<vmem>>, %arg7: memref<1x32xf32, #tpu.memory_space<vmem>>, %arg8: memref<1x32xf32, #tpu.memory_space<vmem>>, %arg9: memref<32x32xf32, #tpu.memory_space<vmem>>, %arg10: memref<32x32xf32, #tpu.memory_space<vmem>>) attributes {dimension_semantics = [#tpu.dimension_semantics<parallel>, #tpu.dimension_semantics<arbitrary>], iteration_bounds = array<i64: 1, 1>, scalar_prefetch = 0 : i64, scratch_operands = 1 : i64, tpu.core_type = #tpu.core_type<tc>, window_params = [{transform_indices = @transform_0, window_bounds = array<i64: 32, 32>}, {transform_indices = @transform_1, window_bounds = array<i64: 32, 64>}, {transform_indices = @transform_2, window_bounds = array<i64: 1, 64>}, {transform_indices = @transform_3, window_bounds = array<i64: 64, 32>}, {pipeline_mode = #tpu.pipeline_mode<synchronous>, transform_indices = @transform_4, window_bounds = array<i64: 1, 32>}, {pipeline_mode = #tpu.pipeline_mode<synchronous>, transform_indices = @transform_5, window_bounds = array<i64: 1, 32>}, {pipeline_mode = #tpu.pipeline_mode<synchronous>, transform_indices = @transform_6, window_bounds = array<i64: 1, 32>}, {transform_indices = @transform_7, window_bounds = array<i64: 32, 32>}]} {
    %c0_i32 = arith.constant 0 : i32
    %0 = arith.cmpi eq, %arg1, %c0_i32 : i32
    %1 = arith.extui %0 : i1 to i32
    %c0_i32_0 = arith.constant 0 : i32
    %2 = arith.cmpi ne, %1, %c0_i32_0 : i32
    scf.if %2 {
      %cst_30 = arith.constant 0.000000e+00 : f32
      %59 = vector.broadcast %cst_30 : f32 to vector<32x32xf32>
      %c0_31 = arith.constant 0 : index
      %c0_32 = arith.constant 0 : index
      %60 = vector.load %arg10[%c0_31, %c0_32] : memref<32x32xf32, #tpu.memory_space<vmem>>, vector<32x32xf32>
      tpu.vector_store %arg10[%c0_31, %c0_32], %59 {strides = array<i32>} : memref<32x32xf32, #tpu.memory_space<vmem>>, vector<32x32xf32>,
    } else {
    }
    %c0 = arith.constant 0 : index
    %c0_1 = arith.constant 0 : index
    %3 = vector.load %arg2[%c0, %c0_1] : memref<32x32xf32, #tpu.memory_space<vmem>>, vector<32x32xf32>
    %c0_2 = arith.constant 0 : index
    %c0_3 = arith.constant 0 : index
    %4 = vector.load %arg3[%c0_2, %c0_3] : memref<32x64xbf16, #tpu.memory_space<vmem>>, vector<32x64xbf16>
    %5 = arith.truncf %3 : vector<32x32xf32> to vector<32x32xbf16>
    %cst = arith.constant dense<0.000000e+00> : vector<32x64xf32>
    %6 = tpu.matmul %5, %4, %cst {dimension_numbers = #tpu.dot_dimension_numbers<[1], [0], [0], [1], [0, 0, 1, 1], [], []>} : vector<32x32xbf16>, vector<32x64xbf16>, vector<32x64xf32> -> vector<32x64xf32>
    %c0_4 = arith.constant 0 : index
    %c0_5 = arith.constant 0 : index
    %7 = vector.load %arg4[%c0_4, %c0_5] : memref<1x64xf32, #tpu.memory_space<vmem>>, vector<1x64xf32>
    %8 = vector.broadcast %7 : vector<1x64xf32> to vector<32x64xf32>
    %9 = arith.addf %6, %8 : vector<32x64xf32>
    %cst_6 = arith.constant 5.000000e-01 : f32
    %10 = vector.broadcast %cst_6 : f32 to vector<32x64xf32>
    %11 = arith.mulf %10, %9 : vector<32x64xf32>
    %cst_7 = arith.constant 0.707106769 : f32
    %12 = vector.broadcast %cst_7 : f32 to vector<32x64xf32>
    %13 = arith.mulf %9, %12 : vector<32x64xf32>
    %14 = math.absf %13 : vector<32x64xf32>
    %cst_8 = arith.constant 0.327591091 : f32
    %15 = vector.broadcast %cst_8 : f32 to vector<32x64xf32>
    %16 = arith.mulf %15, %14 : vector<32x64xf32>
    %cst_9 = arith.constant 1.000000e+00 : f32
    %17 = vector.broadcast %cst_9 : f32 to vector<32x64xf32>
    %18 = arith.addf %17, %16 : vector<32x64xf32>
    %cst_10 = arith.constant 1.000000e+00 : f32
    %19 = vector.broadcast %cst_10 : f32 to vector<32x64xf32>
    %20 = arith.divf %19, %18 : vector<32x64xf32>
    %cst_11 = arith.constant 1.06140542 : f32
    %21 = vector.broadcast %cst_11 : f32 to vector<32x64xf32>
    %22 = arith.mulf %21, %20 : vector<32x64xf32>
    %cst_12 = arith.constant -1.45315206 : f32
    %23 = vector.broadcast %cst_12 : f32 to vector<32x64xf32>
    %24 = arith.addf %22, %23 : vector<32x64xf32>
    %25 = arith.mulf %24, %20 : vector<32x64xf32>
    %cst_13 = arith.constant 1.42141378 : f32
    %26 = vector.broadcast %cst_13 : f32 to vector<32x64xf32>
    %27 = arith.addf %25, %26 : vector<32x64xf32>
    %28 = arith.mulf %27, %20 : vector<32x64xf32>
    %cst_14 = arith.constant -0.284496725 : f32
    %29 = vector.broadcast %cst_14 : f32 to vector<32x64xf32>
    %30 = arith.addf %28, %29 : vector<32x64xf32>
    %31 = arith.mulf %30, %20 : vector<32x64xf32>
    %cst_15 = arith.constant 0.254829586 : f32
    %32 = vector.broadcast %cst_15 : f32 to vector<32x64xf32>
    %33 = arith.addf %31, %32 : vector<32x64xf32>
    %34 = arith.mulf %33, %20 : vector<32x64xf32>
    %cst_16 = arith.constant 0.000000e+00 : f32
    %35 = vector.broadcast %cst_16 : f32 to vector<32x64xf32>
    %36 = arith.subf %35, %14 : vector<32x64xf32>
    %37 = arith.mulf %36, %14 : vector<32x64xf32>
    %38 = math.exp %37 : vector<32x64xf32>
    %39 = arith.mulf %34, %38 : vector<32x64xf32>
    %cst_17 = arith.constant 1.000000e+00 : f32
    %40 = vector.broadcast %cst_17 : f32 to vector<32x64xf32>
    %41 = arith.subf %40, %39 : vector<32x64xf32>
    %cst_18 = arith.constant 0.000000e+00 : f32
    %42 = vector.broadcast %cst_18 : f32 to vector<32x64xf32>
    %43 = arith.cmpf oge, %13, %42 : vector<32x64xf32>
    %cst_19 = arith.constant 0.000000e+00 : f32
    %44 = vector.broadcast %cst_19 : f32 to vector<32x64xf32>
    %45 = arith.subf %44, %41 : vector<32x64xf32>
    %46 = arith.select %43, %41, %45 : vector<32x64xi1>, vector<32x64xf32>
    %cst_20 = arith.constant 1.000000e+00 : f32
    %47 = vector.broadcast %cst_20 : f32 to vector<32x64xf32>
    %48 = arith.addf %47, %46 : vector<32x64xf32>
    %49 = arith.mulf %11, %48 : vector<32x64xf32>
    %c0_21 = arith.constant 0 : index
    %c0_22 = arith.constant 0 : index
    %50 = vector.load %arg10[%c0_21, %c0_22] : memref<32x32xf32, #tpu.memory_space<vmem>>, vector<32x32xf32>
    %c0_23 = arith.constant 0 : index
    %c0_24 = arith.constant 0 : index
    %51 = vector.load %arg5[%c0_23, %c0_24] : memref<64x32xbf16, #tpu.memory_space<vmem>>, vector<64x32xbf16>
    %52 = arith.truncf %49 : vector<32x64xf32> to vector<32x64xbf16>
    %cst_25 = arith.constant dense<0.000000e+00> : vector<32x32xf32>
    %53 = tpu.matmul %52, %51, %cst_25 {dimension_numbers = #tpu.dot_dimension_numbers<[1], [0], [0], [1], [0, 0, 1, 1], [], []>} : vector<32x64xbf16>, vector<64x32xbf16>, vector<32x32xf32> -> vector<32x32xf32>
    %54 = arith.addf %50, %53 : vector<32x32xf32>
    %c0_26 = arith.constant 0 : index
    %c0_27 = arith.constant 0 : index
    %55 = vector.load %arg10[%c0_26, %c0_27] : memref<32x32xf32, #tpu.memory_space<vmem>>, vector<32x32xf32>
    tpu.vector_store %arg10[%c0_26, %c0_27], %54 {strides = array<i32>} : memref<32x32xf32, #tpu.memory_space<vmem>>, vector<32x32xf32>,
    %c0_i32_28 = arith.constant 0 : i32
    %56 = arith.cmpi eq, %arg1, %c0_i32_28 : i32
    %57 = arith.extui %56 : i1 to i32
    %c0_i32_29 = arith.constant 0 : i32
    %58 = arith.cmpi ne, %57, %c0_i32_29 : i32
    scf.if %58 {
      %c0_30 = arith.constant 0 : index
      %c0_31 = arith.constant 0 : index
      %59 = vector.load %arg10[%c0_30, %c0_31] : memref<32x32xf32, #tpu.memory_space<vmem>>, vector<32x32xf32>
      %60 = arith.addf %3, %59 : vector<32x32xf32>
      %c0_32 = arith.constant 0 : index
      %c0_33 = arith.constant 0 : index
      %61 = vector.load %arg6[%c0_32, %c0_33] : memref<1x32xf32, #tpu.memory_space<vmem>>, vector<1x32xf32>
      %62 = vector.broadcast %61 : vector<1x32xf32> to vector<32x32xf32>
      %63 = arith.addf %60, %62 : vector<32x32xf32>
      %c0_34 = arith.constant 0 : index
      %c0_35 = arith.constant 0 : index
      %64 = vector.load %arg7[%c0_34, %c0_35] : memref<1x32xf32, #tpu.memory_space<vmem>>, vector<1x32xf32>
      %c0_36 = arith.constant 0 : index
      %c0_37 = arith.constant 0 : index
      %65 = vector.load %arg8[%c0_36, %c0_37] : memref<1x32xf32, #tpu.memory_space<vmem>>, vector<1x32xf32>
      %cst_38 = arith.constant dense<0.000000e+00> : vector<32xf32>
      %66 = vector.multi_reduction <add>, %63, %cst_38 [1] : vector<32x32xf32> to vector<32xf32>
      %67 = vector.shape_cast %66 : vector<32xf32> to vector<32x1xf32>
      %cst_39 = arith.constant 3.200000e+01 : f32
      %68 = vector.broadcast %cst_39 : f32 to vector<32x1xf32>
      %69 = arith.divf %67, %68 : vector<32x1xf32>
      %70 = vector.broadcast %69 : vector<32x1xf32> to vector<32x32xf32>
      %71 = arith.subf %63, %70 : vector<32x32xf32>
      %72 = arith.mulf %71, %71 : vector<32x32xf32>
      %cst_40 = arith.constant dense<0.000000e+00> : vector<32xf32>
      %73 = vector.multi_reduction <add>, %72, %cst_40 [1] : vector<32x32xf32> to vector<32xf32>
      %74 = vector.shape_cast %73 : vector<32xf32> to vector<32x1xf32>
      %cst_41 = arith.constant 3.200000e+01 : f32
      %75 = vector.broadcast %cst_41 : f32 to vector<32x1xf32>
      %76 = arith.divf %74, %75 : vector<32x1xf32>
      %cst_42 = arith.constant 9.99999974E-6 : f32
      %77 = vector.broadcast %cst_42 : f32 to vector<32x1xf32>
      %78 = arith.addf %76, %77 : vector<32x1xf32>
      %79 = math.rsqrt %78 : vector<32x1xf32>
      %80 = vector.broadcast %79 : vector<32x1xf32> to vector<32x32xf32>
      %81 = arith.mulf %71, %80 : vector<32x32xf32>
      %82 = vector.broadcast %64 : vector<1x32xf32> to vector<32x32xf32>
      %83 = arith.mulf %81, %82 : vector<32x32xf32>
      %84 = vector.broadcast %65 : vector<1x32xf32> to vector<32x32xf32>
      %85 = arith.addf %83, %84 : vector<32x32xf32>
      %c0_43 = arith.constant 0 : index
      %c0_44 = arith.constant 0 : index
      %86 = vector.load %arg9[%c0_43, %c0_44] : memref<32x32xf32, #tpu.memory_space<vmem>>, vector<32x32xf32>
      tpu.vector_store %arg9[%c0_43, %c0_44], %85 {strides = array<i32>} : memref<32x32xf32, #tpu.memory_space<vmem>>, vector<32x32xf32>,
    } else {
    }
    return
  }
  func.func @transform_0(%arg0: i32, %arg1: i32) -> (i32, i32) {
    %c0_i32 = arith.constant 0 : i32
    %c0_i32_0 = arith.constant 0 : i32
    return %arg0, %c0_i32 : i32, i32
  }
  func.func @transform_1(%arg0: i32, %arg1: i32) -> (i32, i32) {
    %c0_i32 = arith.constant 0 : i32
    %c0_i32_0 = arith.constant 0 : i32
    return %c0_i32, %arg1 : i32, i32
  }
  func.func @transform_2(%arg0: i32, %arg1: i32) -> (i32, i32) {
    %c0_i32 = arith.constant 0 : i32
    %c0_i32_0 = arith.constant 0 : i32
    return %c0_i32, %arg1 : i32, i32
  }
  func.func @transform_3(%arg0: i32, %arg1: i32) -> (i32, i32) {
    %c0_i32 = arith.constant 0 : i32
    %c0_i32_0 = arith.constant 0 : i32
    return %arg1, %c0_i32 : i32, i32
  }
  func.func @transform_4(%arg0: i32, %arg1: i32) -> (i32, i32) {
    %c0_i32 = arith.constant 0 : i32
    %c0_i32_0 = arith.constant 0 : i32
    %c0_i32_1 = arith.constant 0 : i32
    return %c0_i32, %c0_i32_0 : i32, i32
  }
  func.func @transform_5(%arg0: i32, %arg1: i32) -> (i32, i32) {
    %c0_i32 = arith.constant 0 : i32
    %c0_i32_0 = arith.constant 0 : i32
    %c0_i32_1 = arith.constant 0 : i32
    return %c0_i32, %c0_i32_0 : i32, i32
  }
  func.func @transform_6(%arg0: i32, %arg1: i32) -> (i32, i32) {
    %c0_i32 = arith.constant 0 : i32
    %c0_i32_0 = arith.constant 0 : i32
    %c0_i32_1 = arith.constant 0 : i32
    return %c0_i32, %c0_i32_0 : i32, i32
  }
  func.func @transform_7(%arg0: i32, %arg1: i32) -> (i32, i32) {
    %c0_i32 = arith.constant 0 : i32
    %c0_i32_0 = arith.constant 0 : i32
    return %arg0, %c0_i32 : i32, i32
  }
}

module attributes {stable_mosaic.version = 11 : i64} {
  func.func @_ffn_res_ln_kernel(%arg0: i32, %arg1: i32, %arg2: memref<32x32xf32, #tpu.memory_space<vmem>>, %arg3: memref<32x64xbf16, #tpu.memory_space<vmem>>, %arg4: memref<1x64xf32, #tpu.memory_space<vmem>>, %arg5: memref<64x32xbf16, #tpu.memory_space<vmem>>, %arg6: memref<1x32xf32, #tpu.memory_space<vmem>>, %arg7: memref<1x32xf32, #tpu.memory_space<vmem>>, %arg8: memref<1x32xf32, #tpu.memory_space<vmem>>, %arg9: memref<1x32xf32, #tpu.memory_space<vmem>>, %arg10: memref<1x32xf32, #tpu.memory_space<vmem>>, %arg11: memref<32x32xf32, #tpu.memory_space<vmem>>, %arg12: memref<32x32xf32, #tpu.memory_space<vmem>>) attributes {dimension_semantics = [#tpu.dimension_semantics<parallel>, #tpu.dimension_semantics<arbitrary>], iteration_bounds = array<i64: 1, 1>, scalar_prefetch = 0 : i64, scratch_operands = 1 : i64, tpu.core_type = #tpu.core_type<tc>, window_params = [{transform_indices = @transform_0, window_bounds = array<i64: 32, 32>}, {transform_indices = @transform_1, window_bounds = array<i64: 32, 64>}, {transform_indices = @transform_2, window_bounds = array<i64: 1, 64>}, {transform_indices = @transform_3, window_bounds = array<i64: 64, 32>}, {pipeline_mode = #tpu.pipeline_mode<synchronous>, transform_indices = @transform_4, window_bounds = array<i64: 1, 32>}, {pipeline_mode = #tpu.pipeline_mode<synchronous>, transform_indices = @transform_5, window_bounds = array<i64: 1, 32>}, {pipeline_mode = #tpu.pipeline_mode<synchronous>, transform_indices = @transform_6, window_bounds = array<i64: 1, 32>}, {pipeline_mode = #tpu.pipeline_mode<synchronous>, transform_indices = @transform_7, window_bounds = array<i64: 1, 32>}, {pipeline_mode = #tpu.pipeline_mode<synchronous>, transform_indices = @transform_8, window_bounds = array<i64: 1, 32>}, {transform_indices = @transform_9, window_bounds = array<i64: 32, 32>}]} {
    %c0_i32 = arith.constant 0 : i32
    %0 = arith.cmpi eq, %arg1, %c0_i32 : i32
    %1 = arith.extui %0 : i1 to i32
    %c0_i32_0 = arith.constant 0 : i32
    %2 = arith.cmpi ne, %1, %c0_i32_0 : i32
    scf.if %2 {
      %cst_30 = arith.constant 0.000000e+00 : f32
      %59 = vector.broadcast %cst_30 : f32 to vector<32x32xf32>
      %c0_31 = arith.constant 0 : index
      %c0_32 = arith.constant 0 : index
      %60 = vector.load %arg12[%c0_31, %c0_32] : memref<32x32xf32, #tpu.memory_space<vmem>>, vector<32x32xf32>
      tpu.vector_store %arg12[%c0_31, %c0_32], %59 {strides = array<i32>} : memref<32x32xf32, #tpu.memory_space<vmem>>, vector<32x32xf32>,
    } else {
    }
    %c0 = arith.constant 0 : index
    %c0_1 = arith.constant 0 : index
    %3 = vector.load %arg2[%c0, %c0_1] : memref<32x32xf32, #tpu.memory_space<vmem>>, vector<32x32xf32>
    %c0_2 = arith.constant 0 : index
    %c0_3 = arith.constant 0 : index
    %4 = vector.load %arg3[%c0_2, %c0_3] : memref<32x64xbf16, #tpu.memory_space<vmem>>, vector<32x64xbf16>
    %5 = arith.truncf %3 : vector<32x32xf32> to vector<32x32xbf16>
    %cst = arith.constant dense<0.000000e+00> : vector<32x64xf32>
    %6 = tpu.matmul %5, %4, %cst {dimension_numbers = #tpu.dot_dimension_numbers<[1], [0], [0], [1], [0, 0, 1, 1], [], []>} : vector<32x32xbf16>, vector<32x64xbf16>, vector<32x64xf32> -> vector<32x64xf32>
    %c0_4 = arith.constant 0 : index
    %c0_5 = arith.constant 0 : index
    %7 = vector.load %arg4[%c0_4, %c0_5] : memref<1x64xf32, #tpu.memory_space<vmem>>, vector<1x64xf32>
    %8 = vector.broadcast %7 : vector<1x64xf32> to vector<32x64xf32>
    %9 = arith.addf %6, %8 : vector<32x64xf32>
    %cst_6 = arith.constant 5.000000e-01 : f32
    %10 = vector.broadcast %cst_6 : f32 to vector<32x64xf32>
    %11 = arith.mulf %10, %9 : vector<32x64xf32>
    %cst_7 = arith.constant 0.707106769 : f32
    %12 = vector.broadcast %cst_7 : f32 to vector<32x64xf32>
    %13 = arith.mulf %9, %12 : vector<32x64xf32>
    %14 = math.absf %13 : vector<32x64xf32>
    %cst_8 = arith.constant 0.327591091 : f32
    %15 = vector.broadcast %cst_8 : f32 to vector<32x64xf32>
    %16 = arith.mulf %15, %14 : vector<32x64xf32>
    %cst_9 = arith.constant 1.000000e+00 : f32
    %17 = vector.broadcast %cst_9 : f32 to vector<32x64xf32>
    %18 = arith.addf %17, %16 : vector<32x64xf32>
    %cst_10 = arith.constant 1.000000e+00 : f32
    %19 = vector.broadcast %cst_10 : f32 to vector<32x64xf32>
    %20 = arith.divf %19, %18 : vector<32x64xf32>
    %cst_11 = arith.constant 1.06140542 : f32
    %21 = vector.broadcast %cst_11 : f32 to vector<32x64xf32>
    %22 = arith.mulf %21, %20 : vector<32x64xf32>
    %cst_12 = arith.constant -1.45315206 : f32
    %23 = vector.broadcast %cst_12 : f32 to vector<32x64xf32>
    %24 = arith.addf %22, %23 : vector<32x64xf32>
    %25 = arith.mulf %24, %20 : vector<32x64xf32>
    %cst_13 = arith.constant 1.42141378 : f32
    %26 = vector.broadcast %cst_13 : f32 to vector<32x64xf32>
    %27 = arith.addf %25, %26 : vector<32x64xf32>
    %28 = arith.mulf %27, %20 : vector<32x64xf32>
    %cst_14 = arith.constant -0.284496725 : f32
    %29 = vector.broadcast %cst_14 : f32 to vector<32x64xf32>
    %30 = arith.addf %28, %29 : vector<32x64xf32>
    %31 = arith.mulf %30, %20 : vector<32x64xf32>
    %cst_15 = arith.constant 0.254829586 : f32
    %32 = vector.broadcast %cst_15 : f32 to vector<32x64xf32>
    %33 = arith.addf %31, %32 : vector<32x64xf32>
    %34 = arith.mulf %33, %20 : vector<32x64xf32>
    %cst_16 = arith.constant 0.000000e+00 : f32
    %35 = vector.broadcast %cst_16 : f32 to vector<32x64xf32>
    %36 = arith.subf %35, %14 : vector<32x64xf32>
    %37 = arith.mulf %36, %14 : vector<32x64xf32>
    %38 = math.exp %37 : vector<32x64xf32>
    %39 = arith.mulf %34, %38 : vector<32x64xf32>
    %cst_17 = arith.constant 1.000000e+00 : f32
    %40 = vector.broadcast %cst_17 : f32 to vector<32x64xf32>
    %41 = arith.subf %40, %39 : vector<32x64xf32>
    %cst_18 = arith.constant 0.000000e+00 : f32
    %42 = vector.broadcast %cst_18 : f32 to vector<32x64xf32>
    %43 = arith.cmpf oge, %13, %42 : vector<32x64xf32>
    %cst_19 = arith.constant 0.000000e+00 : f32
    %44 = vector.broadcast %cst_19 : f32 to vector<32x64xf32>
    %45 = arith.subf %44, %41 : vector<32x64xf32>
    %46 = arith.select %43, %41, %45 : vector<32x64xi1>, vector<32x64xf32>
    %cst_20 = arith.constant 1.000000e+00 : f32
    %47 = vector.broadcast %cst_20 : f32 to vector<32x64xf32>
    %48 = arith.addf %47, %46 : vector<32x64xf32>
    %49 = arith.mulf %11, %48 : vector<32x64xf32>
    %c0_21 = arith.constant 0 : index
    %c0_22 = arith.constant 0 : index
    %50 = vector.load %arg12[%c0_21, %c0_22] : memref<32x32xf32, #tpu.memory_space<vmem>>, vector<32x32xf32>
    %c0_23 = arith.constant 0 : index
    %c0_24 = arith.constant 0 : index
    %51 = vector.load %arg5[%c0_23, %c0_24] : memref<64x32xbf16, #tpu.memory_space<vmem>>, vector<64x32xbf16>
    %52 = arith.truncf %49 : vector<32x64xf32> to vector<32x64xbf16>
    %cst_25 = arith.constant dense<0.000000e+00> : vector<32x32xf32>
    %53 = tpu.matmul %52, %51, %cst_25 {dimension_numbers = #tpu.dot_dimension_numbers<[1], [0], [0], [1], [0, 0, 1, 1], [], []>} : vector<32x64xbf16>, vector<64x32xbf16>, vector<32x32xf32> -> vector<32x32xf32>
    %54 = arith.addf %50, %53 : vector<32x32xf32>
    %c0_26 = arith.constant 0 : index
    %c0_27 = arith.constant 0 : index
    %55 = vector.load %arg12[%c0_26, %c0_27] : memref<32x32xf32, #tpu.memory_space<vmem>>, vector<32x32xf32>
    tpu.vector_store %arg12[%c0_26, %c0_27], %54 {strides = array<i32>} : memref<32x32xf32, #tpu.memory_space<vmem>>, vector<32x32xf32>,
    %c0_i32_28 = arith.constant 0 : i32
    %56 = arith.cmpi eq, %arg1, %c0_i32_28 : i32
    %57 = arith.extui %56 : i1 to i32
    %c0_i32_29 = arith.constant 0 : i32
    %58 = arith.cmpi ne, %57, %c0_i32_29 : i32
    scf.if %58 {
      %c0_30 = arith.constant 0 : index
      %c0_31 = arith.constant 0 : index
      %59 = vector.load %arg12[%c0_30, %c0_31] : memref<32x32xf32, #tpu.memory_space<vmem>>, vector<32x32xf32>
      %60 = arith.addf %3, %59 : vector<32x32xf32>
      %c0_32 = arith.constant 0 : index
      %c0_33 = arith.constant 0 : index
      %61 = vector.load %arg6[%c0_32, %c0_33] : memref<1x32xf32, #tpu.memory_space<vmem>>, vector<1x32xf32>
      %62 = vector.broadcast %61 : vector<1x32xf32> to vector<32x32xf32>
      %63 = arith.addf %60, %62 : vector<32x32xf32>
      %c0_34 = arith.constant 0 : index
      %c0_35 = arith.constant 0 : index
      %64 = vector.load %arg7[%c0_34, %c0_35] : memref<1x32xf32, #tpu.memory_space<vmem>>, vector<1x32xf32>
      %c0_36 = arith.constant 0 : index
      %c0_37 = arith.constant 0 : index
      %65 = vector.load %arg8[%c0_36, %c0_37] : memref<1x32xf32, #tpu.memory_space<vmem>>, vector<1x32xf32>
      %cst_38 = arith.constant dense<0.000000e+00> : vector<32xf32>
      %66 = vector.multi_reduction <add>, %63, %cst_38 [1] : vector<32x32xf32> to vector<32xf32>
      %67 = vector.shape_cast %66 : vector<32xf32> to vector<32x1xf32>
      %cst_39 = arith.constant 3.200000e+01 : f32
      %68 = vector.broadcast %cst_39 : f32 to vector<32x1xf32>
      %69 = arith.divf %67, %68 : vector<32x1xf32>
      %70 = vector.broadcast %69 : vector<32x1xf32> to vector<32x32xf32>
      %71 = arith.subf %63, %70 : vector<32x32xf32>
      %72 = arith.mulf %71, %71 : vector<32x32xf32>
      %cst_40 = arith.constant dense<0.000000e+00> : vector<32xf32>
      %73 = vector.multi_reduction <add>, %72, %cst_40 [1] : vector<32x32xf32> to vector<32xf32>
      %74 = vector.shape_cast %73 : vector<32xf32> to vector<32x1xf32>
      %cst_41 = arith.constant 3.200000e+01 : f32
      %75 = vector.broadcast %cst_41 : f32 to vector<32x1xf32>
      %76 = arith.divf %74, %75 : vector<32x1xf32>
      %cst_42 = arith.constant 9.99999974E-6 : f32
      %77 = vector.broadcast %cst_42 : f32 to vector<32x1xf32>
      %78 = arith.addf %76, %77 : vector<32x1xf32>
      %79 = math.rsqrt %78 : vector<32x1xf32>
      %80 = vector.broadcast %79 : vector<32x1xf32> to vector<32x32xf32>
      %81 = arith.mulf %71, %80 : vector<32x32xf32>
      %82 = vector.broadcast %64 : vector<1x32xf32> to vector<32x32xf32>
      %83 = arith.mulf %81, %82 : vector<32x32xf32>
      %84 = vector.broadcast %65 : vector<1x32xf32> to vector<32x32xf32>
      %85 = arith.addf %83, %84 : vector<32x32xf32>
      %c0_43 = arith.constant 0 : index
      %c0_44 = arith.constant 0 : index
      %86 = vector.load %arg9[%c0_43, %c0_44] : memref<1x32xf32, #tpu.memory_space<vmem>>, vector<1x32xf32>
      %c0_45 = arith.constant 0 : index
      %c0_46 = arith.constant 0 : index
      %87 = vector.load %arg10[%c0_45, %c0_46] : memref<1x32xf32, #tpu.memory_space<vmem>>, vector<1x32xf32>
      %cst_47 = arith.constant dense<0.000000e+00> : vector<32xf32>
      %88 = vector.multi_reduction <add>, %85, %cst_47 [1] : vector<32x32xf32> to vector<32xf32>
      %89 = vector.shape_cast %88 : vector<32xf32> to vector<32x1xf32>
      %cst_48 = arith.constant 3.200000e+01 : f32
      %90 = vector.broadcast %cst_48 : f32 to vector<32x1xf32>
      %91 = arith.divf %89, %90 : vector<32x1xf32>
      %92 = vector.broadcast %91 : vector<32x1xf32> to vector<32x32xf32>
      %93 = arith.subf %85, %92 : vector<32x32xf32>
      %94 = arith.mulf %93, %93 : vector<32x32xf32>
      %cst_49 = arith.constant dense<0.000000e+00> : vector<32xf32>
      %95 = vector.multi_reduction <add>, %94, %cst_49 [1] : vector<32x32xf32> to vector<32xf32>
      %96 = vector.shape_cast %95 : vector<32xf32> to vector<32x1xf32>
      %cst_50 = arith.constant 3.200000e+01 : f32
      %97 = vector.broadcast %cst_50 : f32 to vector<32x1xf32>
      %98 = arith.divf %96, %97 : vector<32x1xf32>
      %cst_51 = arith.constant 9.99999974E-6 : f32
      %99 = vector.broadcast %cst_51 : f32 to vector<32x1xf32>
      %100 = arith.addf %98, %99 : vector<32x1xf32>
      %101 = math.rsqrt %100 : vector<32x1xf32>
      %102 = vector.broadcast %101 : vector<32x1xf32> to vector<32x32xf32>
      %103 = arith.mulf %93, %102 : vector<32x32xf32>
      %104 = vector.broadcast %86 : vector<1x32xf32> to vector<32x32xf32>
      %105 = arith.mulf %103, %104 : vector<32x32xf32>
      %106 = vector.broadcast %87 : vector<1x32xf32> to vector<32x32xf32>
      %107 = arith.addf %105, %106 : vector<32x32xf32>
      %c0_52 = arith.constant 0 : index
      %c0_53 = arith.constant 0 : index
      %108 = vector.load %arg11[%c0_52, %c0_53] : memref<32x32xf32, #tpu.memory_space<vmem>>, vector<32x32xf32>
      tpu.vector_store %arg11[%c0_52, %c0_53], %107 {strides = array<i32>} : memref<32x32xf32, #tpu.memory_space<vmem>>, vector<32x32xf32>,
    } else {
    }
    return
  }
  func.func @transform_0(%arg0: i32, %arg1: i32) -> (i32, i32) {
    %c0_i32 = arith.constant 0 : i32
    %c0_i32_0 = arith.constant 0 : i32
    return %arg0, %c0_i32 : i32, i32
  }
  func.func @transform_1(%arg0: i32, %arg1: i32) -> (i32, i32) {
    %c0_i32 = arith.constant 0 : i32
    %c0_i32_0 = arith.constant 0 : i32
    return %c0_i32, %arg1 : i32, i32
  }
  func.func @transform_2(%arg0: i32, %arg1: i32) -> (i32, i32) {
    %c0_i32 = arith.constant 0 : i32
    %c0_i32_0 = arith.constant 0 : i32
    return %c0_i32, %arg1 : i32, i32
  }
  func.func @transform_3(%arg0: i32, %arg1: i32) -> (i32, i32) {
    %c0_i32 = arith.constant 0 : i32
    %c0_i32_0 = arith.constant 0 : i32
    return %arg1, %c0_i32 : i32, i32
  }
  func.func @transform_4(%arg0: i32, %arg1: i32) -> (i32, i32) {
    %c0_i32 = arith.constant 0 : i32
    %c0_i32_0 = arith.constant 0 : i32
    %c0_i32_1 = arith.constant 0 : i32
    return %c0_i32, %c0_i32_0 : i32, i32
  }
  func.func @transform_5(%arg0: i32, %arg1: i32) -> (i32, i32) {
    %c0_i32 = arith.constant 0 : i32
    %c0_i32_0 = arith.constant 0 : i32
    %c0_i32_1 = arith.constant 0 : i32
    return %c0_i32, %c0_i32_0 : i32, i32
  }
  func.func @transform_6(%arg0: i32, %arg1: i32) -> (i32, i32) {
    %c0_i32 = arith.constant 0 : i32
    %c0_i32_0 = arith.constant 0 : i32
    %c0_i32_1 = arith.constant 0 : i32
    return %c0_i32, %c0_i32_0 : i32, i32
  }
  func.func @transform_7(%arg0: i32, %arg1: i32) -> (i32, i32) {
    %c0_i32 = arith.constant 0 : i32
    %c0_i32_0 = arith.constant 0 : i32
    %c0_i32_1 = arith.constant 0 : i32
    return %c0_i32, %c0_i32_0 : i32, i32
  }
  func.func @transform_8(%arg0: i32, %arg1: i32) -> (i32, i32) {
    %c0_i32 = arith.constant 0 : i32
    %c0_i32_0 = arith.constant 0 : i32
    %c0_i32_1 = arith.constant 0 : i32
    return %c0_i32, %c0_i32_0 : i32, i32
  }
  func.func @transform_9(%arg0: i32, %arg1: i32) -> (i32, i32) {
    %c0_i32 = arith.constant 0 : i32
    %c0_i32_0 = arith.constant 0 : i32
    return %arg0, %c0_i32 : i32, i32
  }
}

module attributes {stable_mosaic.version = 11 : i64} {
  func.func @_linear_kernel(%arg0: i32, %arg1: memref<16x32xf32, #tpu.memory_space<vmem>>, %arg2: memref<32x4xbf16, #tpu.memory_space<vmem>>, %arg3: memref<1x4xf32, #tpu.memory_space<vmem>>, %arg4: memref<16x4xf32, #tpu.memory_space<vmem>>) attributes {dimension_semantics = [#tpu.dimension_semantics<parallel>], iteration_bounds = array<i64: 1>, scalar_prefetch = 0 : i64, scratch_operands = 0 : i64, tpu.core_type = #tpu.core_type<tc>, window_params = [{transform_indices = @transform_0, window_bounds = array<i64: 16, 32>}, {pipeline_mode = #tpu.pipeline_mode<synchronous>, transform_indices = @transform_1, window_bounds = array<i64: 32, 4>}, {pipeline_mode = #tpu.pipeline_mode<synchronous>, transform_indices = @transform_2, window_bounds = array<i64: 1, 4>}, {transform_indices = @transform_3, window_bounds = array<i64: 16, 4>}]} {
    %c0 = arith.constant 0 : index
    %c0_0 = arith.constant 0 : index
    %0 = vector.load %arg1[%c0, %c0_0] : memref<16x32xf32, #tpu.memory_space<vmem>>, vector<16x32xf32>
    %c0_1 = arith.constant 0 : index
    %c0_2 = arith.constant 0 : index
    %1 = vector.load %arg2[%c0_1, %c0_2] : memref<32x4xbf16, #tpu.memory_space<vmem>>, vector<32x4xbf16>
    %2 = arith.truncf %0 : vector<16x32xf32> to vector<16x32xbf16>
    %cst = arith.constant dense<0.000000e+00> : vector<16x4xf32>
    %3 = tpu.matmul %2, %1, %cst {dimension_numbers = #tpu.dot_dimension_numbers<[1], [0], [0], [1], [0, 0, 1, 1], [], []>} : vector<16x32xbf16>, vector<32x4xbf16>, vector<16x4xf32> -> vector<16x4xf32>
    %c0_3 = arith.constant 0 : index
    %c0_4 = arith.constant 0 : index
    %4 = vector.load %arg3[%c0_3, %c0_4] : memref<1x4xf32, #tpu.memory_space<vmem>>, vector<1x4xf32>
    %5 = vector.broadcast %4 : vector<1x4xf32> to vector<16x4xf32>
    %6 = arith.addf %3, %5 : vector<16x4xf32>
    %c0_5 = arith.constant 0 : index
    %c0_6 = arith.constant 0 : index
    %7 = vector.load %arg4[%c0_5, %c0_6] : memref<16x4xf32, #tpu.memory_space<vmem>>, vector<16x4xf32>
    tpu.vector_store %arg4[%c0_5, %c0_6], %6 {strides = array<i32>} : memref<16x4xf32, #tpu.memory_space<vmem>>, vector<16x4xf32>,
    return
  }
  func.func @transform_0(%arg0: i32) -> (i32, i32) {
    %c0_i32 = arith.constant 0 : i32
    %c0_i32_0 = arith.constant 0 : i32
    return %arg0, %c0_i32 : i32, i32
  }
  func.func @transform_1(%arg0: i32) -> (i32, i32) {
    %c0_i32 = arith.constant 0 : i32
    %c0_i32_0 = arith.constant 0 : i32
    %c0_i32_1 = arith.constant 0 : i32
    return %c0_i32, %c0_i32_0 : i32, i32
  }
  func.func @transform_2(%arg0: i32) -> (i32, i32) {
    %c0_i32 = arith.constant 0 : i32
    %c0_i32_0 = arith.constant 0 : i32
    %c0_i32_1 = arith.constant 0 : i32
    return %c0_i32, %c0_i32_0 : i32, i32
  }
  func.func @transform_3(%arg0: i32) -> (i32, i32) {
    %c0_i32 = arith.constant 0 : i32
    %c0_i32_0 = arith.constant 0 : i32
    return %arg0, %c0_i32 : i32, i32
  }
}

</mosaic_0001>

<bundles_post_ra>
// kernel: informer_forward.9
= control target key start
LH: loop header
LB: loop body
LE: loop exit
PB: predicated region body
PF: predicated region fallthrough
CT: control target
= control target key end

     0   :  { %s560_s21 = smov 0   ;;  %s595_s0 = inlined_call_operand.vmem [shape: f32[2,16,12], index: 0, kind: input, shape index: {}]   ;;  %s596_s1 = inlined_call_operand.vmem [shape: f32[2,16,4], index: 1, kind: input, shape index: {}]   ;;  %s597_s2 = inlined_call_operand.vmem [shape: bf16[12,32], index: 2, kind: input, shape index: {}]   ;;  %s598_s3 = inlined_call_operand.vmem [shape: bf16[4,32], index: 3, kind: input, shape index: {}]   ;;  %s599_s4 = inlined_call_operand.vmem [shape: f32[1,32], index: 4, kind: input, shape index: {}]   ;;  %s600_s5 = inlined_call_operand.vmem [shape: f32[16,32], index: 5, kind: input, shape index: {}]   ;;  %s601_s6 = inlined_call_operand.vmem [shape: f32[2,16,32], index: 6, kind: output, shape index: {}]  }
   0x1 LB: > { %s468_s22 = sadd.s32 4294967295, %s521_s21   ;;  %p472_p0 = scmp.ge.s32.totalorder %s521_s21, 1  ;;  %s521_s21 = sphi %s560_s21, %s16_s21  }
   0x2   : > { %p222_p1 = scmp.lt.s32.totalorder %s521_s21, 3 }
   0x4   : > { %p223_p2 = pnand %p472_p0, %p222_p1 }
   0x5   : > { %v280_v0 = vld [vmem:[%s598_s3] sm:$0x3] (!%p223_p2)  ;;  %vm286_vm0 = vcmask (!%p223_p2), 1041408   ;;  %v523_v1 = vmov (!%p223_p2), 0.0   ;;  %vm340_vm1 = vcmask (!%p223_p2), 1045504   ;;  %p257_p3 = scmp.lt.s32.totalorder (!%p223_p2), %s468_s22, 1 }
   0x6   : > { %226 = sbr.rel (%p223_p2) target bundleno = 241 (0xf1), region = 44  ;;  %492 = vmatprep.subr.bf16.mxu0 (!%p223_p2), %v523_v1  ;;  %498 = vmatprep.subr.bf16.mxu1 (!%p223_p2), %v523_v1  ;;  %v288_v2 = vsel (!%p223_p2), %vm286_vm0, %v280_v0, 0  ;;  %v514_v3 = vld [vmem:[%s597_s2] sm:$0x3f] (!%p223_p2)   ;;  %vm524_vm2 = vmmov (!%p223_p2), 0   ;;  %vm282_vm3 = vcmask (!%p223_p2), 31744  }
   0x7   : > { %493 = vmatpush3.bf16.msra.mxu0 (!%p223_p2), %v288_v2  ;;  %v342_v4 = vsel (!%p223_p2), %vm340_vm1, %v514_v3, 0  ;;  %494 = vmatprep.mubr.msk.bf16.mxu0 (!%p223_p2), %vm524_vm2, %v523_v1  ;;  %vm336_vm4 = vcmask (!%p223_p2), 97280   ;;  %v482_v13 = vld [vmem:[%s599_s4] ss:$0 sm:$0xff] (!%p223_p2)  ;;  %vm398_vm5 = vcmask (!%p223_p2), 261120   ;;  %v395_v24 = vld [vmem:[%s600_s5 + $0x8] sm:$0xff] (!%p223_p2) }
   0x8   : > { %500 = vmatprep.mubr.msk.bf16.mxu1 (!%p223_p2), %vm524_vm2, %v523_v1  ;;  %499 = vmatpush3.bf16.msra.mxu1 (!%p223_p2), %v342_v4  ;;  %v394_v18 = vld [vmem:[%s600_s5] sm:$0xff] (!%p223_p2) }
   0xd   : > { %s603_s22 = smov (!%p257_p3, %s468_s22), 1 }
   0xe   : > { %s485_s27 = sshll.u32 %s603_s22, 4 }
   0xf   : > { %s266_s30 = scalar_lea.vmem %s596_s1, %s485_s27  ;;  %s261_s9 = scalar_lea.vmem %s595_s0, %s485_s27 }
  0x10   : > { %v275_v5 = vld [vmem:[%s266_s30] sm:$0xff]  ;;  %v276_v6 = vld [vmem:[%s266_s30 + $0x8] sm:$0xff]  ;;  %s271_s16 = scalar_lea.vmem %s601_s6, %s485_s27 }
  0x11   : > { %v273_v7 = vld [vmem:[%s261_s9] sm:$0xff]  ;;  %v281_v8 = vpack.c.bf16 %v276_v6, %v275_v5  ;;  %v274_v9 = vld [vmem:[%s261_s9 + $0x8] sm:$0xff] }
  0x12   : > { %v279_v10 = vpack.c.bf16 %v274_v9, %v273_v7 }
  0x13   : > { %495 = vmatmul.mubr.msk.bf16.vlgmr.msra.gmra.mrb[0].mxu0 %vm282_vm3, %v281_v8 }
  0x14   : > { %501 = vmatmul.mubr.msk.bf16.vlgmr.msra.gmra.mrb[0].mxu1 %vm336_vm4, %v279_v10 }
  0xe6   : > { %v324_v11 = vpop.f32.mrb[0].mxu0 }
  0xe7   : > { %v378_v12 = vpop.f32.mrb[0].mxu1  ;;  %v496_v14 = vpop.f32.mrb[1].mxu0 }
  0xe8   : > { %v379_v15 = vadd.f32 %v378_v12, %v324_v11  ;;  %v502_v16 = vpop.f32.mrb[1].mxu1  ;;  %v327_v17 = vpop.f32.mrb[2].mxu0 }
  0xe9   : > { %v381_v19 = vpop.f32.mrb[2].mxu1  ;;  %v497_v20 = vpop.f32.mrb[3].mxu0 }
  0xea   : > { %v392_v21 = vadd.f32 %v482_v13, %v379_v15  ;;  %v382_v22 = vadd.f32 %v381_v19, %v327_v17  ;;  %v503_v23 = vpop.f32.mrb[3].mxu1 }
  0xec   : > { %v396_v25 = vadd.f32 %v394_v18, %v392_v21  ;;  %v393_v26 = vadd.f32 %v482_v13, %v382_v22 }
  0xee   : > { %399 = vst.msk [vmem:[%s271_s16] sm:$0xff] %vm398_vm5, %v396_v25  ;;  %v397_v27 = vadd.f32 %v395_v24, %v393_v26 }
  0xf0   : > { %400 = vst.msk [vmem:[%s271_s16 + $0x8] sm:$0xff] %vm398_vm5, %v397_v27 }
  0xf1 PF: > { %s16_s21 = sadd.s32 1, %s521_s21  }
  0xf2   : > { %p13_p4 = scmp.ge.s32.totalorder %s16_s21, 4  }
  0xf4   :  { %15 = sbr.rel (!%p13_p4) target bundleno = 1 (0x1), region = 77 }

// kernel: informer_forward.11
= control target key start
LH: loop header
LB: loop body
LE: loop exit
PB: predicated region body
PF: predicated region fallthrough
CT: control target
= control target key end

     0   :  { %s1778_s21 = smov 0   ;;  %s1780_s22 = smov 0   ;;  %s1974_s0 = inlined_call_operand.vmem [shape: f32[2,16,32], index: 0, kind: input, shape index: {}, may-alias: {0,1}]   ;;  %s1975_s1 = inlined_call_operand.vmem [shape: f32[2,16,32], index: 1, kind: input, shape index: {}, may-alias: {0,1}]   ;;  %s1976_s2 = inlined_call_operand.vmem [shape: bf16[32,32], index: 2, kind: input, shape index: {}]   ;;  %s1977_s3 = inlined_call_operand.vmem [shape: f32[1,32], index: 3, kind: input, shape index: {}]   ;;  %s1978_s4 = inlined_call_operand.vmem [shape: bf16[32,32], index: 4, kind: input, shape index: {}]   ;;  %s1979_s5 = inlined_call_operand.vmem [shape: f32[1,32], index: 5, kind: input, shape index: {}]   ;;  %s1980_s6 = inlined_call_operand.vmem [shape: bf16[32,32], index: 6, kind: input, shape index: {}]   ;;  %s1981_s7 = inlined_call_operand.vmem [shape: f32[1,32], index: 7, kind: input, shape index: {}]   ;;  %s1982_s8 = inlined_call_operand.vmem [shape: bf16[32,32], index: 8, kind: input, shape index: {}]   ;;  %s1983_s9 = inlined_call_operand.vmem [shape: f32[1,32], index: 9, kind: input, shape index: {}]   ;;  %s1984_s10 = inlined_call_operand.vmem [shape: f32[1,32], index: 10, kind: input, shape index: {}]   ;;  %s1985_s11 = inlined_call_operand.vmem [shape: f32[1,32], index: 11, kind: input, shape index: {}]   ;;  %s1986_s12 = inlined_call_operand.vmem [shape: f32[2,16,32], index: 12, kind: output, shape index: {}]  }
   0x1   :  { %s1782_s23 = smov 0  }
   0x2 LB: > { %s34_s24 = sadd.s32 1, %s1699_s22  ;;  %p1444_p0 = scmp.ge.s32.totalorder %s1703_s23, 1  ;;  %s1703_s23 = sphi %s1782_s23, %s22_s23   ;;  %s1699_s22 = sphi %s1780_s22, %s1988_s22   ;;  %s1695_s21 = sphi %s1778_s21, %s1987_s21  }
   0x3   : > { %p36_p1 = scmp.ge.s32.totalorder %s34_s24, 2  ;;  %p393_p2 = scmp.lt.s32.totalorder %s1703_s23, 3 }
   0x5   : > { %s1990_s24 = smov (%p36_p1, %s34_s24), 0  ;;  %p394_p3 = pnand %p1444_p0, %p393_p2 }
   0x6   : > { %v1637_v0 = vld [vmem:[%s1978_s4] sm:$0xff] (!%p394_p3)   ;;  %v1705_v1 = vmov (!%p394_p3), 0.0   ;;  %v1639_v3 = vld [vmem:[%s1978_s4 + $0x8] sm:$0xff] (!%p394_p3)   ;;  %vm1706_vm0 = vmmov (!%p394_p3), 0   ;;  %p449_p4 = scmp.lt.s32.totalorder (!%p394_p3), %s1695_s21, 1  ;;  %vm502_vm1 = vcmask (!%p394_p3), 261120   ;;  %v680_v39 = vlaneseq (!%p394_p3) }
   0x7   : > { %397 = sbr.rel (%p394_p3) target bundleno = 1782 (0x6f6), region = 68  ;;  %1518 = vmatprep.subr.bf16.mxu1 (!%p394_p3), %v1705_v1  ;;  %1510 = vmatprep.subr.bf16.mxu0 (!%p394_p3), %v1705_v1  ;;  %v1638_v2 = vld [vmem:[%s1976_s2] sm:$0xff] (!%p394_p3)   ;;  %v1640_v4 = vld [vmem:[%s1976_s2 + $0x8] sm:$0xff] (!%p394_p3)   ;;  %vm692_vm2 = vcmask (!%p394_p3), 64512   ;;  %s1707_s29 = smov (!%p394_p3), 112   ;;  %vm744_vm5 = vcmask (!%p394_p3), 130048  }
   0x8   : > { %1519 = vmatpush3.bf16.msra.mxu1 (!%p394_p3), %v1637_v0  ;;  %1522 = vmatprep.mubr.msk.bf16.mxu1 (!%p394_p3), %vm1706_vm0, %v1705_v1  ;;  %v1451_v11 = vld [vmem:[%s1977_s3] ss:$0 sm:$0xff] (!%p394_p3)  ;;  %s1708_s30 = smov (!%p394_p3), 120   ;;  %s1709_s13 = smov (!%p394_p3), 104   ;;  %v1642_v29 = vld [vmem:[%s1980_s6 + $0x8] sm:$0xff] (!%p394_p3)   ;;  %v681_v40 = vshrl.u32 (!%p394_p3), %v680_v39, 7 }
   0x9   : > { %1520 = vmatprep.subr.bf16.mxu1 (!%p394_p3), %v1705_v1  ;;  %1511 = vmatpush3.bf16.msra.mxu0 (!%p394_p3), %v1638_v2  ;;  %v1455_v12 = vld [vmem:[%s1979_s5] ss:$0 sm:$0xff] (!%p394_p3)  ;;  %v687_v41 = vand.u32 (!%p394_p3), 127, %v680_v39  ;;  %s1710_s26 = smov (!%p394_p3), 8   ;;  %vm1219_vm6 = vcmask (!%p394_p3), 195584  }
   0xa   : > { %1512 = vmatprep.subr.bf16.mxu0 (!%p394_p3), %v1705_v1  ;;  %1514 = vmatprep.mubr.msk.bf16.mxu0 (!%p394_p3), %vm1706_vm0, %v1705_v1  ;;  %v1641_v28 = vld [vmem:[%s1980_s6] sm:$0xff] (!%p394_p3)   ;;  %v682_v42 = vadd.s32 (!%p394_p3), 8, %v681_v40 }
   0xb   : > { %vm688_vm3 = vcmp.gt.s32.totalorder (!%p394_p3), %v687_v41, %v681_v40  ;;  %v1459_v53 = vld [vmem:[%s1981_s7] ss:$0 sm:$0xff] (!%p394_p3) }
   0xc   : > { %1521 = vmatpush3.bf16.msra.mxu1 (!%p394_p3), %v1639_v3  ;;  %vm689_vm4 = vcmp.gt.s32.totalorder (!%p394_p3), %v687_v41, %v682_v42 }
   0xd   : > { %1513 = vmatpush3.bf16.msra.mxu0 (!%p394_p3), %v1640_v4  ;;  %1534 = vmatprep.subr.bf16.mxu1 (!%p394_p3), %v1705_v1 }
   0xe   : > { %s1992_s21 = smov (!%p449_p4, %s1695_s21), 1  ;;  %1526 = vmatprep.subr.bf16.mxu0 %v1705_v1 }
   0xf   : > { %s1816_s15 = sshll.u32 %s1992_s21, 4 }
  0x10   : > { %s462_s18 = scalar_lea.vmem %s1975_s1, %s1816_s15  ;;  %s456_s25 = scalar_lea.vmem %s1974_s0, %s1816_s15 }
  0x11   : > { %v476_v5 = vld [vmem:[%s462_s18] sm:$0xff]  ;;  %v477_v6 = vld [vmem:[%s462_s18 + $0x8] sm:$0xff]  ;;  %s471_s21 = scalar_lea.vmem %s1986_s12, %s1816_s15 }
  0x12   : > { %v551_v7 = vpack.c.bf16 %v477_v6, %v476_v5  ;;  %v1828_v8 = vld [vmem:[%s456_s25] sm:$0xff]  ;;  %v1830_v9 = vld [vmem:[%s456_s25 + $0x8] sm:$0xff] }
  0x13   : > { %v482_v10 = vpack.c.bf16 %v1830_v9, %v1828_v8 }
  0x14   : > { %1523 = vmatmul.mubr.msk.bf16.vlgmr.msra.gmra.mrb[0].mxu1 %vm502_vm1, %v551_v7 }
  0x15   : > { %1515 = vmatmul.mubr.msk.bf16.vlgmr.msra.gmra.mrb[0].mxu0 %vm502_vm1, %v482_v10  ;;  %1536 = vmatprep.mubr.msk.bf16.mxu1 %vm1706_vm0, %v1705_v1 }
  0x16   : > { %1530 = vmatprep.mubr.msk.bf16.mxu0 %vm1706_vm0, %v1705_v1  ;;  %1527 = vmatpush3.bf16.msra.mxu0 %v1641_v28 }
  0x17   : > { %1528 = vmatprep.subr.bf16.mxu0 %v1705_v1 }
  0x1a   : > { %1529 = vmatpush3.bf16.msra.mxu0 %v1642_v29 }
  0x1b   : > { %1540 = vmatprep.subr.bf16.mxu0 %v1705_v1 }
  0x1d   : > { %1531 = vmatmul.mubr.msk.bf16.vlgmr.msra.gmra.mrb[4].mxu0 %vm502_vm1, %v551_v7 }
  0x1e   : > { %1542 = vmatprep.mubr.msk.bf16.mxu0 %vm1706_vm0, %v1705_v1 }
  0xe7   : > { %v608_v13 = vpop.f32.mrb[0].mxu1 }
  0xe8   : > { %v1524_v14 = vpop.f32.mrb[1].mxu1  ;;  %v540_v15 = vpop.f32.mrb[0].mxu0  ;;  %v609_v19 = vadd.f32 %v1455_v12, %v608_v13 }
  0xe9   : > { %v611_v16 = vpop.f32.mrb[2].mxu1  ;;  %v541_v17 = vadd.f32 %v1451_v11, %v540_v15  ;;  %v1516_v18 = vpop.f32.mrb[1].mxu0 }
  0xea   : > { %v612_v20 = vadd.f32 %v1455_v12, %v611_v16  ;;  %v1525_v21 = vpop.f32.mrb[3].mxu1  ;;  %v543_v22 = vpop.f32.mrb[2].mxu0 }
  0xeb   : > { %v544_v23 = vadd.f32 %v1451_v11, %v543_v22  ;;  %v1517_v24 = vpop.f32.mrb[3].mxu0 }
  0xec   : > { %v691_v25 = vpack.c.bf16 %v612_v20, %v609_v19 }
  0xed   : > { %v690_v26 = vpack.c.bf16 %v544_v23, %v541_v17 }
  0xee   : > { %943 = vrot.lane.b32.xlu1 %v691_v25, %s1707_s29  ;;  %817 = vrot.lane.b32.xlu0 %v691_v25, %s1708_s30  ;;  %v697_v27 = vsel %vm692_vm2, %v691_v25, 0 }
  0xef   : > { %1535 = vmatpush3.bf16.xpose.msra.mxu1 %v697_v27 }
  0xf0   : > { %1546 = vmatprep.subr.bf16.mxu1 %v1705_v1  ;;  %v672_v54 = vpop.f32.mrb[4].mxu0 }
  0xf1   : > { %v673_v55 = vadd.f32 %v1459_v53, %v672_v54  ;;  %v1532_v56 = vpop.f32.mrb[5].mxu0 }
  0xf2   : > { %941 = vrot.lane.b32.xlu1 %v690_v26, %s1707_s29  ;;  %814 = vrot.lane.b32.xlu0 %v690_v26, %s1708_s30  ;;  %v675_v57 = vpop.f32.mrb[6].mxu0 }
  0xf3   : > { %v676_v58 = vadd.f32 %v1459_v53, %v675_v57  ;;  %v1533_v59 = vpop.f32.mrb[7].mxu0 }
  0xf5   : > { %v1890_v60 = vpack.c.bf16 %v676_v58, %v673_v55 }
  0xf6   : > { %1066 = vrot.lane.b32.xlu1 %v690_v26, %s1709_s13  ;;  %1068 = vrot.lane.b32.xlu0 %v691_v25, %s1709_s13 }
  0xf7   : > { %1537 = vmatmul.mubr.msk.bf16.vlgmr.msra.gmra.mrb[4].mxu1 %vm692_vm2, %v690_v26  ;;  %1541 = vmatpush3.bf16.msra.mxu0 %v1890_v60 }
  0xf8   : > { %1548 = vmatprep.mubr.msk.bf16.mxu1 %vm1706_vm0, %v1705_v1  ;;  %1552 = vmatprep.subr.bf16.mxu0 %v1705_v1 }
 0x160   : > { %v818_v30 = vpop.permute.xlu0 %817  ;;  %v944_v32 = vpop.permute.xlu1 %943 }
 0x161   : > { %v823_v31 = vsel %vm692_vm2, %v818_v30, 0  ;;  %v949_v34 = vsel %vm692_vm2, %v944_v32, 0 }
 0x162   : > { %1547 = vmatpush3.bf16.xpose.msra.mxu1 %v823_v31 }
 0x163   : > { %1558 = vmatprep.subr.bf16.mxu1 %v1705_v1 }
 0x164   : > { %v815_v33 = vpop.permute.xlu0 %814  ;;  %v942_v36 = vpop.permute.xlu1 %941 }
 0x168   : > { %v1069_v35 = vpop.permute.xlu0 %1068  ;;  %v1067_v38 = vpop.permute.xlu1 %1066 }
 0x169   : > { %1549 = vmatmul.mubr.msk.bf16.vlgmr.msra.gmra.mrb[8].mxu1 %vm692_vm2, %v815_v33  ;;  %v1074_v37 = vsel %vm692_vm2, %v1069_v35, 0 }
 0x16a   : > { %1559 = vmatpush3.bf16.xpose.msra.mxu1 %v949_v34  ;;  %1560 = vmatprep.mubr.msk.bf16.mxu1 %vm1706_vm0, %v1705_v1 }
 0x16b   : > { %1570 = vmatprep.subr.bf16.mxu1 %v1705_v1 }
 0x171   : > { %1561 = vmatmul.mubr.msk.bf16.vlgmr.msra.gmra.mrb[12].mxu1 %vm692_vm2, %v942_v36 }
 0x172   : > { %1571 = vmatpush3.bf16.xpose.msra.mxu1 %v1074_v37  ;;  %1572 = vmatprep.mubr.msk.bf16.mxu1 %vm1706_vm0, %v1705_v1 }
 0x173   : > { %1582 = vmatprep.subr.bf16.mxu1 %v1705_v1 }
 0x179   : > { %1573 = vmatmul.mubr.msk.bf16.vlgmr.msra.gmra.mrb[16].mxu1 %vm692_vm2, %v1067_v38 }
 0x17a   : > { %1586 = vmatprep.mubr.msk.bf16.mxu1 %vm1706_vm0, %v1705_v1 }
 0x1ca   : > { %v733_v43 = vpop.f32.mrb[4].mxu1 }
 0x1cb   : > { %v740_v44 = vsel %vm688_vm3, -1e+30, %v733_v43  ;;  %v1538_v45 = vpop.f32.mrb[5].mxu1 }
 0x1cc   : > { %v742_v46 = vmul.f32 0.35355338, %v740_v44  ;;  %v736_v47 = vpop.f32.mrb[6].mxu1 }
 0x1cd   : > { %v741_v48 = vsel %vm689_vm4, -1e+30, %v736_v47  ;;  %v1539_v49 = vpop.f32.mrb[7].mxu1 }
 0x1ce   : > { %v743_v50 = vmul.f32 0.35355338, %v741_v48  ;;  %v745_v51 = vsel %vm744_vm5, %v742_v46, -inf }
 0x1cf   : > { %746 = vmax.xlane.f32.xlu0 %v745_v51 }
 0x1d0   : > { %v748_v52 = vsel %vm744_vm5, %v743_v50, -inf }
 0x1d1   : > { %749 = vmax.xlane.f32.xlu1 %v748_v52 }
 0x23c   : > { %v859_v61 = vpop.f32.mrb[8].mxu1 }
 0x23d   : > { %v866_v62 = vsel %vm688_vm3, -1e+30, %v859_v61  ;;  %v1550_v63 = vpop.f32.mrb[9].mxu1 }
 0x23e   : > { %v868_v0 = vmul.f32 0.35355338, %v866_v62  ;;  %v862_v2 = vpop.f32.mrb[10].mxu1 }
 0x23f   : > { %v867_v3 = vsel %vm689_vm4, -1e+30, %v862_v2  ;;  %v1551_v4 = vpop.f32.mrb[11].mxu1 }
 0x240   : > { %v869_v5 = vmul.f32 0.35355338, %v867_v3  ;;  %v870_v6 = vsel %vm744_vm5, %v868_v0, -inf }
 0x241   : > { %871 = vmax.xlane.f32.xlu0 %v870_v6 }
 0x242   : > { %v873_v10 = vsel %vm744_vm5, %v869_v5, -inf }
 0x244   : > { %v985_v7 = vpop.f32.mrb[12].mxu1 }
 0x245   : > { %v992_v11 = vsel %vm688_vm3, -1e+30, %v985_v7  ;;  %874 = vmax.xlane.f32.xlu0 %v873_v10  ;;  %v1562_v12 = vpop.f32.mrb[13].mxu1 }
 0x246   : > { %v994_v13 = vmul.f32 0.35355338, %v992_v11  ;;  %v988_v14 = vpop.f32.mrb[14].mxu1 }
 0x247   : > { %v993_v15 = vsel %vm689_vm4, -1e+30, %v988_v14  ;;  %v1563_v16 = vpop.f32.mrb[15].mxu1 }
 0x248   : > { %v995_v17 = vmul.f32 0.35355338, %v993_v15  ;;  %v996_v18 = vsel %vm744_vm5, %v994_v13, -inf }
 0x249   : > { %997 = vmax.xlane.f32.xlu1 %v996_v18 }
 0x24a   : > { %v999_v19 = vsel %vm744_vm5, %v995_v17, -inf }
 0x24b   : > { %1000 = vmax.xlane.f32.xlu0 %v999_v19 }
 0x24c   : > { %v1110_v20 = vpop.f32.mrb[16].mxu1 }
 0x24d   : > { %v1117_v21 = vsel %vm688_vm3, -1e+30, %v1110_v20  ;;  %v1574_v22 = vpop.f32.mrb[17].mxu1 }
 0x24e   : > { %v1119_v23 = vmul.f32 0.35355338, %v1117_v21  ;;  %v1113_v24 = vpop.f32.mrb[18].mxu1 }
 0x24f   : > { %v1118_v25 = vsel %vm689_vm4, -1e+30, %v1113_v24  ;;  %v1575_v26 = vpop.f32.mrb[19].mxu1 }
 0x250   : > { %v1120_v27 = vmul.f32 0.35355338, %v1118_v25  ;;  %v1121_v28 = vsel %vm744_vm5, %v1119_v23, -inf }
 0x251   : > { %1122 = vmax.xlane.f32.xlu1 %v1121_v28 }
 0x252   : > { %v1124_v29 = vsel %vm744_vm5, %v1120_v27, -inf }
 0x253   : > { %1125 = vmax.xlane.f32.xlu0 %v1124_v29 }
 0x25c   : > { %v747_v30 = vpop.xlane.xlu0 %746 }
 0x25d   : > { %v751_v31 = vsub.f32 %v742_v46, %v747_v30 }
 0x25e   : > { %v750_v32 = vpop.xlane.xlu1 %749 }
 0x25f   : > { %v753_v33 = vmul.f32 1.442695, %v751_v31  ;;  %v752_v34 = vsub.f32 %v743_v50, %v750_v32 }
 0x261   : > { %1645 = vpow2.f32 %v753_v33  ;;  %v755_v35 = vmul.f32 1.442695, %v752_v34 }
 0x263   : > { %1647 = vpow2.f32 %v755_v35 }
 0x26b   : > { %v1646_v36 = vpop.eup %1645 }
 0x26c   : > { %v757_v37 = vsel %vm744_vm5, %v1646_v36, 0.0 }
 0x26d   : > { %v1648_v38 = vpop.eup %1647  ;;  %758 = vadd.xlane.f32.xlu1 %v757_v37 }
 0x26e   : > { %v760_v39 = vsel %vm744_vm5, %v1648_v38, 0.0 }
 0x26f   : > { %761 = vadd.xlane.f32.xlu0 %v760_v39 }
 0x27e   : > { %894 = vrot.lane.b32.xlu1 %v1890_v60, %s1708_s30  ;;  %s1712_s30 = smov 24  }
 0x2ce   : > { %v872_v40 = vpop.xlane.xlu0 %871 }
 0x2cf   : > { %v876_v41 = vsub.f32 %v868_v0, %v872_v40 }
 0x2d1   : > { %v878_v42 = vmul.f32 1.442695, %v876_v41 }
 0x2d2   : > { %v875_v43 = vpop.xlane.xlu0 %874 }
 0x2d3   : > { %1649 = vpow2.f32 %v878_v42  ;;  %v877_v44 = vsub.f32 %v869_v5, %v875_v43 }
 0x2d5   : > { %v880_v45 = vmul.f32 1.442695, %v877_v44 }
 0x2d6   : > { %v998_v46 = vpop.xlane.xlu1 %997 }
 0x2d7   : > { %1651 = vpow2.f32 %v880_v45  ;;  %v1002_v47 = vsub.f32 %v994_v13, %v998_v46 }
 0x2d8   : > { %v1001_v48 = vpop.xlane.xlu0 %1000 }
 0x2d9   : > { %v1004_v49 = vmul.f32 1.442695, %v1002_v47  ;;  %v1003_v50 = vsub.f32 %v995_v17, %v1001_v48  ;;  %v1643_v47 = vld [vmem:[%s1982_s8] sm:$0xff]  }
 0x2da   : > { %1583 = vmatpush3.bf16.msra.mxu1 %v1643_v47 }
 0x2db   : > { %1653 = vpow2.f32 %v1004_v49  ;;  %v1006_v51 = vmul.f32 1.442695, %v1003_v50  ;;  %1584 = vmatprep.subr.bf16.mxu1 %v1705_v1 }
 0x2dd   : > { %v1650_v52 = vpop.eup %1649  ;;  %1655 = vpow2.f32 %v1006_v51 }
 0x2de   : > { %v1123_v53 = vpop.xlane.xlu1 %1122  ;;  %v882_v54 = vsel %vm744_vm5, %v1650_v52, 0.0 }
 0x2df   : > { %v1127_v55 = vsub.f32 %v1119_v23, %v1123_v53  ;;  %883 = vadd.xlane.f32.xlu1 %v882_v54 }
 0x2e0   : > { %v1126_v56 = vpop.xlane.xlu0 %1125 }
 0x2e1   : > { %v1652_v57 = vpop.eup %1651  ;;  %v1129_v58 = vmul.f32 1.442695, %v1127_v55  ;;  %v1128_v59 = vsub.f32 %v1120_v27, %v1126_v56 }
 0x2e2   : > { %v885_v61 = vsel %vm744_vm5, %v1652_v57, 0.0 }
 0x2e3   : > { %1657 = vpow2.f32 %v1129_v58  ;;  %v1131_v62 = vmul.f32 1.442695, %v1128_v59  ;;  %886 = vadd.xlane.f32.xlu0 %v885_v61 }
 0x2e5   : > { %v1654_v63 = vpop.eup %1653  ;;  %1659 = vpow2.f32 %v1131_v62 }
 0x2e6   : > { %v1008_v0 = vsel %vm744_vm5, %v1654_v63, 0.0 }
 0x2e7   : > { %v1656_v2 = vpop.eup %1655  ;;  %1009 = vadd.xlane.f32.xlu1 %v1008_v0 }
 0x2e8   : > { %v1011_v3 = vsel %vm744_vm5, %v1656_v2, 0.0 }
 0x2e9   : > { %1012 = vadd.xlane.f32.xlu0 %v1011_v3 }
 0x2ed   : > { %v1658_v4 = vpop.eup %1657 }
 0x2ee   : > { %v1133_v5 = vsel %vm744_vm5, %v1658_v4, 0.0 }
 0x2ef   : > { %v1660_v6 = vpop.eup %1659  ;;  %1134 = vadd.xlane.f32.xlu1 %v1133_v5 }
 0x2f0   : > { %v1136_v7 = vsel %vm744_vm5, %v1660_v6, 0.0 }
 0x2f1   : > { %1137 = vadd.xlane.f32.xlu0 %v1136_v7 }
 0x2fa   : > { %v759_v10 = vpop.xlane.xlu1 %758 }
 0x2fb   : > { %1661 = vrcp.f32 %v759_v10 }
 0x2fc   : > { %v762_v11 = vpop.xlane.xlu0 %761 }
 0x2fd   : > { %1663 = vrcp.f32 %v762_v11 }
 0x2fe   : > { %v895_v17 = vpop.permute.xlu1 %894 }
 0x300   : > { %1144 = vrot.lane.b32.xlu1 %v1890_v60, %s1709_s13 }
 0x305   : > { %v1662_v12 = vpop.eup %1661 }
 0x306   : > { %v765_v14 = vmul.f32 %v1662_v12, %v1646_v36 }
 0x307   : > { %v1664_v13 = vpop.eup %1663  ;;  %1019 = vrot.lane.b32.xlu0 %v1890_v60, %s1707_s29  ;;  %s1711_s29 = smov 16  }
 0x308   : > { %v766_v15 = vmul.f32 %v1664_v13, %v1648_v38 }
 0x30a   : > { %v767_v16 = vpack.c.bf16 %v766_v15, %v765_v14 }
 0x30c   : > { %1543 = vmatmul.mubr.msk.bf16.vlgmr.msra.gmra.mrb[8].mxu0 %vm744_vm5, %v767_v16 }
 0x30d   : > { %1553 = vmatpush3.bf16.msra.mxu0 %v895_v17  ;;  %1554 = vmatprep.mubr.msk.bf16.mxu0 %vm1706_vm0, %v1705_v1  ;;  %v1474_v17 = vld [vmem:[%s1983_s9] ss:$0 sm:$0xff] }
 0x30e   : > { %1564 = vmatprep.subr.bf16.mxu0 %v1705_v1 }
 0x36c   : > { %v884_v18 = vpop.xlane.xlu1 %883 }
 0x36d   : > { %1665 = vrcp.f32 %v884_v18 }
 0x370   : > { %v887_v19 = vpop.xlane.xlu0 %886 }
 0x371   : > { %1667 = vrcp.f32 %v887_v19 }
 0x374   : > { %v1010_v20 = vpop.xlane.xlu1 %1009 }
 0x375   : > { %1669 = vrcp.f32 %v1010_v20 }
 0x376   : > { %v1013_v21 = vpop.xlane.xlu0 %1012 }
 0x377   : > { %1671 = vrcp.f32 %v1013_v21  ;;  %v1666_v60 = vpop.eup %1665 }
 0x378   : > { %v890_v23 = vmul.f32 %v1666_v60, %v1650_v52  ;;  %v1644_v52 = vld [vmem:[%s1982_s8 + $0x8] sm:$0xff]  }
 0x379   : > { %1585 = vmatpush3.bf16.msra.mxu1 %v1644_v52 }
 0x37b   : > { %v1668_v22 = vpop.eup %1667 }
 0x37c   : > { %v891_v24 = vmul.f32 %v1668_v22, %v1652_v57  ;;  %v1135_v25 = vpop.xlane.xlu1 %1134 }
 0x37d   : > { %1673 = vrcp.f32 %v1135_v25 }
 0x37e   : > { %v1138_v26 = vpop.xlane.xlu0 %1137  ;;  %v892_v27 = vpack.c.bf16 %v891_v24, %v890_v23 }
 0x37f   : > { %1675 = vrcp.f32 %v1138_v26  ;;  %v1670_v28 = vpop.eup %1669 }
 0x380   : > { %1555 = vmatmul.mubr.msk.bf16.vlgmr.msra.gmra.mrb[12].mxu0 %vm744_vm5, %v892_v27  ;;  %v1016_v32 = vmul.f32 %v1670_v28, %v1654_v63  ;;  %v1145_v35 = vpop.permute.xlu1 %1144 }
 0x381   : > { %v1672_v29 = vpop.eup %1671  ;;  %1566 = vmatprep.mubr.msk.bf16.mxu0 %vm1706_vm0, %v1705_v1 }
 0x382   : > { %v1017_v30 = vmul.f32 %v1672_v29, %v1656_v2  ;;  %v1020_v31 = vpop.permute.xlu0 %1019 }
 0x383   : > { %1565 = vmatpush3.bf16.msra.mxu0 %v1020_v31 }
 0x384   : > { %1576 = vmatprep.subr.bf16.mxu0 %v1705_v1  ;;  %v1018_v33 = vpack.c.bf16 %v1017_v30, %v1016_v32 }
 0x387   : > { %v1674_v34 = vpop.eup %1673 }
 0x388   : > { %1567 = vmatmul.mubr.msk.bf16.vlgmr.msra.gmra.mrb[16].mxu0 %vm744_vm5, %v1018_v33  ;;  %v1141_v38 = vmul.f32 %v1674_v34, %v1658_v4 }
 0x389   : > { %v1676_v36 = vpop.eup %1675  ;;  %1577 = vmatpush3.bf16.msra.mxu0 %v1145_v35  ;;  %1578 = vmatprep.mubr.msk.bf16.mxu0 %vm1706_vm0, %v1705_v1 }
 0x38a   : > { %v1142_v37 = vmul.f32 %v1676_v36, %v1660_v6 }
 0x38c   : > { %v1143_v39 = vpack.c.bf16 %v1142_v37, %v1141_v38 }
 0x390   : > { %1579 = vmatmul.mubr.msk.bf16.vlgmr.msra.gmra.mrb[20].mxu0 %vm744_vm5, %v1143_v39 }
 0x3df   : > { %v806_v40 = vpop.f32.mrb[8].mxu0 }
 0x3e0   : > { %v1544_v41 = vpop.f32.mrb[9].mxu0 }
 0x3e1   : > { %v809_v42 = vpop.f32.mrb[10].mxu0  ;;  %v1475_v41 = vld [vmem:[%s1984_s10] ss:$0 sm:$0xff] }
 0x3e2   : > { %v1545_v43 = vpop.f32.mrb[11].mxu0 }
 0x3e3   : > { %v1476_v43 = vld [vmem:[%s1985_s11] ss:$0 sm:$0xff] }
 0x453   : > { %v934_v44 = vpop.f32.mrb[12].mxu0 }
 0x454   : > { %v1556_v45 = vpop.f32.mrb[13].mxu0 }
 0x455   : > { %v937_v46 = vpop.f32.mrb[14].mxu0 }
 0x456   : > { %v1622_v48 = vpack.i.bf16 %v937_v46, %v934_v44  ;;  %v1557_v49 = vpop.f32.mrb[15].mxu0 }
 0x458   : > { %1623 = vrot.lane.b32.xlu1 %v1622_v48, %s1710_s26 }
 0x45b   : > { %v1059_v50 = vpop.f32.mrb[16].mxu0 }
 0x45c   : > { %v1568_v51 = vpop.f32.mrb[17].mxu0 }
 0x45d   : > { %v1062_v53 = vpop.f32.mrb[18].mxu0 }
 0x45e   : > { %v1627_v54 = vpack.i.bf16 %v1062_v53, %v1059_v50  ;;  %v1569_v55 = vpop.f32.mrb[19].mxu0 }
 0x460   : > { %1628 = vrot.lane.b32.xlu0 %v1627_v54, %s1711_s29 }
 0x463   : > { %v1184_v56 = vpop.f32.mrb[20].mxu0 }
 0x464   : > { %v1580_v57 = vpop.f32.mrb[21].mxu0 }
 0x465   : > { %v1187_v58 = vpop.f32.mrb[22].mxu0 }
 0x466   : > { %v1632_v59 = vpack.i.bf16 %v1187_v58, %v1184_v56  ;;  %v1581_v61 = vpop.f32.mrb[23].mxu0 }
 0x468   : > { %1633 = vrot.lane.b32.xlu1 %v1632_v59, %s1712_s30 }
 0x4ca   : > { %v1624_v1 = vpop.permute.xlu1 %1623 }
 0x4cb   : > { %v1626_v63 = vunpack.i.h.bf16 %v1624_v1  ;;  %v1625_v0 = vunpack.i.l.bf16 %v1624_v1 }
 0x4cd   : > { %v1216_v5 = vsel %vm692_vm2, %v809_v42, %v1626_v63  ;;  %v1215_v6 = vsel %vm692_vm2, %v806_v40, %v1625_v0 }
 0x4d2   : > { %v1629_v62 = vpop.permute.xlu0 %1628 }
 0x4d3   : > { %v1631_v2 = vunpack.i.h.bf16 %v1629_v62  ;;  %v1630_v3 = vunpack.i.l.bf16 %v1629_v62 }
 0x4d5   : > { %v1218_v11 = vsel %vm744_vm5, %v1216_v5, %v1631_v2  ;;  %v1217_v12 = vsel %vm744_vm5, %v1215_v6, %v1630_v3 }
 0x4da   : > { %v1634_v4 = vpop.permute.xlu1 %1633 }
 0x4db   : > { %v1636_v7 = vunpack.i.h.bf16 %v1634_v4  ;;  %v1635_v10 = vunpack.i.l.bf16 %v1634_v4 }
 0x4dd   : > { %v1221_v13 = vsel %vm1219_vm6, %v1218_v11, %v1636_v7  ;;  %v1220_v14 = vsel %vm1219_vm6, %v1217_v12, %v1635_v10 }
 0x4de   : > { %v1226_v15 = vpack.c.bf16 %v1221_v13, %v1220_v14 }
 0x4e0   : > { %1587 = vmatmul.mubr.msk.bf16.vlgmr.msra.gmra.mrb[20].mxu1 %vm502_vm1, %v1226_v15 }
 0x5b3   : > { %v1276_v16 = vpop.f32.mrb[20].mxu1 }
 0x5b4   : > { %v1283_v18 = vadd.f32 %v1276_v16, %v1828_v8  ;;  %v1588_v19 = vpop.f32.mrb[21].mxu1 }
 0x5b5   : > { %v1279_v20 = vpop.f32.mrb[22].mxu1 }
 0x5b6   : > { %v1284_v21 = vadd.f32 %v1279_v20, %v1830_v9  ;;  %v1589_v60 = vpop.f32.mrb[23].mxu1  ;;  %v1292_v22 = vadd.f32 %v1474_v17, %v1283_v18 }
 0x5b8   : > { %v1296_v23 = vsel %vm502_vm1, %v1292_v22, 0.0  ;;  %v1293_v24 = vadd.f32 %v1474_v17, %v1284_v21 }
 0x5b9   : > { %1297 = vadd.xlane.f32.xlu0 %v1296_v23 }
 0x5ba   : > { %v1299_v25 = vsel %vm502_vm1, %v1293_v24, 0.0 }
 0x5bb   : > { %1300 = vadd.xlane.f32.xlu1 %v1299_v25 }
 0x646   : > { %v1298_v26 = vpop.xlane.xlu0 %1297 }
 0x647   : > { %v1303_v27 = vmul.f32 0.03125, %v1298_v26 }
 0x648   : > { %v1301_v28 = vpop.xlane.xlu1 %1300 }
 0x649   : > { %v1305_v29 = vsub.f32 %v1292_v22, %v1303_v27  ;;  %v1304_v30 = vmul.f32 0.03125, %v1301_v28 }
 0x64b   : > { %v1306_v31 = vsub.f32 %v1293_v24, %v1304_v30  ;;  %v1307_v8 = vmul.f32 %v1305_v29, %v1305_v29 }
 0x64d   : > { %v1309_v32 = vsel %vm502_vm1, %v1307_v8, 0.0  ;;  %v1308_v33 = vmul.f32 %v1306_v31, %v1306_v31 }
 0x64e   : > { %1310 = vadd.xlane.f32.xlu0 %v1309_v32 }
 0x64f   : > { %v1312_v9 = vsel %vm502_vm1, %v1308_v33, 0.0 }
 0x652   : > { %1313 = vadd.xlane.f32.xlu0 %v1312_v9 }
 0x6db   : > { %v1311_v34 = vpop.xlane.xlu0 %1310 }
 0x6dc   : > { %v1315_v35 = vmul.f32 0.03125, %v1311_v34 }
 0x6de   : > { %v1317_v36 = vadd.f32 1e-05, %v1315_v35 }
 0x6df   : > { %v1314_v37 = vpop.xlane.xlu0 %1313 }
 0x6e0   : > { %1677 = vrsqrt.f32 %v1317_v36  ;;  %v1316_v38 = vmul.f32 0.03125, %v1314_v37 }
 0x6e2   : > { %v1318_v39 = vadd.f32 1e-05, %v1316_v38 }
 0x6e4   : > { %1679 = vrsqrt.f32 %v1318_v39 }
 0x6ea   : > { %v1678_v40 = vpop.eup %1677 }
 0x6eb   : > { %v1321_v42 = vmul.f32 %v1678_v40, %v1305_v29 }
 0x6ed   : > { %v1329_v44 = vmul.f32 %v1475_v41, %v1321_v42 }
 0x6ee   : > { %v1680_v45 = vpop.eup %1679 }
 0x6ef   : > { %v1337_v46 = vadd.f32 %v1476_v43, %v1329_v44  ;;  %v1322_v47 = vmul.f32 %v1680_v45, %v1306_v31 }
 0x6f1   : > { %1339 = vst.msk [vmem:[%s471_s21] sm:$0xff] %vm502_vm1, %v1337_v46  ;;  %v1330_v48 = vmul.f32 %v1475_v41, %v1322_v47 }
 0x6f3   : > { %v1338_v49 = vadd.f32 %v1476_v43, %v1330_v48 }
 0x6f5   : > { %1340 = vst.msk [vmem:[%s471_s21 + $0x8] sm:$0xff] %vm502_vm1, %v1338_v49 }
 0x6f6 PF: > { %s22_s23 = sadd.s32 1, %s1703_s23   ;;  %s1987_s21 = smov %s1699_s22 }
 0x6f7   : > { %p19_p5 = scmp.ge.s32.totalorder %s22_s23, 4   ;;  %s1988_s22 = smov %s1990_s24 }
 0x6f9   :  { %21 = sbr.rel (!%p19_p5) target bundleno = 2 (0x2), region = 101 }

// kernel: informer_forward.12
= control target key start
LH: loop header
LB: loop body
LE: loop exit
PB: predicated region body
PF: predicated region fallthrough
CT: control target
= control target key end

     0   :  { %s1759_s21 = smov 0   ;;  %s1761_s22 = smov 0   ;;  %s1947_s0 = inlined_call_operand.vmem [shape: f32[2,16,32], index: 0, kind: input, shape index: {}]   ;;  %s1948_s1 = inlined_call_operand.vmem [shape: f32[2,16,32], index: 1, kind: input, shape index: {}]   ;;  %s1949_s2 = inlined_call_operand.vmem [shape: bf16[32,32], index: 2, kind: input, shape index: {}]   ;;  %s1950_s3 = inlined_call_operand.vmem [shape: f32[1,32], index: 3, kind: input, shape index: {}]   ;;  %s1951_s4 = inlined_call_operand.vmem [shape: bf16[32,32], index: 4, kind: input, shape index: {}]   ;;  %s1952_s5 = inlined_call_operand.vmem [shape: f32[1,32], index: 5, kind: input, shape index: {}]   ;;  %s1953_s6 = inlined_call_operand.vmem [shape: bf16[32,32], index: 6, kind: input, shape index: {}]   ;;  %s1954_s7 = inlined_call_operand.vmem [shape: f32[1,32], index: 7, kind: input, shape index: {}]   ;;  %s1955_s8 = inlined_call_operand.vmem [shape: bf16[32,32], index: 8, kind: input, shape index: {}]   ;;  %s1956_s9 = inlined_call_operand.vmem [shape: f32[1,32], index: 9, kind: input, shape index: {}]   ;;  %s1957_s10 = inlined_call_operand.vmem [shape: f32[1,32], index: 10, kind: input, shape index: {}]   ;;  %s1958_s11 = inlined_call_operand.vmem [shape: f32[1,32], index: 11, kind: input, shape index: {}]   ;;  %s1959_s12 = inlined_call_operand.vmem [shape: f32[2,16,32], index: 12, kind: output, shape index: {}]  }
   0x1   :  { %s1763_s23 = smov 0  }
   0x2 LB: > { %s34_s24 = sadd.s32 1, %s1680_s22  ;;  %p1425_p0 = scmp.ge.s32.totalorder %s1684_s23, 1  ;;  %s1684_s23 = sphi %s1763_s23, %s22_s23   ;;  %s1680_s22 = sphi %s1761_s22, %s1961_s22   ;;  %s1676_s21 = sphi %s1759_s21, %s1960_s21  }
   0x3   : > { %p36_p1 = scmp.ge.s32.totalorder %s34_s24, 2  ;;  %p393_p2 = scmp.lt.s32.totalorder %s1684_s23, 3 }
   0x5   : > { %s1963_s24 = smov (%p36_p1, %s34_s24), 0  ;;  %p394_p3 = pnand %p1425_p0, %p393_p2 }
   0x6   : > { %v1618_v0 = vld [vmem:[%s1951_s4] sm:$0xff] (!%p394_p3)   ;;  %v1686_v1 = vmov (!%p394_p3), 0.0   ;;  %v1620_v3 = vld [vmem:[%s1951_s4 + $0x8] sm:$0xff] (!%p394_p3)   ;;  %vm1687_vm0 = vmmov (!%p394_p3), 0   ;;  %p449_p4 = scmp.lt.s32.totalorder (!%p394_p3), %s1676_s21, 1  ;;  %vm502_vm1 = vcmask (!%p394_p3), 261120  }
   0x7   : > { %397 = sbr.rel (%p394_p3) target bundleno = 1781 (0x6f5), region = 68  ;;  %1499 = vmatprep.subr.bf16.mxu1 (!%p394_p3), %v1686_v1  ;;  %1491 = vmatprep.subr.bf16.mxu0 (!%p394_p3), %v1686_v1  ;;  %v1619_v2 = vld [vmem:[%s1949_s2] sm:$0xff] (!%p394_p3)   ;;  %v1621_v4 = vld [vmem:[%s1949_s2 + $0x8] sm:$0xff] (!%p394_p3)   ;;  %vm681_vm2 = vcmask (!%p394_p3), 64512   ;;  %s1688_s29 = smov (!%p394_p3), 112   ;;  %vm731_vm3 = vcmask (!%p394_p3), 130048  }
   0x8   : > { %1500 = vmatpush3.bf16.msra.mxu1 (!%p394_p3), %v1618_v0  ;;  %1503 = vmatprep.mubr.msk.bf16.mxu1 (!%p394_p3), %vm1687_vm0, %v1686_v1  ;;  %v1432_v11 = vld [vmem:[%s1950_s3] ss:$0 sm:$0xff] (!%p394_p3)  ;;  %s1689_s30 = smov (!%p394_p3), 120   ;;  %s1690_s13 = smov (!%p394_p3), 104   ;;  %v1623_v29 = vld [vmem:[%s1953_s6 + $0x8] sm:$0xff] (!%p394_p3)   ;;  %vm1200_vm4 = vcmask (!%p394_p3), 195584  }
   0x9   : > { %1501 = vmatprep.subr.bf16.mxu1 (!%p394_p3), %v1686_v1  ;;  %1492 = vmatpush3.bf16.msra.mxu0 (!%p394_p3), %v1619_v2  ;;  %v1436_v12 = vld [vmem:[%s1952_s5] ss:$0 sm:$0xff] (!%p394_p3)  ;;  %s1691_s26 = smov (!%p394_p3), 8  }
   0xa   : > { %1493 = vmatprep.subr.bf16.mxu0 (!%p394_p3), %v1686_v1  ;;  %1495 = vmatprep.mubr.msk.bf16.mxu0 (!%p394_p3), %vm1687_vm0, %v1686_v1  ;;  %v1622_v28 = vld [vmem:[%s1953_s6] sm:$0xff] (!%p394_p3)  }
   0xb   : > { %v1440_v47 = vld [vmem:[%s1954_s7] ss:$0 sm:$0xff] (!%p394_p3) }
   0xc   : > { %1502 = vmatpush3.bf16.msra.mxu1 (!%p394_p3), %v1620_v3 }
   0xd   : > { %1494 = vmatpush3.bf16.msra.mxu0 (!%p394_p3), %v1621_v4  ;;  %1515 = vmatprep.subr.bf16.mxu1 (!%p394_p3), %v1686_v1 }
   0xe   : > { %s1965_s21 = smov (!%p449_p4, %s1676_s21), 1  ;;  %1507 = vmatprep.subr.bf16.mxu0 %v1686_v1 }
   0xf   : > { %s1797_s15 = sshll.u32 %s1965_s21, 4 }
  0x10   : > { %s462_s18 = scalar_lea.vmem %s1948_s1, %s1797_s15  ;;  %s456_s25 = scalar_lea.vmem %s1947_s0, %s1797_s15 }
  0x11   : > { %v476_v5 = vld [vmem:[%s462_s18] sm:$0xff]  ;;  %v477_v6 = vld [vmem:[%s462_s18 + $0x8] sm:$0xff]  ;;  %s471_s21 = scalar_lea.vmem %s1959_s12, %s1797_s15 }
  0x12   : > { %v551_v7 = vpack.c.bf16 %v477_v6, %v476_v5  ;;  %v1809_v8 = vld [vmem:[%s456_s25] sm:$0xff]  ;;  %v1811_v9 = vld [vmem:[%s456_s25 + $0x8] sm:$0xff] }
  0x13   : > { %v482_v10 = vpack.c.bf16 %v1811_v9, %v1809_v8 }
  0x14   : > { %1504 = vmatmul.mubr.msk.bf16.vlgmr.msra.gmra.mrb[0].mxu1 %vm502_vm1, %v551_v7 }
  0x15   : > { %1496 = vmatmul.mubr.msk.bf16.vlgmr.msra.gmra.mrb[0].mxu0 %vm502_vm1, %v482_v10  ;;  %1517 = vmatprep.mubr.msk.bf16.mxu1 %vm1687_vm0, %v1686_v1 }
  0x16   : > { %1511 = vmatprep.mubr.msk.bf16.mxu0 %vm1687_vm0, %v1686_v1  ;;  %1508 = vmatpush3.bf16.msra.mxu0 %v1622_v28 }
  0x17   : > { %1509 = vmatprep.subr.bf16.mxu0 %v1686_v1 }
  0x1a   : > { %1510 = vmatpush3.bf16.msra.mxu0 %v1623_v29 }
  0x1b   : > { %1521 = vmatprep.subr.bf16.mxu0 %v1686_v1 }
  0x1d   : > { %1512 = vmatmul.mubr.msk.bf16.vlgmr.msra.gmra.mrb[4].mxu0 %vm502_vm1, %v551_v7 }
  0x1e   : > { %1523 = vmatprep.mubr.msk.bf16.mxu0 %vm1687_vm0, %v1686_v1 }
  0xe7   : > { %v608_v13 = vpop.f32.mrb[0].mxu1 }
  0xe8   : > { %v1505_v14 = vpop.f32.mrb[1].mxu1  ;;  %v540_v15 = vpop.f32.mrb[0].mxu0  ;;  %v609_v19 = vadd.f32 %v1436_v12, %v608_v13 }
  0xe9   : > { %v611_v16 = vpop.f32.mrb[2].mxu1  ;;  %v541_v17 = vadd.f32 %v1432_v11, %v540_v15  ;;  %v1497_v18 = vpop.f32.mrb[1].mxu0 }
  0xea   : > { %v612_v20 = vadd.f32 %v1436_v12, %v611_v16  ;;  %v1506_v21 = vpop.f32.mrb[3].mxu1  ;;  %v543_v22 = vpop.f32.mrb[2].mxu0 }
  0xeb   : > { %v544_v23 = vadd.f32 %v1432_v11, %v543_v22  ;;  %v1498_v24 = vpop.f32.mrb[3].mxu0 }
  0xec   : > { %v680_v25 = vpack.c.bf16 %v612_v20, %v609_v19 }
  0xed   : > { %v679_v26 = vpack.c.bf16 %v544_v23, %v541_v17 }
  0xee   : > { %928 = vrot.lane.b32.xlu1 %v680_v25, %s1688_s29  ;;  %804 = vrot.lane.b32.xlu0 %v680_v25, %s1689_s30  ;;  %v686_v27 = vsel %vm681_vm2, %v680_v25, 0 }
  0xef   : > { %1516 = vmatpush3.bf16.xpose.msra.mxu1 %v686_v27 }
  0xf0   : > { %1527 = vmatprep.subr.bf16.mxu1 %v1686_v1  ;;  %v672_v48 = vpop.f32.mrb[4].mxu0 }
  0xf1   : > { %v673_v49 = vadd.f32 %v1440_v47, %v672_v48  ;;  %v1513_v50 = vpop.f32.mrb[5].mxu0 }
  0xf2   : > { %926 = vrot.lane.b32.xlu1 %v679_v26, %s1688_s29  ;;  %801 = vrot.lane.b32.xlu0 %v679_v26, %s1689_s30  ;;  %v675_v51 = vpop.f32.mrb[6].mxu0 }
  0xf3   : > { %v676_v52 = vadd.f32 %v1440_v47, %v675_v51  ;;  %v1514_v53 = vpop.f32.mrb[7].mxu0 }
  0xf5   : > { %v1869_v54 = vpack.c.bf16 %v676_v52, %v673_v49 }
  0xf6   : > { %1049 = vrot.lane.b32.xlu1 %v679_v26, %s1690_s13  ;;  %1051 = vrot.lane.b32.xlu0 %v680_v25, %s1690_s13 }
  0xf7   : > { %1518 = vmatmul.mubr.msk.bf16.vlgmr.msra.gmra.mrb[4].mxu1 %vm681_vm2, %v679_v26  ;;  %1522 = vmatpush3.bf16.msra.mxu0 %v1869_v54 }
  0xf8   : > { %1529 = vmatprep.mubr.msk.bf16.mxu1 %vm1687_vm0, %v1686_v1  ;;  %1533 = vmatprep.subr.bf16.mxu0 %v1686_v1 }
 0x160   : > { %v805_v30 = vpop.permute.xlu0 %804  ;;  %v929_v32 = vpop.permute.xlu1 %928 }
 0x161   : > { %v810_v31 = vsel %vm681_vm2, %v805_v30, 0  ;;  %v934_v34 = vsel %vm681_vm2, %v929_v32, 0 }
 0x162   : > { %1528 = vmatpush3.bf16.xpose.msra.mxu1 %v810_v31 }
 0x163   : > { %1539 = vmatprep.subr.bf16.mxu1 %v1686_v1 }
 0x164   : > { %v802_v33 = vpop.permute.xlu0 %801  ;;  %v927_v36 = vpop.permute.xlu1 %926 }
 0x168   : > { %v1052_v35 = vpop.permute.xlu0 %1051  ;;  %v1050_v38 = vpop.permute.xlu1 %1049 }
 0x169   : > { %1530 = vmatmul.mubr.msk.bf16.vlgmr.msra.gmra.mrb[8].mxu1 %vm681_vm2, %v802_v33  ;;  %v1057_v37 = vsel %vm681_vm2, %v1052_v35, 0 }
 0x16a   : > { %1540 = vmatpush3.bf16.xpose.msra.mxu1 %v934_v34  ;;  %1541 = vmatprep.mubr.msk.bf16.mxu1 %vm1687_vm0, %v1686_v1 }
 0x16b   : > { %1551 = vmatprep.subr.bf16.mxu1 %v1686_v1 }
 0x171   : > { %1542 = vmatmul.mubr.msk.bf16.vlgmr.msra.gmra.mrb[12].mxu1 %vm681_vm2, %v927_v36 }
 0x172   : > { %1552 = vmatpush3.bf16.xpose.msra.mxu1 %v1057_v37  ;;  %1553 = vmatprep.mubr.msk.bf16.mxu1 %vm1687_vm0, %v1686_v1 }
 0x173   : > { %1563 = vmatprep.subr.bf16.mxu1 %v1686_v1 }
 0x179   : > { %1554 = vmatmul.mubr.msk.bf16.vlgmr.msra.gmra.mrb[16].mxu1 %vm681_vm2, %v1050_v38 }
 0x17a   : > { %1567 = vmatprep.mubr.msk.bf16.mxu1 %vm1687_vm0, %v1686_v1 }
 0x1ca   : > { %v722_v39 = vpop.f32.mrb[4].mxu1 }
 0x1cb   : > { %v729_v40 = vmul.f32 0.35355338, %v722_v39  ;;  %v1519_v41 = vpop.f32.mrb[5].mxu1 }
 0x1cc   : > { %v725_v42 = vpop.f32.mrb[6].mxu1 }
 0x1cd   : > { %v730_v43 = vmul.f32 0.35355338, %v725_v42  ;;  %v1520_v44 = vpop.f32.mrb[7].mxu1  ;;  %v732_v45 = vsel %vm731_vm3, %v729_v40, -inf }
 0x1ce   : > { %733 = vmax.xlane.f32.xlu0 %v732_v45 }
 0x1cf   : > { %v735_v46 = vsel %vm731_vm3, %v730_v43, -inf }
 0x1d0   : > { %736 = vmax.xlane.f32.xlu1 %v735_v46 }
 0x23c   : > { %v846_v55 = vpop.f32.mrb[8].mxu1 }
 0x23d   : > { %v853_v56 = vmul.f32 0.35355338, %v846_v55  ;;  %v1531_v57 = vpop.f32.mrb[9].mxu1 }
 0x23e   : > { %v849_v58 = vpop.f32.mrb[10].mxu1 }
 0x23f   : > { %v854_v59 = vmul.f32 0.35355338, %v849_v58  ;;  %v1532_v60 = vpop.f32.mrb[11].mxu1  ;;  %v855_v61 = vsel %vm731_vm3, %v853_v56, -inf }
 0x240   : > { %856 = vmax.xlane.f32.xlu0 %v855_v61 }
 0x241   : > { %v858_v62 = vsel %vm731_vm3, %v854_v59, -inf }
 0x244   : > { %859 = vmax.xlane.f32.xlu0 %v858_v62  ;;  %v970_v63 = vpop.f32.mrb[12].mxu1 }
 0x245   : > { %v977_v0 = vmul.f32 0.35355338, %v970_v63  ;;  %v1543_v2 = vpop.f32.mrb[13].mxu1 }
 0x246   : > { %v973_v3 = vpop.f32.mrb[14].mxu1 }
 0x247   : > { %v978_v4 = vmul.f32 0.35355338, %v973_v3  ;;  %v1544_v5 = vpop.f32.mrb[15].mxu1  ;;  %v979_v6 = vsel %vm731_vm3, %v977_v0, -inf }
 0x248   : > { %980 = vmax.xlane.f32.xlu1 %v979_v6 }
 0x249   : > { %v982_v7 = vsel %vm731_vm3, %v978_v4, -inf }
 0x24a   : > { %983 = vmax.xlane.f32.xlu0 %v982_v7 }
 0x24c   : > { %v1093_v10 = vpop.f32.mrb[16].mxu1 }
 0x24d   : > { %v1100_v11 = vmul.f32 0.35355338, %v1093_v10  ;;  %v1555_v12 = vpop.f32.mrb[17].mxu1 }
 0x24e   : > { %v1096_v13 = vpop.f32.mrb[18].mxu1 }
 0x24f   : > { %v1101_v14 = vmul.f32 0.35355338, %v1096_v13  ;;  %v1556_v15 = vpop.f32.mrb[19].mxu1  ;;  %v1102_v16 = vsel %vm731_vm3, %v1100_v11, -inf }
 0x250   : > { %1103 = vmax.xlane.f32.xlu1 %v1102_v16 }
 0x251   : > { %v1105_v17 = vsel %vm731_vm3, %v1101_v14, -inf }
 0x252   : > { %1106 = vmax.xlane.f32.xlu0 %v1105_v17 }
 0x25b   : > { %v734_v18 = vpop.xlane.xlu0 %733 }
 0x25c   : > { %v738_v19 = vsub.f32 %v729_v40, %v734_v18 }
 0x25d   : > { %v737_v20 = vpop.xlane.xlu1 %736 }
 0x25e   : > { %v740_v21 = vmul.f32 1.442695, %v738_v19  ;;  %v739_v22 = vsub.f32 %v730_v43, %v737_v20 }
 0x260   : > { %1626 = vpow2.f32 %v740_v21  ;;  %v742_v23 = vmul.f32 1.442695, %v739_v22 }
 0x262   : > { %1628 = vpow2.f32 %v742_v23 }
 0x26a   : > { %v1627_v24 = vpop.eup %1626 }
 0x26b   : > { %v744_v25 = vsel %vm731_vm3, %v1627_v24, 0.0 }
 0x26c   : > { %v1629_v26 = vpop.eup %1628  ;;  %745 = vadd.xlane.f32.xlu1 %v744_v25 }
 0x26d   : > { %v747_v27 = vsel %vm731_vm3, %v1629_v26, 0.0 }
 0x26e   : > { %748 = vadd.xlane.f32.xlu0 %v747_v27 }
 0x27d   : > { %879 = vrot.lane.b32.xlu1 %v1869_v54, %s1689_s30  ;;  %s1693_s30 = smov 24  }
 0x2cd   : > { %v857_v28 = vpop.xlane.xlu0 %856 }
 0x2ce   : > { %v861_v29 = vsub.f32 %v853_v56, %v857_v28 }
 0x2d0   : > { %v863_v30 = vmul.f32 1.442695, %v861_v29 }
 0x2d1   : > { %v860_v31 = vpop.xlane.xlu0 %859 }
 0x2d2   : > { %1630 = vpow2.f32 %v863_v30  ;;  %v862_v32 = vsub.f32 %v854_v59, %v860_v31 }
 0x2d4   : > { %v865_v33 = vmul.f32 1.442695, %v862_v32 }
 0x2d5   : > { %v981_v34 = vpop.xlane.xlu1 %980 }
 0x2d6   : > { %1632 = vpow2.f32 %v865_v33  ;;  %v985_v35 = vsub.f32 %v977_v0, %v981_v34 }
 0x2d7   : > { %v984_v36 = vpop.xlane.xlu0 %983 }
 0x2d8   : > { %v987_v37 = vmul.f32 1.442695, %v985_v35  ;;  %v986_v38 = vsub.f32 %v978_v4, %v984_v36  ;;  %v1624_v35 = vld [vmem:[%s1955_s8] sm:$0xff]  }
 0x2d9   : > { %1564 = vmatpush3.bf16.msra.mxu1 %v1624_v35 }
 0x2da   : > { %1634 = vpow2.f32 %v987_v37  ;;  %v989_v39 = vmul.f32 1.442695, %v986_v38  ;;  %1565 = vmatprep.subr.bf16.mxu1 %v1686_v1 }
 0x2dc   : > { %v1631_v40 = vpop.eup %1630  ;;  %1636 = vpow2.f32 %v989_v39 }
 0x2dd   : > { %v1104_v41 = vpop.xlane.xlu1 %1103  ;;  %v867_v42 = vsel %vm731_vm3, %v1631_v40, 0.0 }
 0x2de   : > { %v1108_v43 = vsub.f32 %v1100_v11, %v1104_v41  ;;  %868 = vadd.xlane.f32.xlu1 %v867_v42 }
 0x2df   : > { %v1107_v44 = vpop.xlane.xlu0 %1106 }
 0x2e0   : > { %v1633_v45 = vpop.eup %1632  ;;  %v1110_v46 = vmul.f32 1.442695, %v1108_v43  ;;  %v1109_v47 = vsub.f32 %v1101_v14, %v1107_v44 }
 0x2e1   : > { %v870_v48 = vsel %vm731_vm3, %v1633_v45, 0.0 }
 0x2e2   : > { %1638 = vpow2.f32 %v1110_v46  ;;  %v1112_v49 = vmul.f32 1.442695, %v1109_v47  ;;  %871 = vadd.xlane.f32.xlu0 %v870_v48 }
 0x2e4   : > { %v1635_v50 = vpop.eup %1634  ;;  %1640 = vpow2.f32 %v1112_v49 }
 0x2e5   : > { %v991_v51 = vsel %vm731_vm3, %v1635_v50, 0.0 }
 0x2e6   : > { %v1637_v52 = vpop.eup %1636  ;;  %992 = vadd.xlane.f32.xlu1 %v991_v51 }
 0x2e7   : > { %v994_v53 = vsel %vm731_vm3, %v1637_v52, 0.0 }
 0x2e8   : > { %995 = vadd.xlane.f32.xlu0 %v994_v53 }
 0x2ec   : > { %v1639_v55 = vpop.eup %1638 }
 0x2ed   : > { %v1114_v56 = vsel %vm731_vm3, %v1639_v55, 0.0 }
 0x2ee   : > { %v1641_v57 = vpop.eup %1640  ;;  %1115 = vadd.xlane.f32.xlu1 %v1114_v56 }
 0x2ef   : > { %v1117_v58 = vsel %vm731_vm3, %v1641_v57, 0.0 }
 0x2f0   : > { %1118 = vadd.xlane.f32.xlu0 %v1117_v58 }
 0x2f9   : > { %v746_v59 = vpop.xlane.xlu1 %745 }
 0x2fa   : > { %1642 = vrcp.f32 %v746_v59 }
 0x2fb   : > { %v749_v60 = vpop.xlane.xlu0 %748 }
 0x2fc   : > { %1644 = vrcp.f32 %v749_v60 }
 0x2fd   : > { %v880_v3 = vpop.permute.xlu1 %879 }
 0x2ff   : > { %1125 = vrot.lane.b32.xlu1 %v1869_v54, %s1690_s13 }
 0x304   : > { %v1643_v61 = vpop.eup %1642 }
 0x305   : > { %v752_v63 = vmul.f32 %v1643_v61, %v1627_v24 }
 0x306   : > { %v1645_v62 = vpop.eup %1644  ;;  %1002 = vrot.lane.b32.xlu0 %v1869_v54, %s1688_s29  ;;  %s1692_s29 = smov 16  }
 0x307   : > { %v753_v0 = vmul.f32 %v1645_v62, %v1629_v26 }
 0x309   : > { %v754_v2 = vpack.c.bf16 %v753_v0, %v752_v63 }
 0x30b   : > { %1524 = vmatmul.mubr.msk.bf16.vlgmr.msra.gmra.mrb[8].mxu0 %vm731_vm3, %v754_v2 }
 0x30c   : > { %1534 = vmatpush3.bf16.msra.mxu0 %v880_v3  ;;  %1535 = vmatprep.mubr.msk.bf16.mxu0 %vm1687_vm0, %v1686_v1  ;;  %v1455_v3 = vld [vmem:[%s1956_s9] ss:$0 sm:$0xff] }
 0x30d   : > { %1545 = vmatprep.subr.bf16.mxu0 %v1686_v1 }
 0x36b   : > { %v869_v4 = vpop.xlane.xlu1 %868 }
 0x36c   : > { %1646 = vrcp.f32 %v869_v4 }
 0x36f   : > { %v872_v5 = vpop.xlane.xlu0 %871 }
 0x370   : > { %1648 = vrcp.f32 %v872_v5 }
 0x373   : > { %v993_v6 = vpop.xlane.xlu1 %992 }
 0x374   : > { %1650 = vrcp.f32 %v993_v6 }
 0x375   : > { %v996_v7 = vpop.xlane.xlu0 %995 }
 0x376   : > { %1652 = vrcp.f32 %v996_v7  ;;  %v1647_v54 = vpop.eup %1646 }
 0x377   : > { %v875_v11 = vmul.f32 %v1647_v54, %v1631_v40  ;;  %v1625_v40 = vld [vmem:[%s1955_s8 + $0x8] sm:$0xff]  }
 0x378   : > { %1566 = vmatpush3.bf16.msra.mxu1 %v1625_v40 }
 0x37a   : > { %v1649_v10 = vpop.eup %1648 }
 0x37b   : > { %v876_v12 = vmul.f32 %v1649_v10, %v1633_v45  ;;  %v1116_v13 = vpop.xlane.xlu1 %1115 }
 0x37c   : > { %1654 = vrcp.f32 %v1116_v13 }
 0x37d   : > { %v1119_v14 = vpop.xlane.xlu0 %1118  ;;  %v877_v15 = vpack.c.bf16 %v876_v12, %v875_v11 }
 0x37e   : > { %1656 = vrcp.f32 %v1119_v14  ;;  %v1651_v16 = vpop.eup %1650 }
 0x37f   : > { %1536 = vmatmul.mubr.msk.bf16.vlgmr.msra.gmra.mrb[12].mxu0 %vm731_vm3, %v877_v15  ;;  %v999_v20 = vmul.f32 %v1651_v16, %v1635_v50  ;;  %v1126_v23 = vpop.permute.xlu1 %1125 }
 0x380   : > { %v1653_v17 = vpop.eup %1652  ;;  %1547 = vmatprep.mubr.msk.bf16.mxu0 %vm1687_vm0, %v1686_v1 }
 0x381   : > { %v1000_v18 = vmul.f32 %v1653_v17, %v1637_v52  ;;  %v1003_v19 = vpop.permute.xlu0 %1002 }
 0x382   : > { %1546 = vmatpush3.bf16.msra.mxu0 %v1003_v19 }
 0x383   : > { %1557 = vmatprep.subr.bf16.mxu0 %v1686_v1  ;;  %v1001_v21 = vpack.c.bf16 %v1000_v18, %v999_v20 }
 0x386   : > { %v1655_v22 = vpop.eup %1654 }
 0x387   : > { %1548 = vmatmul.mubr.msk.bf16.vlgmr.msra.gmra.mrb[16].mxu0 %vm731_vm3, %v1001_v21  ;;  %v1122_v26 = vmul.f32 %v1655_v22, %v1639_v55 }
 0x388   : > { %v1657_v24 = vpop.eup %1656  ;;  %1558 = vmatpush3.bf16.msra.mxu0 %v1126_v23  ;;  %1559 = vmatprep.mubr.msk.bf16.mxu0 %vm1687_vm0, %v1686_v1 }
 0x389   : > { %v1123_v25 = vmul.f32 %v1657_v24, %v1641_v57 }
 0x38b   : > { %v1124_v27 = vpack.c.bf16 %v1123_v25, %v1122_v26 }
 0x38f   : > { %1560 = vmatmul.mubr.msk.bf16.vlgmr.msra.gmra.mrb[20].mxu0 %vm731_vm3, %v1124_v27 }
 0x3de   : > { %v793_v28 = vpop.f32.mrb[8].mxu0 }
 0x3df   : > { %v1525_v29 = vpop.f32.mrb[9].mxu0 }
 0x3e0   : > { %v796_v30 = vpop.f32.mrb[10].mxu0  ;;  %v1456_v29 = vld [vmem:[%s1957_s10] ss:$0 sm:$0xff] }
 0x3e1   : > { %v1526_v31 = vpop.f32.mrb[11].mxu0 }
 0x3e2   : > { %v1457_v31 = vld [vmem:[%s1958_s11] ss:$0 sm:$0xff] }
 0x452   : > { %v919_v32 = vpop.f32.mrb[12].mxu0 }
 0x453   : > { %v1537_v33 = vpop.f32.mrb[13].mxu0 }
 0x454   : > { %v922_v34 = vpop.f32.mrb[14].mxu0 }
 0x455   : > { %v1603_v36 = vpack.i.bf16 %v922_v34, %v919_v32  ;;  %v1538_v37 = vpop.f32.mrb[15].mxu0 }
 0x457   : > { %1604 = vrot.lane.b32.xlu1 %v1603_v36, %s1691_s26 }
 0x45a   : > { %v1042_v38 = vpop.f32.mrb[16].mxu0 }
 0x45b   : > { %v1549_v39 = vpop.f32.mrb[17].mxu0 }
 0x45c   : > { %v1045_v41 = vpop.f32.mrb[18].mxu0 }
 0x45d   : > { %v1608_v42 = vpack.i.bf16 %v1045_v41, %v1042_v38  ;;  %v1550_v43 = vpop.f32.mrb[19].mxu0 }
 0x45f   : > { %1609 = vrot.lane.b32.xlu0 %v1608_v42, %s1692_s29 }
 0x462   : > { %v1165_v44 = vpop.f32.mrb[20].mxu0 }
 0x463   : > { %v1561_v45 = vpop.f32.mrb[21].mxu0 }
 0x464   : > { %v1168_v46 = vpop.f32.mrb[22].mxu0 }
 0x465   : > { %v1613_v47 = vpack.i.bf16 %v1168_v46, %v1165_v44  ;;  %v1562_v48 = vpop.f32.mrb[23].mxu0 }
 0x467   : > { %1614 = vrot.lane.b32.xlu1 %v1613_v47, %s1693_s30 }
 0x4c9   : > { %v1605_v1 = vpop.permute.xlu1 %1604 }
 0x4ca   : > { %v1607_v50 = vunpack.i.h.bf16 %v1605_v1  ;;  %v1606_v51 = vunpack.i.l.bf16 %v1605_v1 }
 0x4cc   : > { %v1197_v56 = vsel %vm681_vm2, %v796_v30, %v1607_v50  ;;  %v1196_v57 = vsel %vm681_vm2, %v793_v28, %v1606_v51 }
 0x4d1   : > { %v1610_v49 = vpop.permute.xlu0 %1609 }
 0x4d2   : > { %v1612_v52 = vunpack.i.h.bf16 %v1610_v49  ;;  %v1611_v53 = vunpack.i.l.bf16 %v1610_v49 }
 0x4d4   : > { %v1199_v60 = vsel %vm731_vm3, %v1197_v56, %v1612_v52  ;;  %v1198_v61 = vsel %vm731_vm3, %v1196_v57, %v1611_v53 }
 0x4d9   : > { %v1615_v55 = vpop.permute.xlu1 %1614 }
 0x4da   : > { %v1617_v58 = vunpack.i.h.bf16 %v1615_v55  ;;  %v1616_v59 = vunpack.i.l.bf16 %v1615_v55 }
 0x4dc   : > { %v1202_v62 = vsel %vm1200_vm4, %v1199_v60, %v1617_v58  ;;  %v1201_v63 = vsel %vm1200_vm4, %v1198_v61, %v1616_v59 }
 0x4dd   : > { %v1207_v0 = vpack.c.bf16 %v1202_v62, %v1201_v63 }
 0x4df   : > { %1568 = vmatmul.mubr.msk.bf16.vlgmr.msra.gmra.mrb[20].mxu1 %vm502_vm1, %v1207_v0 }
 0x5b2   : > { %v1257_v2 = vpop.f32.mrb[20].mxu1 }
 0x5b3   : > { %v1264_v4 = vadd.f32 %v1257_v2, %v1809_v8  ;;  %v1569_v5 = vpop.f32.mrb[21].mxu1 }
 0x5b4   : > { %v1260_v6 = vpop.f32.mrb[22].mxu1 }
 0x5b5   : > { %v1265_v7 = vadd.f32 %v1260_v6, %v1811_v9  ;;  %v1570_v54 = vpop.f32.mrb[23].mxu1  ;;  %v1273_v10 = vadd.f32 %v1455_v3, %v1264_v4 }
 0x5b7   : > { %v1277_v11 = vsel %vm502_vm1, %v1273_v10, 0.0  ;;  %v1274_v12 = vadd.f32 %v1455_v3, %v1265_v7 }
 0x5b8   : > { %1278 = vadd.xlane.f32.xlu0 %v1277_v11 }
 0x5b9   : > { %v1280_v13 = vsel %vm502_vm1, %v1274_v12, 0.0 }
 0x5ba   : > { %1281 = vadd.xlane.f32.xlu1 %v1280_v13 }
 0x645   : > { %v1279_v14 = vpop.xlane.xlu0 %1278 }
 0x646   : > { %v1284_v15 = vmul.f32 0.03125, %v1279_v14 }
 0x647   : > { %v1282_v16 = vpop.xlane.xlu1 %1281 }
 0x648   : > { %v1286_v17 = vsub.f32 %v1273_v10, %v1284_v15  ;;  %v1285_v18 = vmul.f32 0.03125, %v1282_v16 }
 0x64a   : > { %v1287_v19 = vsub.f32 %v1274_v12, %v1285_v18  ;;  %v1288_v8 = vmul.f32 %v1286_v17, %v1286_v17 }
 0x64c   : > { %v1290_v20 = vsel %vm502_vm1, %v1288_v8, 0.0  ;;  %v1289_v21 = vmul.f32 %v1287_v19, %v1287_v19 }
 0x64d   : > { %1291 = vadd.xlane.f32.xlu0 %v1290_v20 }
 0x64e   : > { %v1293_v9 = vsel %vm502_vm1, %v1289_v21, 0.0 }
 0x651   : > { %1294 = vadd.xlane.f32.xlu0 %v1293_v9 }
 0x6da   : > { %v1292_v22 = vpop.xlane.xlu0 %1291 }
 0x6db   : > { %v1296_v23 = vmul.f32 0.03125, %v1292_v22 }
 0x6dd   : > { %v1298_v24 = vadd.f32 1e-05, %v1296_v23 }
 0x6de   : > { %v1295_v25 = vpop.xlane.xlu0 %1294 }
 0x6df   : > { %1658 = vrsqrt.f32 %v1298_v24  ;;  %v1297_v26 = vmul.f32 0.03125, %v1295_v25 }
 0x6e1   : > { %v1299_v27 = vadd.f32 1e-05, %v1297_v26 }
 0x6e3   : > { %1660 = vrsqrt.f32 %v1299_v27 }
 0x6e9   : > { %v1659_v28 = vpop.eup %1658 }
 0x6ea   : > { %v1302_v30 = vmul.f32 %v1659_v28, %v1286_v17 }
 0x6ec   : > { %v1310_v32 = vmul.f32 %v1456_v29, %v1302_v30 }
 0x6ed   : > { %v1661_v33 = vpop.eup %1660 }
 0x6ee   : > { %v1318_v34 = vadd.f32 %v1457_v31, %v1310_v32  ;;  %v1303_v35 = vmul.f32 %v1661_v33, %v1287_v19 }
 0x6f0   : > { %1320 = vst.msk [vmem:[%s471_s21] sm:$0xff] %vm502_vm1, %v1318_v34  ;;  %v1311_v36 = vmul.f32 %v1456_v29, %v1303_v35 }
 0x6f2   : > { %v1319_v37 = vadd.f32 %v1457_v31, %v1311_v36 }
 0x6f4   : > { %1321 = vst.msk [vmem:[%s471_s21 + $0x8] sm:$0xff] %vm502_vm1, %v1319_v37 }
 0x6f5 PF: > { %s22_s23 = sadd.s32 1, %s1684_s23   ;;  %s1960_s21 = smov %s1680_s22 }
 0x6f6   : > { %p19_p5 = scmp.ge.s32.totalorder %s22_s23, 4   ;;  %s1961_s22 = smov %s1963_s24 }
 0x6f8   :  { %21 = sbr.rel (!%p19_p5) target bundleno = 2 (0x2), region = 101 }

// kernel: informer_forward.13
= control target key start
LH: loop header
LB: loop body
LE: loop exit
PB: predicated region body
PF: predicated region fallthrough
CT: control target
= control target key end

     0   :  { %vm31_vm0 = vcmask 261120   ;;  %v511_v12 = vmov 0.0   ;;  %vm267_vm5 = vcmask 523264   ;;  %s676_s1 = inlined_call_operand.vmem [shape: bf16[32,64], index: 1, kind: input, shape index: {}]   ;;  %s677_s0 = inlined_call_operand.vmem [shape: f32[32,32], index: 0, kind: input, shape index: {}]   ;;  %s678_s3 = inlined_call_operand.vmem [shape: bf16[64,32], index: 3, kind: input, shape index: {}]   ;;  %s679_s2 = inlined_call_operand.vmem [shape: f32[1,64], index: 2, kind: input, shape index: {}]   ;;  %s680_s4 = inlined_call_operand.vmem [shape: f32[1,32], index: 4, kind: input, shape index: {}]   ;;  %s681_s5 = inlined_call_operand.vmem [shape: f32[1,32], index: 5, kind: input, shape index: {}]   ;;  %s682_s6 = inlined_call_operand.vmem [shape: f32[1,32], index: 6, kind: input, shape index: {}]   ;;  %s683_s7 = inlined_call_operand.vmem [shape: f32[32,32], index: 7, kind: output, shape index: {}]  }
   0x1   :  { %v481_v0 = vld [vmem:[%s676_s1] sm:$0xff]   ;;  %v482_v1 = vld [vmem:[%s676_s1 + $0x8] sm:$0xff]   ;;  %v573_v5 = vld [vmem:[%s677_s0 + $0x10] sm:$0xff]  ;;  %34 = vst.msk [vmem:[#allocation2 + $0x10] sm:$0xff] %vm31_vm0, %v511_v12 }
   0x2   :  { %460 = vmatprep.subr.bf16.mxu0 %v481_v0  ;;  %v561_v2 = vld [vmem:[%s677_s0] sm:$0xff]  ;;  %v566_v3 = vld [vmem:[%s677_s0 + $0x8] sm:$0xff]  ;;  %v578_v6 = vld [vmem:[%s677_s0 + $0x18] sm:$0xff]  ;;  %32 = vst.msk [vmem:[#allocation2] sm:$0xff] %vm31_vm0, %v511_v12 }
   0x3   :  { %461 = vmatpush3.bf16.msra.mxu0 %v481_v0  ;;  %v44_v4 = vpack.c.bf16 %v566_v3, %v561_v2  ;;  %v45_v7 = vpack.c.bf16 %v578_v6, %v573_v5  ;;  %v483_v8 = vld [vmem:[%s678_s3] sm:$0xff]   ;;  %v484_v9 = vld [vmem:[%s678_s3 + $0x8] sm:$0xff]   ;;  %v485_v10 = vld [vmem:[%s678_s3 + $0x10] sm:$0xff]   ;;  %33 = vst.msk [vmem:[#allocation2 + $0x8] sm:$0xff] %vm31_vm0, %v511_v12 }
   0x4   :  { %462 = vmatprep.subr.bf16.mxu0 %v482_v1  ;;  %468 = vmatprep.subr.bf16.mxu1 %v483_v8  ;;  %v486_v11 = vld [vmem:[%s678_s3 + $0x18] sm:$0xff]   ;;  %35 = vst.msk [vmem:[#allocation2 + $0x18] sm:$0xff] %vm31_vm0, %v511_v12  ;;  %v436_v13 = vld [vmem:[%s679_s2] ss:$0 sm:$0xff] }
   0x5   :  { %464 = vmatprep.mubr.msk.bf16.mxu0 %vm31_vm0, %v44_v4  ;;  %469 = vmatpush3.bf16.msra.mxu1 %v483_v8 }
   0x6   :  { %470 = vmatprep.subr.bf16.mxu1 %v484_v9 }
   0x7   :  { %463 = vmatpush3.bf16.msra.mxu0 %v482_v1 }
   0x9   :  { %471 = vmatpush3.bf16.msra.mxu1 %v484_v9 }
   0xa   :  { %465 = vmatmul.mubr.msk.bf16.vlgmr.msra.gmra.mrb[0].mxu0 %vm31_vm0, %v45_v7  ;;  %472 = vmatprep.subr.bf16.mxu1 %v485_v10 }
   0xd   :  { %473 = vmatpush3.bf16.msra.mxu1 %v485_v10 }
   0xe   :  { %474 = vmatprep.subr.bf16.mxu1 %v486_v11 }
  0x11   :  { %475 = vmatpush3.bf16.msra.mxu1 %v486_v11 }
  0xdd   :  { %v466_v14 = vpop.f32.mrb[0].mxu0 }
  0xde   :  { %v603_v15 = vadd.f32 %v466_v14, %v436_v13  ;;  %v106_v16 = vpop.f32.mrb[1].mxu0 }
  0xdf   :  { %v605_v17 = vadd.f32 %v436_v13, %v106_v16  ;;  %v467_v18 = vpop.f32.mrb[2].mxu0 }
  0xe0   :  { %v608_v19 = vmul.f32 0.70710677, %v603_v15  ;;  %v610_v20 = vadd.f32 %v467_v18, %v436_v13  ;;  %v109_v21 = vpop.f32.mrb[3].mxu0 }
  0xe1   :  { %v613_v22 = vmul.f32 0.70710677, %v605_v17  ;;  %v615_v23 = vadd.f32 %v436_v13, %v109_v21 }
  0xe2   :  { %v131_v24 = vand.u32 2147483647, %v608_v19  ;;  %v619_v25 = vmul.f32 0.70710677, %v610_v20  ;;  %vm211_vm1 = vcmp.ge.f32.partialorder %v608_v19, 0.0 }
  0xe3   :  { %v129_v26 = vand.u32 2147483647, %v613_v22  ;;  %v623_v27 = vmul.f32 0.70710677, %v615_v23  ;;  %vm209_vm2 = vcmp.ge.f32.partialorder %v613_v22, 0.0 }
  0xe4   :  { %v135_v28 = vmul.f32 0.3275911, %v131_v24  ;;  %v132_v29 = vand.u32 2147483647, %v619_v25  ;;  %v187_v38 = vsub.f32 0.0, %v131_v24  ;;  %vm212_vm3 = vcmp.ge.f32.partialorder %v619_v25, 0.0 }
  0xe5   :  { %v133_v30 = vmul.f32 0.3275911, %v129_v26  ;;  %v130_v31 = vand.u32 2147483647, %v623_v27  ;;  %v185_v39 = vsub.f32 0.0, %v129_v26  ;;  %vm210_vm4 = vcmp.ge.f32.partialorder %v623_v27, 0.0 }
  0xe6   :  { %v139_v32 = vadd.f32 1.0, %v135_v28  ;;  %v136_v33 = vmul.f32 0.3275911, %v132_v29  ;;  %v191_v41 = vmul.f32 %v187_v38, %v131_v24  ;;  %v188_v42 = vsub.f32 0.0, %v132_v29  ;;  %v232_v27 = vld [vmem:[#allocation2 + $0x18] sm:$0xff] }
  0xe7   :  { %v137_v34 = vadd.f32 1.0, %v133_v30  ;;  %v134_v35 = vmul.f32 0.3275911, %v130_v31  ;;  %v189_v45 = vmul.f32 %v185_v39, %v129_v26  ;;  %v186_v46 = vsub.f32 0.0, %v130_v31 }
  0xe8   :  { %487 = vrcp.f32 %v139_v32  ;;  %v140_v36 = vadd.f32 1.0, %v136_v33  ;;  %v197_v50 = vmul.f32 1.442695, %v191_v41  ;;  %v192_v51 = vmul.f32 %v188_v42, %v132_v29 }
  0xe9   :  { %489 = vrcp.f32 %v137_v34  ;;  %v138_v37 = vadd.f32 1.0, %v134_v35  ;;  %v193_v54 = vmul.f32 1.442695, %v189_v45  ;;  %v190_v57 = vmul.f32 %v186_v46, %v130_v31 }
  0xea   :  { %491 = vrcp.f32 %v140_v36  ;;  %v199_v62 = vmul.f32 1.442695, %v192_v51 }
  0xeb   :  { %493 = vrcp.f32 %v138_v37  ;;  %v195_v7 = vmul.f32 1.442695, %v190_v57 }
  0xec   :  { %495 = vpow2.f32 %v197_v50 }
  0xed   :  { %497 = vpow2.f32 %v193_v54 }
  0xee   :  { %499 = vpow2.f32 %v199_v62 }
  0xef   :  { %501 = vpow2.f32 %v195_v7 }
  0xf2   :  { %v488_v40 = vpop.eup %487 }
  0xf3   :  { %v490_v43 = vpop.eup %489  ;;  %v151_v44 = vmul.f32 1.0614054, %v488_v40 }
  0xf4   :  { %v149_v47 = vmul.f32 1.0614054, %v490_v43  ;;  %v492_v49 = vpop.eup %491 }
  0xf5   :  { %v155_v48 = vadd.f32 -1.4531521, %v151_v44  ;;  %v152_v55 = vmul.f32 1.0614054, %v492_v49  ;;  %v494_v56 = vpop.eup %493 }
  0xf6   :  { %v153_v52 = vadd.f32 -1.4531521, %v149_v47  ;;  %v150_v61 = vmul.f32 1.0614054, %v494_v56  ;;  %v496_v32 = vpop.eup %495 }
  0xf7   :  { %v159_v53 = vmul.f32 %v488_v40, %v155_v48  ;;  %v156_v60 = vadd.f32 -1.4531521, %v152_v55  ;;  %v498_v34 = vpop.eup %497 }
  0xf8   :  { %v157_v58 = vmul.f32 %v490_v43, %v153_v52  ;;  %v154_v4 = vadd.f32 -1.4531521, %v150_v61  ;;  %v500_v44 = vpop.eup %499  ;;  %v121_v61 = vmul.f32 0.5, %v605_v17  ;;  %v230_v17 = vld [vmem:[#allocation2 + $0x8] sm:$0xff] }
  0xf9   :  { %v163_v59 = vadd.f32 1.4214138, %v159_v53  ;;  %v160_v1 = vmul.f32 %v492_v49, %v156_v60  ;;  %v502_v50 = vpop.eup %501 }
  0xfa   :  { %v161_v63 = vadd.f32 1.4214138, %v157_v58  ;;  %v158_v11 = vmul.f32 %v494_v56, %v154_v4 }
  0xfb   :  { %v167_v0 = vmul.f32 %v488_v40, %v163_v59  ;;  %v164_v10 = vadd.f32 1.4214138, %v160_v1 }
  0xfc   :  { %v165_v8 = vmul.f32 %v490_v43, %v161_v63  ;;  %v162_v16 = vadd.f32 1.4214138, %v158_v11 }
  0xfd   :  { %v171_v9 = vadd.f32 -0.28449672, %v167_v0  ;;  %v168_v14 = vmul.f32 %v492_v49, %v164_v10  ;;  %v122_v0 = vmul.f32 0.5, %v615_v23 }
  0xfe   :  { %v169_v12 = vadd.f32 -0.28449672, %v165_v8  ;;  %v166_v26 = vmul.f32 %v494_v56, %v162_v16  ;;  %v229_v8 = vld [vmem:[#allocation2] sm:$0xff] }
  0xff   :  { %v175_v13 = vmul.f32 %v488_v40, %v171_v9  ;;  %v172_v24 = vadd.f32 -0.28449672, %v168_v14 }
 0x100   :  { %v173_v18 = vmul.f32 %v490_v43, %v169_v12  ;;  %v170_v31 = vadd.f32 -0.28449672, %v166_v26 }
 0x101   :  { %v179_v21 = vadd.f32 0.2548296, %v175_v13  ;;  %v176_v30 = vmul.f32 %v492_v49, %v172_v24 }
 0x102   :  { %v177_v28 = vadd.f32 0.2548296, %v173_v18  ;;  %v174_v37 = vmul.f32 %v494_v56, %v170_v31 }
 0x103   :  { %v183_v29 = vmul.f32 %v488_v40, %v179_v21  ;;  %v180_v36 = vadd.f32 0.2548296, %v176_v30  ;;  %v447_v21 = vld [vmem:[%s680_s4] ss:$0 sm:$0xff] }
 0x104   :  { %v181_v33 = vmul.f32 %v490_v43, %v177_v28  ;;  %v178_v42 = vadd.f32 0.2548296, %v174_v37 }
 0x105   :  { %v203_v35 = vmul.f32 %v496_v32, %v183_v29  ;;  %v184_v41 = vmul.f32 %v492_v49, %v180_v36  ;;  %v123_v49 = vmul.f32 0.5, %v603_v15 }
 0x106   :  { %v201_v38 = vmul.f32 %v498_v34, %v181_v33  ;;  %v182_v48 = vmul.f32 %v494_v56, %v178_v42  ;;  %v124_v56 = vmul.f32 0.5, %v610_v20  ;;  %v231_v20 = vld [vmem:[#allocation2 + $0x10] sm:$0xff] }
 0x107   :  { %v207_v39 = vsub.f32 1.0, %v203_v35  ;;  %v204_v47 = vmul.f32 %v500_v44, %v184_v41 }
 0x108   :  { %v205_v45 = vsub.f32 1.0, %v201_v38  ;;  %v202_v43 = vmul.f32 %v502_v50, %v182_v48 }
 0x109   :  { %v215_v46 = vsub.f32 0.0, %v207_v39  ;;  %v208_v52 = vsub.f32 1.0, %v204_v47 }
 0x10a   :  { %v213_v40 = vsub.f32 0.0, %v205_v45  ;;  %v206_v54 = vsub.f32 1.0, %v202_v43 }
 0x10b   :  { %v219_v51 = vsel %vm211_vm1, %v207_v39, %v215_v46  ;;  %v216_v53 = vsub.f32 0.0, %v208_v52 }
 0x10c   :  { %v217_v55 = vsel %vm209_vm2, %v205_v45, %v213_v40  ;;  %v223_v57 = vadd.f32 1.0, %v219_v51  ;;  %v214_v59 = vsub.f32 0.0, %v206_v54 }
 0x10d   :  { %v220_v58 = vsel %vm212_vm3, %v208_v52, %v216_v53  ;;  %v221_v19 = vadd.f32 1.0, %v217_v55 }
 0x10e   :  { %v224_v60 = vadd.f32 1.0, %v220_v58  ;;  %v218_v62 = vsel %vm210_vm4, %v206_v54, %v214_v59  ;;  %v227_v22 = vmul.f32 %v223_v57, %v123_v49 }
 0x10f   :  { %v222_v1 = vadd.f32 1.0, %v218_v62  ;;  %v225_v25 = vmul.f32 %v221_v19, %v121_v61 }
 0x110   :  { %v228_v63 = vmul.f32 %v224_v60, %v124_v56 }
 0x111   :  { %v226_v7 = vmul.f32 %v222_v1, %v122_v0 }
 0x112   :  { %v242_v4 = vpack.c.bf16 %v228_v63, %v227_v22 }
 0x113   :  { %v241_v15 = vpack.c.bf16 %v226_v7, %v225_v25  ;;  %v448_v7 = vld [vmem:[%s681_s5] ss:$0 sm:$0xff] }
 0x115   :  { %476 = vmatprep.mubr.msk.bf16.mxu1 %vm267_vm5, %v241_v15 }
 0x116   :  { %477 = vmatmul.mubr.msk.bf16.vlgmr.msra.gmra.mrb[0].mxu1 %vm267_vm5, %v242_v4 }
 0x1e9   :  { %v478_v9 = vpop.f32.mrb[0].mxu1 }
 0x1ea   :  { %v325_v10 = vadd.f32 %v478_v9, %v231_v20  ;;  %v308_v11 = vpop.f32.mrb[1].mxu1  ;;  %v449_v20 = vld [vmem:[%s682_s6] ss:$0 sm:$0xff] }
 0x1eb   :  { %v323_v12 = vadd.f32 %v308_v11, %v229_v8  ;;  %v479_v13 = vpop.f32.mrb[2].mxu1 }
 0x1ec   :  { %329 = vst.msk [vmem:[#allocation2 + $0x10] sm:$0xff] %vm31_vm0, %v325_v10  ;;  %v326_v23 = vadd.f32 %v479_v13, %v232_v27  ;;  %v311_v14 = vpop.f32.mrb[3].mxu1 }
 0x1ed   :  { %327 = vst.msk [vmem:[#allocation2] sm:$0xff] %vm31_vm0, %v323_v12  ;;  %v324_v16 = vadd.f32 %v311_v14, %v230_v17 }
 0x1ee   :  { %330 = vst.msk [vmem:[#allocation2 + $0x18] sm:$0xff] %vm31_vm0, %v326_v23 }
 0x1ef   :  { %328 = vst.msk [vmem:[#allocation2 + $0x8] sm:$0xff] %vm31_vm0, %v324_v16 }
 0x1f3   :  { %v336_v18 = vld [vmem:[#allocation2 + $0x10] sm:$0xff] }
 0x1f4   :  { %v340_v24 = vadd.f32 %v336_v18, %v573_v5  ;;  %v334_v26 = vld [vmem:[#allocation2] sm:$0xff] }
 0x1f5   :  { %v338_v28 = vadd.f32 %v334_v26, %v561_v2  ;;  %v337_v29 = vld [vmem:[#allocation2 + $0x18] sm:$0xff] }
 0x1f6   :  { %v351_v30 = vadd.f32 %v447_v21, %v340_v24  ;;  %v341_v31 = vadd.f32 %v337_v29, %v578_v6  ;;  %v335_v32 = vld [vmem:[#allocation2 + $0x8] sm:$0xff] }
 0x1f7   :  { %v349_v33 = vadd.f32 %v447_v21, %v338_v28  ;;  %v339_v34 = vadd.f32 %v335_v32, %v566_v3 }
 0x1f8   :  { %v361_v35 = vsel %vm31_vm0, %v351_v30, 0.0  ;;  %v352_v36 = vadd.f32 %v447_v21, %v341_v31 }
 0x1f9   :  { %362 = vadd.xlane.f32.xlu1 %v361_v35  ;;  %v355_v37 = vsel %vm31_vm0, %v349_v33, 0.0  ;;  %v350_v38 = vadd.f32 %v447_v21, %v339_v34 }
 0x1fa   :  { %356 = vadd.xlane.f32.xlu0 %v355_v37  ;;  %v364_v5 = vsel %vm31_vm0, %v352_v36, 0.0 }
 0x1fb   :  { %v358_v2 = vsel %vm31_vm0, %v350_v38, 0.0 }
 0x1fd   :  { %365 = vadd.xlane.f32.xlu1 %v364_v5 }
 0x1fe   :  { %359 = vadd.xlane.f32.xlu0 %v358_v2 }
 0x286   :  { %v363_v39 = vpop.xlane.xlu1 %362 }
 0x287   :  { %v370_v6 = vmul.f32 0.03125, %v363_v39  ;;  %v357_v41 = vpop.xlane.xlu0 %356 }
 0x288   :  { %v368_v42 = vmul.f32 0.03125, %v357_v41 }
 0x289   :  { %v374_v44 = vsub.f32 %v351_v30, %v370_v6 }
 0x28a   :  { %v372_v3 = vsub.f32 %v349_v33, %v368_v42  ;;  %v366_v45 = vpop.xlane.xlu1 %365 }
 0x28b   :  { %v371_v46 = vmul.f32 0.03125, %v366_v45  ;;  %v360_v47 = vpop.xlane.xlu0 %359  ;;  %v378_v43 = vmul.f32 %v374_v44, %v374_v44 }
 0x28c   :  { %v369_v48 = vmul.f32 0.03125, %v360_v47  ;;  %v376_v50 = vmul.f32 %v372_v3, %v372_v3 }
 0x28d   :  { %v375_v40 = vsub.f32 %v352_v36, %v371_v46  ;;  %v386_v54 = vsel %vm31_vm0, %v378_v43, 0.0 }
 0x28e   :  { %v373_v51 = vsub.f32 %v350_v38, %v369_v48  ;;  %v380_v52 = vsel %vm31_vm0, %v376_v50, 0.0 }
 0x28f   :  { %381 = vadd.xlane.f32.xlu0 %v380_v52  ;;  %v379_v57 = vmul.f32 %v375_v40, %v375_v40 }
 0x290   :  { %v377_v53 = vmul.f32 %v373_v51, %v373_v51 }
 0x291   :  { %v389_v49 = vsel %vm31_vm0, %v379_v57, 0.0 }
 0x292   :  { %v383_v55 = vsel %vm31_vm0, %v377_v53, 0.0 }
 0x293   :  { %387 = vadd.xlane.f32.xlu0 %v386_v54  ;;  %384 = vadd.xlane.f32.xlu1 %v383_v55 }
 0x297   :  { %390 = vadd.xlane.f32.xlu1 %v389_v49 }
 0x31c   :  { %v382_v58 = vpop.xlane.xlu0 %381 }
 0x31d   :  { %v392_v59 = vmul.f32 0.03125, %v382_v58 }
 0x31f   :  { %v396_v56 = vadd.f32 1e-05, %v392_v59 }
 0x320   :  { %v385_v60 = vpop.xlane.xlu1 %384  ;;  %v388_v19 = vpop.xlane.xlu0 %387 }
 0x321   :  { %503 = vrsqrt.f32 %v396_v56  ;;  %v393_v61 = vmul.f32 0.03125, %v385_v60  ;;  %v394_v62 = vmul.f32 0.03125, %v388_v19 }
 0x323   :  { %v397_v22 = vadd.f32 1e-05, %v393_v61  ;;  %v398_v63 = vadd.f32 1e-05, %v394_v62 }
 0x324   :  { %v391_v0 = vpop.xlane.xlu1 %390 }
 0x325   :  { %505 = vrsqrt.f32 %v397_v22  ;;  %v395_v1 = vmul.f32 0.03125, %v391_v0 }
 0x326   :  { %507 = vrsqrt.f32 %v398_v63 }
 0x327   :  { %v399_v4 = vadd.f32 1e-05, %v395_v1 }
 0x329   :  { %509 = vrsqrt.f32 %v399_v4 }
 0x32b   :  { %v504_v25 = vpop.eup %503 }
 0x32c   :  { %v404_v15 = vmul.f32 %v504_v25, %v372_v3 }
 0x32e   :  { %v414_v8 = vmul.f32 %v448_v7, %v404_v15 }
 0x32f   :  { %v506_v9 = vpop.eup %505 }
 0x330   :  { %v508_v27 = vpop.eup %507  ;;  %v424_v10 = vadd.f32 %v449_v20, %v414_v8  ;;  %v405_v11 = vmul.f32 %v506_v9, %v373_v51 }
 0x331   :  { %v406_v17 = vmul.f32 %v508_v27, %v374_v44 }
 0x332   :  { %428 = vst.msk [vmem:[%s683_s7] sm:$0xff] %vm31_vm0, %v424_v10  ;;  %v415_v12 = vmul.f32 %v448_v7, %v405_v11 }
 0x333   :  { %v510_v13 = vpop.eup %509  ;;  %v416_v23 = vmul.f32 %v448_v7, %v406_v17 }
 0x334   :  { %v425_v14 = vadd.f32 %v449_v20, %v415_v12  ;;  %v407_v16 = vmul.f32 %v510_v13, %v375_v40 }
 0x335   :  { %v426_v18 = vadd.f32 %v449_v20, %v416_v23 }
 0x336   :  { %429 = vst.msk [vmem:[%s683_s7 + $0x8] sm:$0xff] %vm31_vm0, %v425_v14  ;;  %v417_v21 = vmul.f32 %v448_v7, %v407_v16 }
 0x337   :  { %430 = vst.msk [vmem:[%s683_s7 + $0x10] sm:$0xff] %vm31_vm0, %v426_v18 }
 0x338   :  { %v427_v24 = vadd.f32 %v449_v20, %v417_v21 }
 0x33a   :  { %431 = vst.msk [vmem:[%s683_s7 + $0x18] sm:$0xff] %vm31_vm0, %v427_v24 }

// kernel: informer_forward.16
= control target key start
LH: loop header
LB: loop body
LE: loop exit
PB: predicated region body
PF: predicated region fallthrough
CT: control target
= control target key end

     0   :  { %vm37_vm0 = vcmask 261120   ;;  %v601_v12 = vmov 0.0   ;;  %vm273_vm5 = vcmask 523264   ;;  %s790_s1 = inlined_call_operand.vmem [shape: bf16[32,64], index: 1, kind: input, shape index: {}]   ;;  %s791_s0 = inlined_call_operand.vmem [shape: f32[32,32], index: 0, kind: input, shape index: {}]   ;;  %s792_s3 = inlined_call_operand.vmem [shape: bf16[64,32], index: 3, kind: input, shape index: {}]   ;;  %s793_s2 = inlined_call_operand.vmem [shape: f32[1,64], index: 2, kind: input, shape index: {}]   ;;  %s794_s4 = inlined_call_operand.vmem [shape: f32[1,32], index: 4, kind: input, shape index: {}]   ;;  %s795_s5 = inlined_call_operand.vmem [shape: f32[1,32], index: 5, kind: input, shape index: {}]   ;;  %s796_s6 = inlined_call_operand.vmem [shape: f32[1,32], index: 6, kind: input, shape index: {}]   ;;  %s797_s7 = inlined_call_operand.vmem [shape: f32[1,32], index: 7, kind: input, shape index: {}]   ;;  %s798_s8 = inlined_call_operand.vmem [shape: f32[1,32], index: 8, kind: input, shape index: {}]   ;;  %s799_s9 = inlined_call_operand.vmem [shape: f32[32,32], index: 9, kind: output, shape index: {}]  }
   0x1   :  { %v563_v0 = vld [vmem:[%s790_s1] sm:$0xff]   ;;  %v564_v1 = vld [vmem:[%s790_s1 + $0x8] sm:$0xff]   ;;  %v673_v5 = vld [vmem:[%s791_s0 + $0x10] sm:$0xff]  ;;  %40 = vst.msk [vmem:[#allocation2 + $0x10] sm:$0xff] %vm37_vm0, %v601_v12 }
   0x2   :  { %542 = vmatprep.subr.bf16.mxu0 %v563_v0  ;;  %v661_v2 = vld [vmem:[%s791_s0] sm:$0xff]  ;;  %v666_v3 = vld [vmem:[%s791_s0 + $0x8] sm:$0xff]  ;;  %v678_v6 = vld [vmem:[%s791_s0 + $0x18] sm:$0xff]  ;;  %38 = vst.msk [vmem:[#allocation2] sm:$0xff] %vm37_vm0, %v601_v12 }
   0x3   :  { %543 = vmatpush3.bf16.msra.mxu0 %v563_v0  ;;  %v50_v4 = vpack.c.bf16 %v666_v3, %v661_v2  ;;  %v51_v7 = vpack.c.bf16 %v678_v6, %v673_v5  ;;  %v565_v8 = vld [vmem:[%s792_s3] sm:$0xff]   ;;  %v566_v9 = vld [vmem:[%s792_s3 + $0x8] sm:$0xff]   ;;  %v567_v10 = vld [vmem:[%s792_s3 + $0x10] sm:$0xff]   ;;  %39 = vst.msk [vmem:[#allocation2 + $0x8] sm:$0xff] %vm37_vm0, %v601_v12 }
   0x4   :  { %544 = vmatprep.subr.bf16.mxu0 %v564_v1  ;;  %550 = vmatprep.subr.bf16.mxu1 %v565_v8  ;;  %v568_v11 = vld [vmem:[%s792_s3 + $0x18] sm:$0xff]   ;;  %41 = vst.msk [vmem:[#allocation2 + $0x18] sm:$0xff] %vm37_vm0, %v601_v12  ;;  %v516_v13 = vld [vmem:[%s793_s2] ss:$0 sm:$0xff] }
   0x5   :  { %546 = vmatprep.mubr.msk.bf16.mxu0 %vm37_vm0, %v50_v4  ;;  %551 = vmatpush3.bf16.msra.mxu1 %v565_v8 }
   0x6   :  { %552 = vmatprep.subr.bf16.mxu1 %v566_v9 }
   0x7   :  { %545 = vmatpush3.bf16.msra.mxu0 %v564_v1 }
   0x9   :  { %553 = vmatpush3.bf16.msra.mxu1 %v566_v9 }
   0xa   :  { %547 = vmatmul.mubr.msk.bf16.vlgmr.msra.gmra.mrb[0].mxu0 %vm37_vm0, %v51_v7  ;;  %554 = vmatprep.subr.bf16.mxu1 %v567_v10 }
   0xd   :  { %555 = vmatpush3.bf16.msra.mxu1 %v567_v10 }
   0xe   :  { %556 = vmatprep.subr.bf16.mxu1 %v568_v11 }
  0x11   :  { %557 = vmatpush3.bf16.msra.mxu1 %v568_v11 }
  0xdd   :  { %v548_v14 = vpop.f32.mrb[0].mxu0 }
  0xde   :  { %v703_v15 = vadd.f32 %v548_v14, %v516_v13  ;;  %v112_v16 = vpop.f32.mrb[1].mxu0 }
  0xdf   :  { %v705_v17 = vadd.f32 %v516_v13, %v112_v16  ;;  %v549_v18 = vpop.f32.mrb[2].mxu0 }
  0xe0   :  { %v708_v19 = vmul.f32 0.70710677, %v703_v15  ;;  %v710_v20 = vadd.f32 %v549_v18, %v516_v13  ;;  %v115_v21 = vpop.f32.mrb[3].mxu0 }
  0xe1   :  { %v713_v22 = vmul.f32 0.70710677, %v705_v17  ;;  %v715_v23 = vadd.f32 %v516_v13, %v115_v21 }
  0xe2   :  { %v137_v24 = vand.u32 2147483647, %v708_v19  ;;  %v719_v25 = vmul.f32 0.70710677, %v710_v20  ;;  %vm217_vm1 = vcmp.ge.f32.partialorder %v708_v19, 0.0 }
  0xe3   :  { %v135_v26 = vand.u32 2147483647, %v713_v22  ;;  %v723_v27 = vmul.f32 0.70710677, %v715_v23  ;;  %vm215_vm2 = vcmp.ge.f32.partialorder %v713_v22, 0.0 }
  0xe4   :  { %v141_v28 = vmul.f32 0.3275911, %v137_v24  ;;  %v138_v29 = vand.u32 2147483647, %v719_v25  ;;  %v193_v38 = vsub.f32 0.0, %v137_v24  ;;  %vm218_vm3 = vcmp.ge.f32.partialorder %v719_v25, 0.0 }
  0xe5   :  { %v139_v30 = vmul.f32 0.3275911, %v135_v26  ;;  %v136_v31 = vand.u32 2147483647, %v723_v27  ;;  %v191_v39 = vsub.f32 0.0, %v135_v26  ;;  %vm216_vm4 = vcmp.ge.f32.partialorder %v723_v27, 0.0 }
  0xe6   :  { %v145_v32 = vadd.f32 1.0, %v141_v28  ;;  %v142_v33 = vmul.f32 0.3275911, %v138_v29  ;;  %v197_v41 = vmul.f32 %v193_v38, %v137_v24  ;;  %v194_v42 = vsub.f32 0.0, %v138_v29  ;;  %v238_v27 = vld [vmem:[#allocation2 + $0x18] sm:$0xff] }
  0xe7   :  { %v143_v34 = vadd.f32 1.0, %v139_v30  ;;  %v140_v35 = vmul.f32 0.3275911, %v136_v31  ;;  %v195_v45 = vmul.f32 %v191_v39, %v135_v26  ;;  %v192_v46 = vsub.f32 0.0, %v136_v31 }
  0xe8   :  { %569 = vrcp.f32 %v145_v32  ;;  %v146_v36 = vadd.f32 1.0, %v142_v33  ;;  %v203_v50 = vmul.f32 1.442695, %v197_v41  ;;  %v198_v51 = vmul.f32 %v194_v42, %v138_v29 }
  0xe9   :  { %571 = vrcp.f32 %v143_v34  ;;  %v144_v37 = vadd.f32 1.0, %v140_v35  ;;  %v199_v54 = vmul.f32 1.442695, %v195_v45  ;;  %v196_v57 = vmul.f32 %v192_v46, %v136_v31 }
  0xea   :  { %573 = vrcp.f32 %v146_v36  ;;  %v205_v62 = vmul.f32 1.442695, %v198_v51 }
  0xeb   :  { %575 = vrcp.f32 %v144_v37  ;;  %v201_v7 = vmul.f32 1.442695, %v196_v57 }
  0xec   :  { %577 = vpow2.f32 %v203_v50 }
  0xed   :  { %579 = vpow2.f32 %v199_v54 }
  0xee   :  { %581 = vpow2.f32 %v205_v62 }
  0xef   :  { %583 = vpow2.f32 %v201_v7 }
  0xf2   :  { %v570_v40 = vpop.eup %569 }
  0xf3   :  { %v572_v43 = vpop.eup %571  ;;  %v157_v44 = vmul.f32 1.0614054, %v570_v40 }
  0xf4   :  { %v155_v47 = vmul.f32 1.0614054, %v572_v43  ;;  %v574_v49 = vpop.eup %573 }
  0xf5   :  { %v161_v48 = vadd.f32 -1.4531521, %v157_v44  ;;  %v158_v55 = vmul.f32 1.0614054, %v574_v49  ;;  %v576_v56 = vpop.eup %575 }
  0xf6   :  { %v159_v52 = vadd.f32 -1.4531521, %v155_v47  ;;  %v156_v61 = vmul.f32 1.0614054, %v576_v56  ;;  %v578_v32 = vpop.eup %577 }
  0xf7   :  { %v165_v53 = vmul.f32 %v570_v40, %v161_v48  ;;  %v162_v60 = vadd.f32 -1.4531521, %v158_v55  ;;  %v580_v34 = vpop.eup %579 }
  0xf8   :  { %v163_v58 = vmul.f32 %v572_v43, %v159_v52  ;;  %v160_v4 = vadd.f32 -1.4531521, %v156_v61  ;;  %v582_v44 = vpop.eup %581  ;;  %v127_v61 = vmul.f32 0.5, %v705_v17  ;;  %v236_v17 = vld [vmem:[#allocation2 + $0x8] sm:$0xff] }
  0xf9   :  { %v169_v59 = vadd.f32 1.4214138, %v165_v53  ;;  %v166_v1 = vmul.f32 %v574_v49, %v162_v60  ;;  %v584_v50 = vpop.eup %583 }
  0xfa   :  { %v167_v63 = vadd.f32 1.4214138, %v163_v58  ;;  %v164_v11 = vmul.f32 %v576_v56, %v160_v4 }
  0xfb   :  { %v173_v0 = vmul.f32 %v570_v40, %v169_v59  ;;  %v170_v10 = vadd.f32 1.4214138, %v166_v1 }
  0xfc   :  { %v171_v8 = vmul.f32 %v572_v43, %v167_v63  ;;  %v168_v16 = vadd.f32 1.4214138, %v164_v11 }
  0xfd   :  { %v177_v9 = vadd.f32 -0.28449672, %v173_v0  ;;  %v174_v14 = vmul.f32 %v574_v49, %v170_v10  ;;  %v128_v0 = vmul.f32 0.5, %v715_v23 }
  0xfe   :  { %v175_v12 = vadd.f32 -0.28449672, %v171_v8  ;;  %v172_v26 = vmul.f32 %v576_v56, %v168_v16  ;;  %v235_v8 = vld [vmem:[#allocation2] sm:$0xff] }
  0xff   :  { %v181_v13 = vmul.f32 %v570_v40, %v177_v9  ;;  %v178_v24 = vadd.f32 -0.28449672, %v174_v14 }
 0x100   :  { %v179_v18 = vmul.f32 %v572_v43, %v175_v12  ;;  %v176_v31 = vadd.f32 -0.28449672, %v172_v26 }
 0x101   :  { %v185_v21 = vadd.f32 0.2548296, %v181_v13  ;;  %v182_v30 = vmul.f32 %v574_v49, %v178_v24 }
 0x102   :  { %v183_v28 = vadd.f32 0.2548296, %v179_v18  ;;  %v180_v37 = vmul.f32 %v576_v56, %v176_v31 }
 0x103   :  { %v189_v29 = vmul.f32 %v570_v40, %v185_v21  ;;  %v186_v36 = vadd.f32 0.2548296, %v182_v30  ;;  %v527_v21 = vld [vmem:[%s794_s4] ss:$0 sm:$0xff] }
 0x104   :  { %v187_v33 = vmul.f32 %v572_v43, %v183_v28  ;;  %v184_v42 = vadd.f32 0.2548296, %v180_v37 }
 0x105   :  { %v209_v35 = vmul.f32 %v578_v32, %v189_v29  ;;  %v190_v41 = vmul.f32 %v574_v49, %v186_v36  ;;  %v129_v49 = vmul.f32 0.5, %v703_v15 }
 0x106   :  { %v207_v38 = vmul.f32 %v580_v34, %v187_v33  ;;  %v188_v48 = vmul.f32 %v576_v56, %v184_v42  ;;  %v130_v56 = vmul.f32 0.5, %v710_v20  ;;  %v237_v20 = vld [vmem:[#allocation2 + $0x10] sm:$0xff] }
 0x107   :  { %v213_v39 = vsub.f32 1.0, %v209_v35  ;;  %v210_v47 = vmul.f32 %v582_v44, %v190_v41 }
 0x108   :  { %v211_v45 = vsub.f32 1.0, %v207_v38  ;;  %v208_v43 = vmul.f32 %v584_v50, %v188_v48 }
 0x109   :  { %v221_v46 = vsub.f32 0.0, %v213_v39  ;;  %v214_v52 = vsub.f32 1.0, %v210_v47 }
 0x10a   :  { %v219_v40 = vsub.f32 0.0, %v211_v45  ;;  %v212_v54 = vsub.f32 1.0, %v208_v43 }
 0x10b   :  { %v225_v51 = vsel %vm217_vm1, %v213_v39, %v221_v46  ;;  %v222_v53 = vsub.f32 0.0, %v214_v52 }
 0x10c   :  { %v223_v55 = vsel %vm215_vm2, %v211_v45, %v219_v40  ;;  %v229_v57 = vadd.f32 1.0, %v225_v51  ;;  %v220_v59 = vsub.f32 0.0, %v212_v54 }
 0x10d   :  { %v226_v58 = vsel %vm218_vm3, %v214_v52, %v222_v53  ;;  %v227_v19 = vadd.f32 1.0, %v223_v55 }
 0x10e   :  { %v230_v60 = vadd.f32 1.0, %v226_v58  ;;  %v224_v62 = vsel %vm216_vm4, %v212_v54, %v220_v59  ;;  %v233_v22 = vmul.f32 %v229_v57, %v129_v49 }
 0x10f   :  { %v228_v1 = vadd.f32 1.0, %v224_v62  ;;  %v231_v25 = vmul.f32 %v227_v19, %v127_v61 }
 0x110   :  { %v234_v63 = vmul.f32 %v230_v60, %v130_v56 }
 0x111   :  { %v232_v7 = vmul.f32 %v228_v1, %v128_v0 }
 0x112   :  { %v248_v4 = vpack.c.bf16 %v234_v63, %v233_v22 }
 0x113   :  { %v247_v15 = vpack.c.bf16 %v232_v7, %v231_v25  ;;  %v528_v7 = vld [vmem:[%s795_s5] ss:$0 sm:$0xff] }
 0x115   :  { %558 = vmatprep.mubr.msk.bf16.mxu1 %vm273_vm5, %v247_v15 }
 0x116   :  { %559 = vmatmul.mubr.msk.bf16.vlgmr.msra.gmra.mrb[0].mxu1 %vm273_vm5, %v248_v4 }
 0x1e9   :  { %v560_v9 = vpop.f32.mrb[0].mxu1 }
 0x1ea   :  { %v331_v10 = vadd.f32 %v560_v9, %v237_v20  ;;  %v314_v11 = vpop.f32.mrb[1].mxu1  ;;  %v529_v20 = vld [vmem:[%s796_s6] ss:$0 sm:$0xff] }
 0x1eb   :  { %v329_v12 = vadd.f32 %v314_v11, %v235_v8  ;;  %v561_v13 = vpop.f32.mrb[2].mxu1 }
 0x1ec   :  { %335 = vst.msk [vmem:[#allocation2 + $0x10] sm:$0xff] %vm37_vm0, %v331_v10  ;;  %v332_v23 = vadd.f32 %v561_v13, %v238_v27  ;;  %v317_v14 = vpop.f32.mrb[3].mxu1 }
 0x1ed   :  { %333 = vst.msk [vmem:[#allocation2] sm:$0xff] %vm37_vm0, %v329_v12  ;;  %v330_v16 = vadd.f32 %v317_v14, %v236_v17 }
 0x1ee   :  { %336 = vst.msk [vmem:[#allocation2 + $0x18] sm:$0xff] %vm37_vm0, %v332_v23 }
 0x1ef   :  { %334 = vst.msk [vmem:[#allocation2 + $0x8] sm:$0xff] %vm37_vm0, %v330_v16 }
 0x1f3   :  { %v342_v18 = vld [vmem:[#allocation2 + $0x10] sm:$0xff] }
 0x1f4   :  { %v346_v24 = vadd.f32 %v342_v18, %v673_v5  ;;  %v340_v26 = vld [vmem:[#allocation2] sm:$0xff] }
 0x1f5   :  { %v344_v28 = vadd.f32 %v340_v26, %v661_v2  ;;  %v343_v29 = vld [vmem:[#allocation2 + $0x18] sm:$0xff] }
 0x1f6   :  { %v357_v30 = vadd.f32 %v527_v21, %v346_v24  ;;  %v347_v31 = vadd.f32 %v343_v29, %v678_v6  ;;  %v341_v32 = vld [vmem:[#allocation2 + $0x8] sm:$0xff] }
 0x1f7   :  { %v355_v33 = vadd.f32 %v527_v21, %v344_v28  ;;  %v345_v34 = vadd.f32 %v341_v32, %v666_v3 }
 0x1f8   :  { %v367_v35 = vsel %vm37_vm0, %v357_v30, 0.0  ;;  %v358_v36 = vadd.f32 %v527_v21, %v347_v31 }
 0x1f9   :  { %368 = vadd.xlane.f32.xlu1 %v367_v35  ;;  %v361_v37 = vsel %vm37_vm0, %v355_v33, 0.0  ;;  %v356_v38 = vadd.f32 %v527_v21, %v345_v34 }
 0x1fa   :  { %362 = vadd.xlane.f32.xlu0 %v361_v37  ;;  %v370_v5 = vsel %vm37_vm0, %v358_v36, 0.0 }
 0x1fb   :  { %v364_v2 = vsel %vm37_vm0, %v356_v38, 0.0 }
 0x1fd   :  { %371 = vadd.xlane.f32.xlu1 %v370_v5 }
 0x1fe   :  { %365 = vadd.xlane.f32.xlu0 %v364_v2 }
 0x286   :  { %v369_v39 = vpop.xlane.xlu1 %368 }
 0x287   :  { %v376_v6 = vmul.f32 0.03125, %v369_v39  ;;  %v363_v41 = vpop.xlane.xlu0 %362 }
 0x288   :  { %v374_v42 = vmul.f32 0.03125, %v363_v41 }
 0x289   :  { %v380_v44 = vsub.f32 %v357_v30, %v376_v6 }
 0x28a   :  { %v378_v3 = vsub.f32 %v355_v33, %v374_v42  ;;  %v372_v45 = vpop.xlane.xlu1 %371 }
 0x28b   :  { %v377_v46 = vmul.f32 0.03125, %v372_v45  ;;  %v366_v47 = vpop.xlane.xlu0 %365  ;;  %v384_v43 = vmul.f32 %v380_v44, %v380_v44 }
 0x28c   :  { %v375_v48 = vmul.f32 0.03125, %v366_v47  ;;  %v382_v50 = vmul.f32 %v378_v3, %v378_v3 }
 0x28d   :  { %v381_v40 = vsub.f32 %v358_v36, %v377_v46  ;;  %v392_v54 = vsel %vm37_vm0, %v384_v43, 0.0 }
 0x28e   :  { %v379_v51 = vsub.f32 %v356_v38, %v375_v48  ;;  %v386_v52 = vsel %vm37_vm0, %v382_v50, 0.0 }
 0x28f   :  { %387 = vadd.xlane.f32.xlu0 %v386_v52  ;;  %v385_v57 = vmul.f32 %v381_v40, %v381_v40 }
 0x290   :  { %v383_v53 = vmul.f32 %v379_v51, %v379_v51 }
 0x291   :  { %v395_v49 = vsel %vm37_vm0, %v385_v57, 0.0 }
 0x292   :  { %v389_v55 = vsel %vm37_vm0, %v383_v53, 0.0 }
 0x293   :  { %393 = vadd.xlane.f32.xlu0 %v392_v54  ;;  %390 = vadd.xlane.f32.xlu1 %v389_v55 }
 0x297   :  { %396 = vadd.xlane.f32.xlu1 %v395_v49 }
 0x31c   :  { %v388_v58 = vpop.xlane.xlu0 %387 }
 0x31d   :  { %v398_v59 = vmul.f32 0.03125, %v388_v58 }
 0x31f   :  { %v402_v56 = vadd.f32 1e-05, %v398_v59 }
 0x320   :  { %v391_v60 = vpop.xlane.xlu1 %390  ;;  %v394_v19 = vpop.xlane.xlu0 %393 }
 0x321   :  { %585 = vrsqrt.f32 %v402_v56  ;;  %v399_v61 = vmul.f32 0.03125, %v391_v60  ;;  %v400_v62 = vmul.f32 0.03125, %v394_v19  ;;  %v530_v60 = vld [vmem:[%s797_s7] ss:$0 sm:$0xff] }
 0x323   :  { %v403_v22 = vadd.f32 1e-05, %v399_v61  ;;  %v404_v63 = vadd.f32 1e-05, %v400_v62  ;;  %v531_v61 = vld [vmem:[%s798_s8] ss:$0 sm:$0xff] }
 0x324   :  { %v397_v0 = vpop.xlane.xlu1 %396 }
 0x325   :  { %587 = vrsqrt.f32 %v403_v22  ;;  %v401_v1 = vmul.f32 0.03125, %v397_v0 }
 0x326   :  { %589 = vrsqrt.f32 %v404_v63 }
 0x327   :  { %v405_v4 = vadd.f32 1e-05, %v401_v1 }
 0x329   :  { %591 = vrsqrt.f32 %v405_v4 }
 0x32b   :  { %v586_v25 = vpop.eup %585 }
 0x32c   :  { %v410_v15 = vmul.f32 %v586_v25, %v378_v3 }
 0x32e   :  { %v420_v8 = vmul.f32 %v528_v7, %v410_v15 }
 0x32f   :  { %v588_v9 = vpop.eup %587 }
 0x330   :  { %v590_v27 = vpop.eup %589  ;;  %v430_v10 = vadd.f32 %v529_v20, %v420_v8  ;;  %v411_v11 = vmul.f32 %v588_v9, %v379_v51 }
 0x331   :  { %v412_v17 = vmul.f32 %v590_v27, %v380_v44 }
 0x332   :  { %v436_v12 = vsel %vm37_vm0, %v430_v10, 0.0  ;;  %v421_v13 = vmul.f32 %v528_v7, %v411_v11 }
 0x333   :  { %v592_v23 = vpop.eup %591  ;;  %437 = vadd.xlane.f32.xlu0 %v436_v12  ;;  %v422_v14 = vmul.f32 %v528_v7, %v412_v17 }
 0x334   :  { %v431_v16 = vadd.f32 %v529_v20, %v421_v13  ;;  %v413_v18 = vmul.f32 %v592_v23, %v381_v40 }
 0x335   :  { %v432_v21 = vadd.f32 %v529_v20, %v422_v14 }
 0x336   :  { %v439_v24 = vsel %vm37_vm0, %v431_v16, 0.0  ;;  %v423_v26 = vmul.f32 %v528_v7, %v413_v18 }
 0x337   :  { %440 = vadd.xlane.f32.xlu1 %v439_v24  ;;  %v442_v28 = vsel %vm37_vm0, %v432_v21, 0.0 }
 0x338   :  { %443 = vadd.xlane.f32.xlu0 %v442_v28  ;;  %v433_v29 = vadd.f32 %v529_v20, %v423_v26 }
 0x33a   :  { %v445_v30 = vsel %vm37_vm0, %v433_v29, 0.0 }
 0x33b   :  { %446 = vadd.xlane.f32.xlu1 %v445_v30 }
 0x3c0   :  { %v438_v31 = vpop.xlane.xlu0 %437 }
 0x3c1   :  { %v448_v32 = vmul.f32 0.03125, %v438_v31 }
 0x3c3   :  { %v452_v33 = vsub.f32 %v430_v10, %v448_v32 }
 0x3c4   :  { %v441_v34 = vpop.xlane.xlu1 %440 }
 0x3c5   :  { %v449_v35 = vmul.f32 0.03125, %v441_v34  ;;  %v444_v36 = vpop.xlane.xlu0 %443  ;;  %v456_v37 = vmul.f32 %v452_v33, %v452_v33 }
 0x3c6   :  { %v450_v38 = vmul.f32 0.03125, %v444_v36 }
 0x3c7   :  { %v453_v5 = vsub.f32 %v431_v16, %v449_v35  ;;  %v460_v2 = vsel %vm37_vm0, %v456_v37, 0.0 }
 0x3c8   :  { %v454_v39 = vsub.f32 %v432_v21, %v450_v38  ;;  %v447_v6 = vpop.xlane.xlu1 %446  ;;  %461 = vadd.xlane.f32.xlu0 %v460_v2 }
 0x3c9   :  { %v451_v41 = vmul.f32 0.03125, %v447_v6  ;;  %v457_v42 = vmul.f32 %v453_v5, %v453_v5 }
 0x3ca   :  { %v458_v44 = vmul.f32 %v454_v39, %v454_v39 }
 0x3cb   :  { %v455_v3 = vsub.f32 %v433_v29, %v451_v41  ;;  %v463_v45 = vsel %vm37_vm0, %v457_v42, 0.0 }
 0x3cc   :  { %464 = vadd.xlane.f32.xlu1 %v463_v45  ;;  %v466_v46 = vsel %vm37_vm0, %v458_v44, 0.0 }
 0x3cd   :  { %467 = vadd.xlane.f32.xlu0 %v466_v46  ;;  %v459_v47 = vmul.f32 %v455_v3, %v455_v3 }
 0x3cf   :  { %v469_v48 = vsel %vm37_vm0, %v459_v47, 0.0 }
 0x3d0   :  { %470 = vadd.xlane.f32.xlu1 %v469_v48 }
 0x455   :  { %v462_v50 = vpop.xlane.xlu0 %461 }
 0x456   :  { %v472_v40 = vmul.f32 0.03125, %v462_v50 }
 0x458   :  { %v476_v51 = vadd.f32 1e-05, %v472_v40 }
 0x459   :  { %v465_v52 = vpop.xlane.xlu1 %464 }
 0x45a   :  { %593 = vrsqrt.f32 %v476_v51  ;;  %v473_v43 = vmul.f32 0.03125, %v465_v52  ;;  %v468_v53 = vpop.xlane.xlu0 %467 }
 0x45b   :  { %v474_v54 = vmul.f32 0.03125, %v468_v53 }
 0x45c   :  { %v477_v55 = vadd.f32 1e-05, %v473_v43 }
 0x45d   :  { %v478_v57 = vadd.f32 1e-05, %v474_v54  ;;  %v471_v49 = vpop.xlane.xlu1 %470 }
 0x45e   :  { %595 = vrsqrt.f32 %v477_v55  ;;  %v475_v58 = vmul.f32 0.03125, %v471_v49 }
 0x45f   :  { %597 = vrsqrt.f32 %v478_v57 }
 0x460   :  { %v479_v59 = vadd.f32 1e-05, %v475_v58 }
 0x462   :  { %599 = vrsqrt.f32 %v479_v59 }
 0x464   :  { %v594_v56 = vpop.eup %593 }
 0x465   :  { %v484_v19 = vmul.f32 %v594_v56, %v452_v33 }
 0x467   :  { %v494_v62 = vmul.f32 %v530_v60, %v484_v19 }
 0x468   :  { %v596_v22 = vpop.eup %595 }
 0x469   :  { %v598_v63 = vpop.eup %597  ;;  %v504_v0 = vadd.f32 %v531_v61, %v494_v62  ;;  %v485_v1 = vmul.f32 %v596_v22, %v453_v5 }
 0x46a   :  { %v486_v4 = vmul.f32 %v598_v63, %v454_v39 }
 0x46b   :  { %508 = vst.msk [vmem:[%s799_s9] sm:$0xff] %vm37_vm0, %v504_v0  ;;  %v495_v25 = vmul.f32 %v530_v60, %v485_v1 }
 0x46c   :  { %v600_v7 = vpop.eup %599  ;;  %v496_v15 = vmul.f32 %v530_v60, %v486_v4 }
 0x46d   :  { %v505_v20 = vadd.f32 %v531_v61, %v495_v25  ;;  %v487_v8 = vmul.f32 %v600_v7, %v455_v3 }
 0x46e   :  { %v506_v9 = vadd.f32 %v531_v61, %v496_v15 }
 0x46f   :  { %509 = vst.msk [vmem:[%s799_s9 + $0x8] sm:$0xff] %vm37_vm0, %v505_v20  ;;  %v497_v27 = vmul.f32 %v530_v60, %v487_v8 }
 0x470   :  { %510 = vst.msk [vmem:[%s799_s9 + $0x10] sm:$0xff] %vm37_vm0, %v506_v9 }
 0x471   :  { %v507_v10 = vadd.f32 %v531_v61, %v497_v27 }
 0x473   :  { %511 = vst.msk [vmem:[%s799_s9 + $0x18] sm:$0xff] %vm37_vm0, %v507_v10 }

// kernel: informer_forward.17
= control target key start
LH: loop header
LB: loop body
LE: loop exit
PB: predicated region body
PF: predicated region fallthrough
CT: control target
= control target key end

     0   :  { %v112_v0 = vmov 0.0   ;;  %vm113_vm0 = vmmov 0   ;;  %vm41_vm1 = vcmask 261120   ;;  %vm86_vm2 = vcmask 31744   ;;  %s155_s1 = inlined_call_operand.vmem [shape: bf16[32,4], index: 1, kind: input, shape index: {}]   ;;  %s156_s0 = inlined_call_operand.vmem [shape: f32[16,32], index: 0, kind: input, shape index: {}]   ;;  %s157_s2 = inlined_call_operand.vmem [shape: f32[1,4], index: 2, kind: input, shape index: {}]   ;;  %s158_s3 = inlined_call_operand.vmem [shape: f32[16,4], index: 3, kind: output, shape index: {}]  }
   0x1   :  { %100 = vmatprep.subr.bf16.mxu0 %v112_v0  ;;  %v110_v1 = vld [vmem:[%s155_s1] sm:$0xff]   ;;  %104 = vmatprep.mubr.msk.bf16.mxu0 %vm113_vm0, %v112_v0  ;;  %v111_v2 = vld [vmem:[%s155_s1 + $0x8] sm:$0xff]  }
   0x2   :  { %101 = vmatpush3.bf16.msra.mxu0 %v110_v1  ;;  %v15_v3 = vld [vmem:[%s156_s0] sm:$0xff]  ;;  %v16_v4 = vld [vmem:[%s156_s0 + $0x8] sm:$0xff] }
   0x3   :  { %102 = vmatprep.subr.bf16.mxu0 %v112_v0  ;;  %v21_v5 = vpack.c.bf16 %v16_v4, %v15_v3  ;;  %v93_v6 = vld [vmem:[%s157_s2] ss:$0 sm:$0xff] }
   0x6   :  { %103 = vmatpush3.bf16.msra.mxu0 %v111_v2 }
   0x9   :  { %105 = vmatmul.mubr.msk.bf16.vlgmr.msra.gmra.mrb[0].mxu0 %vm41_vm1, %v21_v5 }
  0xdc   :  { %v79_v7 = vpop.f32.mrb[0].mxu0 }
  0xdd   :  { %v80_v8 = vadd.f32 %v93_v6, %v79_v7  ;;  %v106_v9 = vpop.f32.mrb[1].mxu0 }
  0xde   :  { %v82_v10 = vpop.f32.mrb[2].mxu0 }
  0xdf   :  { %87 = vst.msk [vmem:[%s158_s3] sm:$0xff] %vm86_vm2, %v80_v8  ;;  %v83_v11 = vadd.f32 %v93_v6, %v82_v10  ;;  %v107_v12 = vpop.f32.mrb[3].mxu0 }
  0xe1   :  { %88 = vst.msk [vmem:[%s158_s3 + $0x8] sm:$0xff] %vm86_vm2, %v83_v11 }

</bundles_post_ra>
